<compile_context>
chip_gen: v7x
topology: tpu7x:2x2x1
jax: 0.10.0
libtpu: 0.0.40
codegen_flags: <defaults>
</compile_context>

<pallas_src>
import functools

import jax
import jax.numpy as jnp
from jax.experimental import pallas as pl
from jax.experimental.pallas import tpu as pltpu

NHEAD = 8
LN_EPS = 1e-5
LANE = 128
VEC_LANE = 128        # lane width of the packed per-layer vector-param tile


def _layer_norm(y, gamma, beta):
    mu = jnp.mean(y, axis=-1, keepdims=True)
    yc = y - mu
    var = jnp.mean(yc * yc, axis=-1, keepdims=True)
    return yc * jax.lax.rsqrt(var + LN_EPS) * gamma + beta


def _mm(a, w_bf16):
    """MXU matmul: bf16 operands (half the weight DMA), f32 accumulate."""
    return jnp.dot(a.astype(jnp.bfloat16), w_bf16,
                   preferred_element_type=jnp.float32)


def _encoder_layer(x, w_attn, vec, b1, w1, w2,
                   attn_bias, kt_sel, v_sel, ones_bd, tile_k, tile_v):
    """One post-LN TransformerEncoderLayer on the (N, D) activation slab.

    Attention is computed with a lane-dense block-diagonal layout:
      scores (N, H*N): lanes [h*N:(h+1)*N] hold head h's (own+other batch) keys,
      cross-batch keys are killed by the precomputed additive bias.
    """
    N, D = x.shape

    # ---- unpack the packed per-layer vector params (static slices) ----
    bqkv = vec[0:1, :3 * D]
    bo = vec[1:2, :D]
    g1 = vec[2:3, :D]
    be1 = vec[3:4, :D]
    b2 = vec[4:5, :D]
    g2 = vec[5:6, :D]
    be2 = vec[6:7, :D]

    # ---- fused QKV projection (1/sqrt(dh) pre-folded into the Q columns) ----
    qkv = _mm(x, w_attn[:, :3 * D]) + bqkv                     # (N, 3D) f32
    q = qkv[:, :D].astype(jnp.bfloat16)
    kT = qkv[:, D:2 * D].T                                     # (D, N) f32 transpose
    v = qkv[:, 2 * D:].astype(jnp.bfloat16)

    # ---- block-diagonal K^T / V via const "tile" matmuls (MXU, no XLU tiling) ----
    k_bd = jnp.dot(kT.astype(jnp.bfloat16), tile_k,
                   preferred_element_type=jnp.float32) * kt_sel        # (D, H*N)
    v_bd = jnp.dot(tile_v, v,
                   preferred_element_type=jnp.float32) * v_sel         # (H*N, D)

    # ---- scores + per-head softmax, all in f32 (keep the -1e30 bias exact) ----
    s = jnp.dot(q, k_bd.astype(jnp.bfloat16),
                preferred_element_type=jnp.float32) + attn_bias        # (N, H*N)
    s = s - jnp.max(s, axis=-1, keepdims=True)   # row max over own-batch keys
    p = jnp.exp(s)                               # masked lanes -> exactly 0
    # per-head segment sums, broadcast back to every lane of the segment
    denom = jnp.dot(p.astype(jnp.bfloat16), ones_bd,
                    preferred_element_type=jnp.float32)
    p = p * pl.reciprocal(denom, approx=True)

    ctx = jnp.dot(p.astype(jnp.bfloat16), v_bd.astype(jnp.bfloat16),
                  preferred_element_type=jnp.float32)                  # (N, D)
    attn = _mm(ctx, w_attn[:, 3 * D:]) + bo

    # ---- post-LN residual blocks ----
    x1 = _layer_norm(x + attn, g1, be1)
    h1 = jnp.maximum(_mm(x1, w1) + b1, 0.0)                            # (N, FFN)
    ff = _mm(h1, w2) + b2
    return _layer_norm(x1 + ff, g2, be2)


def _fused_kernel(x0_ref, bias_ref, ktsel_ref, vsel_ref, ones_ref,
                  tilek_ref, tilev_ref,
                  wattn_ref, vecs_ref, b1_ref, w1_ref, w2_ref,
                  ow_ref, ob_ref,
                  o_ref, xs_ref, *, layers_per_step):
    """Grid axis = layer-pair (sequential / 'arbitrary').

    xs_ref (VMEM scratch) carries the (B*S, D) activation across grid steps;
    the packed weights of the next layer pair are the only per-step DMAs and
    are pipelined behind the current pair's compute by the BlockSpec machinery.
    """
    g = pl.program_id(0)

    @pl.when(g == 0)
    def _():
        xs_ref[...] = x0_ref[...]

    x = xs_ref[...]
    attn_bias = bias_ref[...]
    kt_sel = ktsel_ref[...]
    v_sel = vsel_ref[...]
    ones_bd = ones_ref[...]
    tile_k = tilek_ref[...]
    tile_v = tilev_ref[...]

    for sub in range(layers_per_step):          # static unroll (2 layers/step)
        x = _encoder_layer(x, wattn_ref[sub], vecs_ref[sub], b1_ref[sub],
                           w1_ref[sub], w2_ref[sub],
                           attn_bias, kt_sel, v_sel, ones_bd, tile_k, tile_v)

    xs_ref[...] = x

    # fused, lane-dense (128-wide) output projection on the last step
    @pl.when(g == pl.num_programs(0) - 1)
    def _():
        o_ref[...] = _mm(x, ow_ref[...]) + ob_ref[...]


def acoustic_token_generator(params, semantic_tokens, style_emb):
    """semantic_tokens: (B, S) int32, style_emb: (B, STYLE_DIM) f32."""
    B, S = semantic_tokens.shape
    vocab = params['embedding'].shape[0]

    # glue (not the hot path): embedding gather + style broadcast/concat
    x_tok = params['embedding'][semantic_tokens]                       # (B,S,Dt)
    style = jnp.broadcast_to(style_emb[:, None, :],
                             (B, S, style_emb.shape[-1]))              # (B,S,Ds)
    x = jnp.concatenate([x_tok, style], axis=-1).astype(jnp.float32)   # (B,S,D)

    N = B * S
    D = x.shape[-1]
    H = NHEAD
    dh = D // H
    HN = H * N
    xf = x.reshape(N, D)

    num_layers = params['w_attn'].shape[0]
    lps = 2 if num_layers % 2 == 0 else 1
    lane_v = params['out_w'].shape[-1]

    # ---- hoisted attention constants (DMA'd once, resident in VMEM) ----
    # additive batch-block mask, tiled per head along lanes: (N, H*N)
    ri = jnp.arange(N)[:, None] // S
    cj = (jnp.arange(HN)[None, :] % N) // S
    attn_bias = jnp.where(ri == cj, 0.0, -1e30).astype(jnp.float32)
    # head-dim selector for K_blockdiag (D, H*N) and V_blockdiag (H*N, D)
    kt_sel = (jnp.arange(D)[:, None] // dh ==
              jnp.arange(HN)[None, :] // N).astype(jnp.float32)
    v_sel = (jnp.arange(HN)[:, None] // N ==
             jnp.arange(D)[None, :] // dh).astype(jnp.float32)
    # block-diagonal ones (H*N, H*N) for per-head softmax segment sums
    ones_bd = (jnp.arange(HN)[:, None] // N ==
               jnp.arange(HN)[None, :] // N).astype(jnp.bfloat16)
    # lane/sublane replication matrices (tiling done on the idle MXU)
    tile_k = (jnp.arange(N)[:, None] ==
              jnp.arange(HN)[None, :] % N).astype(jnp.bfloat16)        # (N, HN)
    tile_v = tile_k.T                                                  # (HN, N)

    # TODO(synk): scaling guard — the (N, H*N) score slab and (N, FFN) f32
    # intermediate are kept un-tiled in VMEM; add a row-tile grid axis if B*S
    # grows to the thousands (v7x has only 64 MiB VMEM).
    # TODO(synk): on v7x, add a leading 'parallel' batch grid axis to use the
    # second TensorCore (also removes attn_bias entirely).

    def const_spec(arr):      # constant block index -> DMA'd once, stays resident
        return pl.BlockSpec(arr.shape, lambda g, nd=arr.ndim: (0,) * nd)

    def layer_spec(arr):      # stacked per-layer tensor: fetch `lps` layers/step
        return pl.BlockSpec((lps,) + arr.shape[1:], lambda g: (g, 0, 0))

    args = (xf, attn_bias, kt_sel, v_sel, ones_bd, tile_k, tile_v,
            params['w_attn'], params['vecs'], params['b1'],
            params['w1'], params['w2'],
            params['out_w'], params['out_b'])
    # TODO(synk): on v5e, if the w1/w2 DMAs become exposed, set
    # pipeline_mode=pl.Buffered(3) on their layer_specs.
    in_specs = ([const_spec(a) for a in args[:7]]
                + [layer_spec(a) for a in args[7:12]]
                + [const_spec(params['out_w']), const_spec(params['out_b'])])

    logits_pad = pl.pallas_call(
        functools.partial(_fused_kernel, layers_per_step=lps),
        out_shape=jax.ShapeDtypeStruct((N, lane_v), jnp.float32),
        grid_spec=pltpu.PrefetchScalarGridSpec(
            num_scalar_prefetch=0,
            grid=(num_layers // lps,),
            in_specs=in_specs,
            out_specs=pl.BlockSpec((N, lane_v), lambda g: (0, 0)),
            scratch_shapes=[pltpu.VMEM((N, D), jnp.float32)]),
        compiler_params=pltpu.CompilerParams(
            dimension_semantics=("arbitrary",)),   # layer axis is sequential
    )(*args)

    return logits_pad[:, :vocab].reshape(B, S, vocab)


def init_params(key, vocab_size, token_dim, style_dim, ffn_dim, num_layers):
    d = token_dim + style_dim
    dh = d // NHEAD
    scale = 1.0 / float(dh) ** 0.5
    lane_v = ((vocab_size + LANE - 1) // LANE) * LANE      # pad logits to 128 lanes
    assert 3 * d <= VEC_LANE

    def normal(k, shape, s=0.02):
        return (s * jax.random.normal(k, shape)).astype(jnp.float32)

    k_emb, k_out, k_lyr = jax.random.split(key, 3)
    lk = jax.random.split(k_lyr, 6)
    wq = normal(lk[0], (num_layers, d, d))
    wk = normal(lk[1], (num_layers, d, d))
    wv = normal(lk[2], (num_layers, d, d))
    wo = normal(lk[3], (num_layers, d, d))
    w1 = normal(lk[4], (num_layers, d, ffn_dim))
    w2 = normal(lk[5], (num_layers, ffn_dim, d))

    # packed attention weights: [scaled-Q | K | V | out-proj] -> (L, d, 4d),
    # exactly 128 lanes for d=32 (single lane-dense DMA stream per step).
    w_attn = jnp.concatenate([wq * scale, wk, wv, wo], axis=-1)

    # packed per-layer vector params (one (8,128) f32 tile per layer).
    # NOTE: when converting a real checkpoint, the Q bias must be scaled by
    # the same 1/sqrt(dh) folded into the Q weight (zeros here).
    bq = jnp.zeros((num_layers, d), jnp.float32) * scale
    bk = jnp.zeros((num_layers, d), jnp.float32)
    bv = jnp.zeros((num_layers, d), jnp.float32)
    vecs = jnp.zeros((num_layers, 8, VEC_LANE), jnp.float32)
    vecs = vecs.at[:, 0, :3 * d].set(jnp.concatenate([bq, bk, bv], axis=-1))
    vecs = vecs.at[:, 1, :d].set(jnp.zeros((num_layers, d)))     # bo
    vecs = vecs.at[:, 2, :d].set(jnp.ones((num_layers, d)))      # ln1 gamma
    vecs = vecs.at[:, 3, :d].set(jnp.zeros((num_layers, d)))     # ln1 beta
    vecs = vecs.at[:, 4, :d].set(jnp.zeros((num_layers, d)))     # b2
    vecs = vecs.at[:, 5, :d].set(jnp.ones((num_layers, d)))      # ln2 gamma
    vecs = vecs.at[:, 6, :d].set(jnp.zeros((num_layers, d)))     # ln2 beta

    out_w = normal(k_out, (d, vocab_size))
    out_w_pad = jnp.zeros((d, lane_v), jnp.float32).at[:, :vocab_size].set(out_w)

    # matmul weights in bf16 (halved HBM->VMEM traffic); everything touched by
    # the VPU (biases, LN params, activations) stays f32 (v5e has no bf16 VALU).
    return {
        'embedding': normal(k_emb, (vocab_size, token_dim)),
        'w_attn': w_attn.astype(jnp.bfloat16),                  # (L, d, 4d)
        'vecs': vecs,                                           # (L, 8, 128) f32
        'b1': jnp.zeros((num_layers, 1, ffn_dim), jnp.float32),
        'w1': w1.astype(jnp.bfloat16),                          # (L, d, ffn)
        'w2': w2.astype(jnp.bfloat16),                          # (L, ffn, d)
        'out_w': out_w_pad.astype(jnp.bfloat16),                # (d, 128)
        'out_b': jnp.zeros((1, lane_v), jnp.float32),
    }


if __name__ == "__main__":
    VOCAB_SIZE = 64
    TOKEN_DIM = 16
    STYLE_DIM = 16
    EMBED_DIM = TOKEN_DIM + STYLE_DIM     # transformer d_model (divisible by 8)
    FFN_DIM = 2048                        # nn.TransformerEncoderLayer default
    NUM_LAYERS = 6
    MAX_SEQ_LEN = 32                      # stored but unused in forward
    B, S = 2, 8

    key = jax.random.PRNGKey(0)
    k_tok, k_style, k_param = jax.random.split(key, 3)

    semantic_tokens = jax.random.randint(k_tok, (B, S), 0, VOCAB_SIZE,
                                         dtype=jnp.int32)
    style_emb = jax.random.normal(k_style, (B, STYLE_DIM), dtype=jnp.float32)
    params = init_params(k_param, VOCAB_SIZE, TOKEN_DIM, STYLE_DIM,
                         FFN_DIM, NUM_LAYERS)

    fwd = jax.jit(acoustic_token_generator)
    logits = jax.block_until_ready(fwd(params, semantic_tokens, style_emb))

    assert logits.shape == (B, S, VOCAB_SIZE), logits.shape
    assert bool(jnp.all(jnp.isfinite(logits)))
    print("KERNEL_OK")
</pallas_src>

<mosaic_0001>
module attributes {stable_mosaic.version = 11 : i64} {
  func.func @_fused_kernel(%arg0: i32, %arg1: memref<16x32xf32, #tpu.memory_space<vmem>>, %arg2: memref<16x128xf32, #tpu.memory_space<vmem>>, %arg3: memref<32x128xf32, #tpu.memory_space<vmem>>, %arg4: memref<128x32xf32, #tpu.memory_space<vmem>>, %arg5: memref<128x128xbf16, #tpu.memory_space<vmem>>, %arg6: memref<16x128xbf16, #tpu.memory_space<vmem>>, %arg7: memref<128x16xbf16, #tpu.memory_space<vmem>>, %arg8: memref<2x32x128xbf16, #tpu.memory_space<vmem>>, %arg9: memref<2x8x128xf32, #tpu.memory_space<vmem>>, %arg10: memref<2x1x2048xf32, #tpu.memory_space<vmem>>, %arg11: memref<2x32x2048xbf16, #tpu.memory_space<vmem>>, %arg12: memref<2x2048x32xbf16, #tpu.memory_space<vmem>>, %arg13: memref<32x128xbf16, #tpu.memory_space<vmem>>, %arg14: memref<1x128xf32, #tpu.memory_space<vmem>>, %arg15: memref<16x128xf32, #tpu.memory_space<vmem>>, %arg16: memref<16x32xf32, #tpu.memory_space<vmem>>) attributes {dimension_semantics = [#tpu.dimension_semantics<arbitrary>], iteration_bounds = array<i64: 3>, scalar_prefetch = 0 : i64, scratch_operands = 1 : i64, tpu.core_type = #tpu.core_type<tc>, window_params = [{pipeline_mode = #tpu.pipeline_mode<synchronous>, transform_indices = @transform_0, window_bounds = array<i64: 16, 32>}, {pipeline_mode = #tpu.pipeline_mode<synchronous>, transform_indices = @transform_1, window_bounds = array<i64: 16, 128>}, {pipeline_mode = #tpu.pipeline_mode<synchronous>, transform_indices = @transform_2, window_bounds = array<i64: 32, 128>}, {pipeline_mode = #tpu.pipeline_mode<synchronous>, transform_indices = @transform_3, window_bounds = array<i64: 128, 32>}, {pipeline_mode = #tpu.pipeline_mode<synchronous>, transform_indices = @transform_4, window_bounds = array<i64: 128, 128>}, {pipeline_mode = #tpu.pipeline_mode<synchronous>, transform_indices = @transform_5, window_bounds = array<i64: 16, 128>}, {pipeline_mode = #tpu.pipeline_mode<synchronous>, transform_indices = @transform_6, window_bounds = array<i64: 128, 16>}, {transform_indices = @transform_7, window_bounds = array<i64: 2, 32, 128>}, {transform_indices = @transform_8, window_bounds = array<i64: 2, 8, 128>}, {transform_indices = @transform_9, window_bounds = array<i64: 2, 1, 2048>}, {transform_indices = @transform_10, window_bounds = array<i64: 2, 32, 2048>}, {transform_indices = @transform_11, window_bounds = array<i64: 2, 2048, 32>}, {pipeline_mode = #tpu.pipeline_mode<synchronous>, transform_indices = @transform_12, window_bounds = array<i64: 32, 128>}, {pipeline_mode = #tpu.pipeline_mode<synchronous>, transform_indices = @transform_13, window_bounds = array<i64: 1, 128>}, {pipeline_mode = #tpu.pipeline_mode<synchronous>, transform_indices = @transform_14, window_bounds = array<i64: 16, 128>}]} {
    %c0_i32 = arith.constant 0 : i32
    %0 = arith.cmpi eq, %arg0, %c0_i32 : i32
    %1 = arith.extui %0 : i1 to i32
    %c0_i32_0 = arith.constant 0 : i32
    %2 = arith.cmpi ne, %1, %c0_i32_0 : i32
    scf.if %2 {
      %c0_87 = arith.constant 0 : index
      %c0_88 = arith.constant 0 : index
      %224 = vector.load %arg1[%c0_87, %c0_88] : memref<16x32xf32, #tpu.memory_space<vmem>>, vector<16x32xf32>
      %c0_89 = arith.constant 0 : index
      %c0_90 = arith.constant 0 : index
      %225 = vector.load %arg16[%c0_89, %c0_90] : memref<16x32xf32, #tpu.memory_space<vmem>>, vector<16x32xf32>
      tpu.vector_store %arg16[%c0_89, %c0_90], %224 {strides = array<i32>} : memref<16x32xf32, #tpu.memory_space<vmem>>, vector<16x32xf32>,
    } else {
    }
    %c0 = arith.constant 0 : index
    %c0_1 = arith.constant 0 : index
    %3 = vector.load %arg16[%c0, %c0_1] : memref<16x32xf32, #tpu.memory_space<vmem>>, vector<16x32xf32>
    %c0_2 = arith.constant 0 : index
    %c0_3 = arith.constant 0 : index
    %4 = vector.load %arg2[%c0_2, %c0_3] : memref<16x128xf32, #tpu.memory_space<vmem>>, vector<16x128xf32>
    %c0_4 = arith.constant 0 : index
    %c0_5 = arith.constant 0 : index
    %5 = vector.load %arg3[%c0_4, %c0_5] : memref<32x128xf32, #tpu.memory_space<vmem>>, vector<32x128xf32>
    %c0_6 = arith.constant 0 : index
    %c0_7 = arith.constant 0 : index
    %6 = vector.load %arg4[%c0_6, %c0_7] : memref<128x32xf32, #tpu.memory_space<vmem>>, vector<128x32xf32>
    %c0_8 = arith.constant 0 : index
    %c0_9 = arith.constant 0 : index
    %7 = vector.load %arg5[%c0_8, %c0_9] : memref<128x128xbf16, #tpu.memory_space<vmem>>, vector<128x128xbf16>
    %c0_10 = arith.constant 0 : index
    %c0_11 = arith.constant 0 : index
    %8 = vector.load %arg6[%c0_10, %c0_11] : memref<16x128xbf16, #tpu.memory_space<vmem>>, vector<16x128xbf16>
    %c0_12 = arith.constant 0 : index
    %c0_13 = arith.constant 0 : index
    %9 = vector.load %arg7[%c0_12, %c0_13] : memref<128x16xbf16, #tpu.memory_space<vmem>>, vector<128x16xbf16>
    %c0_14 = arith.constant 0 : index
    %c0_15 = arith.constant 0 : index
    %c0_16 = arith.constant 0 : index
    %10 = vector.load %arg8[%c0_14, %c0_15, %c0_16] : memref<2x32x128xbf16, #tpu.memory_space<vmem>>, vector<1x32x128xbf16>
    %11 = vector.shape_cast %10 : vector<1x32x128xbf16> to vector<32x128xbf16>
    %c0_17 = arith.constant 0 : index
    %c0_18 = arith.constant 0 : index
    %c0_19 = arith.constant 0 : index
    %12 = vector.load %arg9[%c0_17, %c0_18, %c0_19] : memref<2x8x128xf32, #tpu.memory_space<vmem>>, vector<1x8x128xf32>
    %13 = vector.shape_cast %12 : vector<1x8x128xf32> to vector<8x128xf32>
    %c0_20 = arith.constant 0 : index
    %c0_21 = arith.constant 0 : index
    %c0_22 = arith.constant 0 : index
    %14 = vector.load %arg10[%c0_20, %c0_21, %c0_22] : memref<2x1x2048xf32, #tpu.memory_space<vmem>>, vector<1x1x2048xf32>
    %15 = vector.shape_cast %14 : vector<1x1x2048xf32> to vector<1x2048xf32>
    %c0_23 = arith.constant 0 : index
    %c0_24 = arith.constant 0 : index
    %c0_25 = arith.constant 0 : index
    %16 = vector.load %arg11[%c0_23, %c0_24, %c0_25] : memref<2x32x2048xbf16, #tpu.memory_space<vmem>>, vector<1x32x2048xbf16>
    %17 = vector.shape_cast %16 : vector<1x32x2048xbf16> to vector<32x2048xbf16>
    %c0_26 = arith.constant 0 : index
    %c0_27 = arith.constant 0 : index
    %c0_28 = arith.constant 0 : index
    %18 = vector.load %arg12[%c0_26, %c0_27, %c0_28] : memref<2x2048x32xbf16, #tpu.memory_space<vmem>>, vector<1x2048x32xbf16>
    %19 = vector.shape_cast %18 : vector<1x2048x32xbf16> to vector<2048x32xbf16>
    %20 = vector.extract_strided_slice %13 {offsets = [0, 0], sizes = [1, 96], strides = [1, 1]} : vector<8x128xf32> to vector<1x96xf32>
    %21 = vector.extract_strided_slice %13 {offsets = [1, 0], sizes = [1, 32], strides = [1, 1]} : vector<8x128xf32> to vector<1x32xf32>
    %22 = vector.extract_strided_slice %13 {offsets = [2, 0], sizes = [1, 32], strides = [1, 1]} : vector<8x128xf32> to vector<1x32xf32>
    %23 = vector.extract_strided_slice %13 {offsets = [3, 0], sizes = [1, 32], strides = [1, 1]} : vector<8x128xf32> to vector<1x32xf32>
    %24 = vector.extract_strided_slice %13 {offsets = [4, 0], sizes = [1, 32], strides = [1, 1]} : vector<8x128xf32> to vector<1x32xf32>
    %25 = vector.extract_strided_slice %13 {offsets = [5, 0], sizes = [1, 32], strides = [1, 1]} : vector<8x128xf32> to vector<1x32xf32>
    %26 = vector.extract_strided_slice %13 {offsets = [6, 0], sizes = [1, 32], strides = [1, 1]} : vector<8x128xf32> to vector<1x32xf32>
    %27 = vector.extract_strided_slice %11 {offsets = [0, 0], sizes = [32, 96], strides = [1, 1]} : vector<32x128xbf16> to vector<32x96xbf16>
    %28 = arith.truncf %3 : vector<16x32xf32> to vector<16x32xbf16>
    %cst = arith.constant dense<0.000000e+00> : vector<16x96xf32>
    %29 = tpu.matmul %28, %27, %cst {dimension_numbers = #tpu.dot_dimension_numbers<[1], [0], [0], [1], [0, 0, 1, 1], [], []>} : vector<16x32xbf16>, vector<32x96xbf16>, vector<16x96xf32> -> vector<16x96xf32>
    %30 = vector.broadcast %20 : vector<1x96xf32> to vector<16x96xf32>
    %31 = arith.addf %29, %30 : vector<16x96xf32>
    %32 = vector.extract_strided_slice %31 {offsets = [0, 0], sizes = [16, 32], strides = [1, 1]} : vector<16x96xf32> to vector<16x32xf32>
    %33 = arith.truncf %32 : vector<16x32xf32> to vector<16x32xbf16>
    %34 = vector.extract_strided_slice %31 {offsets = [0, 32], sizes = [16, 32], strides = [1, 1]} : vector<16x96xf32> to vector<16x32xf32>
    %35 = tpu.transpose %34, [1, 0] : vector<16x32xf32> -> vector<32x16xf32>
    %36 = vector.extract_strided_slice %31 {offsets = [0, 64], sizes = [16, 32], strides = [1, 1]} : vector<16x96xf32> to vector<16x32xf32>
    %37 = arith.truncf %36 : vector<16x32xf32> to vector<16x32xbf16>
    %38 = arith.truncf %35 : vector<32x16xf32> to vector<32x16xbf16>
    %cst_29 = arith.constant dense<0.000000e+00> : vector<32x128xf32>
    %39 = tpu.matmul %38, %8, %cst_29 {dimension_numbers = #tpu.dot_dimension_numbers<[1], [0], [0], [1], [0, 0, 1, 1], [], []>} : vector<32x16xbf16>, vector<16x128xbf16>, vector<32x128xf32> -> vector<32x128xf32>
    %40 = arith.mulf %39, %5 : vector<32x128xf32>
    %cst_30 = arith.constant dense<0.000000e+00> : vector<128x32xf32>
    %41 = tpu.matmul %9, %37, %cst_30 {dimension_numbers = #tpu.dot_dimension_numbers<[1], [0], [0], [1], [0, 0, 1, 1], [], []>} : vector<128x16xbf16>, vector<16x32xbf16>, vector<128x32xf32> -> vector<128x32xf32>
    %42 = arith.mulf %41, %6 : vector<128x32xf32>
    %43 = arith.truncf %40 : vector<32x128xf32> to vector<32x128xbf16>
    %cst_31 = arith.constant dense<0.000000e+00> : vector<16x128xf32>
    %44 = tpu.matmul %33, %43, %cst_31 {dimension_numbers = #tpu.dot_dimension_numbers<[1], [0], [0], [1], [0, 0, 1, 1], [], []>} : vector<16x32xbf16>, vector<32x128xbf16>, vector<16x128xf32> -> vector<16x128xf32>
    %45 = arith.addf %44, %4 : vector<16x128xf32>
    %cst_32 = arith.constant dense<0xFF800000> : vector<16xf32>
    %46 = vector.multi_reduction <maximumf>, %45, %cst_32 [1] : vector<16x128xf32> to vector<16xf32>
    %47 = vector.shape_cast %46 : vector<16xf32> to vector<16x1xf32>
    %48 = vector.broadcast %47 : vector<16x1xf32> to vector<16x128xf32>
    %49 = arith.subf %45, %48 : vector<16x128xf32>
    %50 = math.exp %49 : vector<16x128xf32>
    %51 = arith.truncf %50 : vector<16x128xf32> to vector<16x128xbf16>
    %cst_33 = arith.constant dense<0.000000e+00> : vector<16x128xf32>
    %52 = tpu.matmul %51, %7, %cst_33 {dimension_numbers = #tpu.dot_dimension_numbers<[1], [0], [0], [1], [0, 0, 1, 1], [], []>} : vector<16x128xbf16>, vector<128x128xbf16>, vector<16x128xf32> -> vector<16x128xf32>
    %53 = tpu.reciprocal %52 {approx = true} : vector<16x128xf32> -> vector<16x128xf32>
    %54 = arith.mulf %50, %53 : vector<16x128xf32>
    %55 = arith.truncf %54 : vector<16x128xf32> to vector<16x128xbf16>
    %56 = arith.truncf %42 : vector<128x32xf32> to vector<128x32xbf16>
    %cst_34 = arith.constant dense<0.000000e+00> : vector<16x32xf32>
    %57 = tpu.matmul %55, %56, %cst_34 {dimension_numbers = #tpu.dot_dimension_numbers<[1], [0], [0], [1], [0, 0, 1, 1], [], []>} : vector<16x128xbf16>, vector<128x32xbf16>, vector<16x32xf32> -> vector<16x32xf32>
    %58 = vector.extract_strided_slice %11 {offsets = [0, 96], sizes = [32, 32], strides = [1, 1]} : vector<32x128xbf16> to vector<32x32xbf16>
    %59 = arith.truncf %57 : vector<16x32xf32> to vector<16x32xbf16>
    %cst_35 = arith.constant dense<0.000000e+00> : vector<16x32xf32>
    %60 = tpu.matmul %59, %58, %cst_35 {dimension_numbers = #tpu.dot_dimension_numbers<[1], [0], [0], [1], [0, 0, 1, 1], [], []>} : vector<16x32xbf16>, vector<32x32xbf16>, vector<16x32xf32> -> vector<16x32xf32>
    %61 = vector.broadcast %21 : vector<1x32xf32> to vector<16x32xf32>
    %62 = arith.addf %60, %61 : vector<16x32xf32>
    %63 = arith.addf %3, %62 : vector<16x32xf32>
    %cst_36 = arith.constant dense<0.000000e+00> : vector<16xf32>
    %64 = vector.multi_reduction <add>, %63, %cst_36 [1] : vector<16x32xf32> to vector<16xf32>
    %65 = vector.shape_cast %64 : vector<16xf32> to vector<16x1xf32>
    %cst_37 = arith.constant 3.200000e+01 : f32
    %66 = vector.broadcast %cst_37 : f32 to vector<16x1xf32>
    %67 = arith.divf %65, %66 : vector<16x1xf32>
    %68 = vector.broadcast %67 : vector<16x1xf32> to vector<16x32xf32>
    %69 = arith.subf %63, %68 : vector<16x32xf32>
    %70 = arith.mulf %69, %69 : vector<16x32xf32>
    %cst_38 = arith.constant dense<0.000000e+00> : vector<16xf32>
    %71 = vector.multi_reduction <add>, %70, %cst_38 [1] : vector<16x32xf32> to vector<16xf32>
    %72 = vector.shape_cast %71 : vector<16xf32> to vector<16x1xf32>
    %cst_39 = arith.constant 3.200000e+01 : f32
    %73 = vector.broadcast %cst_39 : f32 to vector<16x1xf32>
    %74 = arith.divf %72, %73 : vector<16x1xf32>
    %cst_40 = arith.constant 9.99999974E-6 : f32
    %75 = vector.broadcast %cst_40 : f32 to vector<16x1xf32>
    %76 = arith.addf %74, %75 : vector<16x1xf32>
    %77 = math.rsqrt %76 : vector<16x1xf32>
    %78 = vector.broadcast %77 : vector<16x1xf32> to vector<16x32xf32>
    %79 = arith.mulf %69, %78 : vector<16x32xf32>
    %80 = vector.broadcast %22 : vector<1x32xf32> to vector<16x32xf32>
    %81 = arith.mulf %79, %80 : vector<16x32xf32>
    %82 = vector.broadcast %23 : vector<1x32xf32> to vector<16x32xf32>
    %83 = arith.addf %81, %82 : vector<16x32xf32>
    %84 = arith.truncf %83 : vector<16x32xf32> to vector<16x32xbf16>
    %cst_41 = arith.constant dense<0.000000e+00> : vector<16x2048xf32>
    %85 = tpu.matmul %84, %17, %cst_41 {dimension_numbers = #tpu.dot_dimension_numbers<[1], [0], [0], [1], [0, 0, 1, 1], [], []>} : vector<16x32xbf16>, vector<32x2048xbf16>, vector<16x2048xf32> -> vector<16x2048xf32>
    %86 = vector.broadcast %15 : vector<1x2048xf32> to vector<16x2048xf32>
    %87 = arith.addf %85, %86 : vector<16x2048xf32>
    %cst_42 = arith.constant 0.000000e+00 : f32
    %88 = vector.broadcast %cst_42 : f32 to vector<16x2048xf32>
    %89 = arith.maximumf %87, %88 : vector<16x2048xf32>
    %90 = arith.truncf %89 : vector<16x2048xf32> to vector<16x2048xbf16>
    %cst_43 = arith.constant dense<0.000000e+00> : vector<16x32xf32>
    %91 = tpu.matmul %90, %19, %cst_43 {dimension_numbers = #tpu.dot_dimension_numbers<[1], [0], [0], [1], [0, 0, 1, 1], [], []>} : vector<16x2048xbf16>, vector<2048x32xbf16>, vector<16x32xf32> -> vector<16x32xf32>
    %92 = vector.broadcast %24 : vector<1x32xf32> to vector<16x32xf32>
    %93 = arith.addf %91, %92 : vector<16x32xf32>
    %94 = arith.addf %83, %93 : vector<16x32xf32>
    %cst_44 = arith.constant dense<0.000000e+00> : vector<16xf32>
    %95 = vector.multi_reduction <add>, %94, %cst_44 [1] : vector<16x32xf32> to vector<16xf32>
    %96 = vector.shape_cast %95 : vector<16xf32> to vector<16x1xf32>
    %cst_45 = arith.constant 3.200000e+01 : f32
    %97 = vector.broadcast %cst_45 : f32 to vector<16x1xf32>
    %98 = arith.divf %96, %97 : vector<16x1xf32>
    %99 = vector.broadcast %98 : vector<16x1xf32> to vector<16x32xf32>
    %100 = arith.subf %94, %99 : vector<16x32xf32>
    %101 = arith.mulf %100, %100 : vector<16x32xf32>
    %cst_46 = arith.constant dense<0.000000e+00> : vector<16xf32>
    %102 = vector.multi_reduction <add>, %101, %cst_46 [1] : vector<16x32xf32> to vector<16xf32>
    %103 = vector.shape_cast %102 : vector<16xf32> to vector<16x1xf32>
    %cst_47 = arith.constant 3.200000e+01 : f32
    %104 = vector.broadcast %cst_47 : f32 to vector<16x1xf32>
    %105 = arith.divf %103, %104 : vector<16x1xf32>
    %cst_48 = arith.constant 9.99999974E-6 : f32
    %106 = vector.broadcast %cst_48 : f32 to vector<16x1xf32>
    %107 = arith.addf %105, %106 : vector<16x1xf32>
    %108 = math.rsqrt %107 : vector<16x1xf32>
    %109 = vector.broadcast %108 : vector<16x1xf32> to vector<16x32xf32>
    %110 = arith.mulf %100, %109 : vector<16x32xf32>
    %111 = vector.broadcast %25 : vector<1x32xf32> to vector<16x32xf32>
    %112 = arith.mulf %110, %111 : vector<16x32xf32>
    %113 = vector.broadcast %26 : vector<1x32xf32> to vector<16x32xf32>
    %114 = arith.addf %112, %113 : vector<16x32xf32>
    %c1 = arith.constant 1 : index
    %c0_49 = arith.constant 0 : index
    %c0_50 = arith.constant 0 : index
    %115 = vector.load %arg8[%c1, %c0_49, %c0_50] : memref<2x32x128xbf16, #tpu.memory_space<vmem>>, vector<1x32x128xbf16>
    %116 = vector.shape_cast %115 : vector<1x32x128xbf16> to vector<32x128xbf16>
    %c1_51 = arith.constant 1 : index
    %c0_52 = arith.constant 0 : index
    %c0_53 = arith.constant 0 : index
    %117 = vector.load %arg9[%c1_51, %c0_52, %c0_53] : memref<2x8x128xf32, #tpu.memory_space<vmem>>, vector<1x8x128xf32>
    %118 = vector.shape_cast %117 : vector<1x8x128xf32> to vector<8x128xf32>
    %c1_54 = arith.constant 1 : index
    %c0_55 = arith.constant 0 : index
    %c0_56 = arith.constant 0 : index
    %119 = vector.load %arg10[%c1_54, %c0_55, %c0_56] : memref<2x1x2048xf32, #tpu.memory_space<vmem>>, vector<1x1x2048xf32>
    %120 = vector.shape_cast %119 : vector<1x1x2048xf32> to vector<1x2048xf32>
    %c1_57 = arith.constant 1 : index
    %c0_58 = arith.constant 0 : index
    %c0_59 = arith.constant 0 : index
    %121 = vector.load %arg11[%c1_57, %c0_58, %c0_59] : memref<2x32x2048xbf16, #tpu.memory_space<vmem>>, vector<1x32x2048xbf16>
    %122 = vector.shape_cast %121 : vector<1x32x2048xbf16> to vector<32x2048xbf16>
    %c1_60 = arith.constant 1 : index
    %c0_61 = arith.constant 0 : index
    %c0_62 = arith.constant 0 : index
    %123 = vector.load %arg12[%c1_60, %c0_61, %c0_62] : memref<2x2048x32xbf16, #tpu.memory_space<vmem>>, vector<1x2048x32xbf16>
    %124 = vector.shape_cast %123 : vector<1x2048x32xbf16> to vector<2048x32xbf16>
    %125 = vector.extract_strided_slice %118 {offsets = [0, 0], sizes = [1, 96], strides = [1, 1]} : vector<8x128xf32> to vector<1x96xf32>
    %126 = vector.extract_strided_slice %118 {offsets = [1, 0], sizes = [1, 32], strides = [1, 1]} : vector<8x128xf32> to vector<1x32xf32>
    %127 = vector.extract_strided_slice %118 {offsets = [2, 0], sizes = [1, 32], strides = [1, 1]} : vector<8x128xf32> to vector<1x32xf32>
    %128 = vector.extract_strided_slice %118 {offsets = [3, 0], sizes = [1, 32], strides = [1, 1]} : vector<8x128xf32> to vector<1x32xf32>
    %129 = vector.extract_strided_slice %118 {offsets = [4, 0], sizes = [1, 32], strides = [1, 1]} : vector<8x128xf32> to vector<1x32xf32>
    %130 = vector.extract_strided_slice %118 {offsets = [5, 0], sizes = [1, 32], strides = [1, 1]} : vector<8x128xf32> to vector<1x32xf32>
    %131 = vector.extract_strided_slice %118 {offsets = [6, 0], sizes = [1, 32], strides = [1, 1]} : vector<8x128xf32> to vector<1x32xf32>
    %132 = vector.extract_strided_slice %116 {offsets = [0, 0], sizes = [32, 96], strides = [1, 1]} : vector<32x128xbf16> to vector<32x96xbf16>
    %133 = arith.truncf %114 : vector<16x32xf32> to vector<16x32xbf16>
    %cst_63 = arith.constant dense<0.000000e+00> : vector<16x96xf32>
    %134 = tpu.matmul %133, %132, %cst_63 {dimension_numbers = #tpu.dot_dimension_numbers<[1], [0], [0], [1], [0, 0, 1, 1], [], []>} : vector<16x32xbf16>, vector<32x96xbf16>, vector<16x96xf32> -> vector<16x96xf32>
    %135 = vector.broadcast %125 : vector<1x96xf32> to vector<16x96xf32>
    %136 = arith.addf %134, %135 : vector<16x96xf32>
    %137 = vector.extract_strided_slice %136 {offsets = [0, 0], sizes = [16, 32], strides = [1, 1]} : vector<16x96xf32> to vector<16x32xf32>
    %138 = arith.truncf %137 : vector<16x32xf32> to vector<16x32xbf16>
    %139 = vector.extract_strided_slice %136 {offsets = [0, 32], sizes = [16, 32], strides = [1, 1]} : vector<16x96xf32> to vector<16x32xf32>
    %140 = tpu.transpose %139, [1, 0] : vector<16x32xf32> -> vector<32x16xf32>
    %141 = vector.extract_strided_slice %136 {offsets = [0, 64], sizes = [16, 32], strides = [1, 1]} : vector<16x96xf32> to vector<16x32xf32>
    %142 = arith.truncf %141 : vector<16x32xf32> to vector<16x32xbf16>
    %143 = arith.truncf %140 : vector<32x16xf32> to vector<32x16xbf16>
    %cst_64 = arith.constant dense<0.000000e+00> : vector<32x128xf32>
    %144 = tpu.matmul %143, %8, %cst_64 {dimension_numbers = #tpu.dot_dimension_numbers<[1], [0], [0], [1], [0, 0, 1, 1], [], []>} : vector<32x16xbf16>, vector<16x128xbf16>, vector<32x128xf32> -> vector<32x128xf32>
    %145 = arith.mulf %144, %5 : vector<32x128xf32>
    %cst_65 = arith.constant dense<0.000000e+00> : vector<128x32xf32>
    %146 = tpu.matmul %9, %142, %cst_65 {dimension_numbers = #tpu.dot_dimension_numbers<[1], [0], [0], [1], [0, 0, 1, 1], [], []>} : vector<128x16xbf16>, vector<16x32xbf16>, vector<128x32xf32> -> vector<128x32xf32>
    %147 = arith.mulf %146, %6 : vector<128x32xf32>
    %148 = arith.truncf %145 : vector<32x128xf32> to vector<32x128xbf16>
    %cst_66 = arith.constant dense<0.000000e+00> : vector<16x128xf32>
    %149 = tpu.matmul %138, %148, %cst_66 {dimension_numbers = #tpu.dot_dimension_numbers<[1], [0], [0], [1], [0, 0, 1, 1], [], []>} : vector<16x32xbf16>, vector<32x128xbf16>, vector<16x128xf32> -> vector<16x128xf32>
    %150 = arith.addf %149, %4 : vector<16x128xf32>
    %cst_67 = arith.constant dense<0xFF800000> : vector<16xf32>
    %151 = vector.multi_reduction <maximumf>, %150, %cst_67 [1] : vector<16x128xf32> to vector<16xf32>
    %152 = vector.shape_cast %151 : vector<16xf32> to vector<16x1xf32>
    %153 = vector.broadcast %152 : vector<16x1xf32> to vector<16x128xf32>
    %154 = arith.subf %150, %153 : vector<16x128xf32>
    %155 = math.exp %154 : vector<16x128xf32>
    %156 = arith.truncf %155 : vector<16x128xf32> to vector<16x128xbf16>
    %cst_68 = arith.constant dense<0.000000e+00> : vector<16x128xf32>
    %157 = tpu.matmul %156, %7, %cst_68 {dimension_numbers = #tpu.dot_dimension_numbers<[1], [0], [0], [1], [0, 0, 1, 1], [], []>} : vector<16x128xbf16>, vector<128x128xbf16>, vector<16x128xf32> -> vector<16x128xf32>
    %158 = tpu.reciprocal %157 {approx = true} : vector<16x128xf32> -> vector<16x128xf32>
    %159 = arith.mulf %155, %158 : vector<16x128xf32>
    %160 = arith.truncf %159 : vector<16x128xf32> to vector<16x128xbf16>
    %161 = arith.truncf %147 : vector<128x32xf32> to vector<128x32xbf16>
    %cst_69 = arith.constant dense<0.000000e+00> : vector<16x32xf32>
    %162 = tpu.matmul %160, %161, %cst_69 {dimension_numbers = #tpu.dot_dimension_numbers<[1], [0], [0], [1], [0, 0, 1, 1], [], []>} : vector<16x128xbf16>, vector<128x32xbf16>, vector<16x32xf32> -> vector<16x32xf32>
    %163 = vector.extract_strided_slice %116 {offsets = [0, 96], sizes = [32, 32], strides = [1, 1]} : vector<32x128xbf16> to vector<32x32xbf16>
    %164 = arith.truncf %162 : vector<16x32xf32> to vector<16x32xbf16>
    %cst_70 = arith.constant dense<0.000000e+00> : vector<16x32xf32>
    %165 = tpu.matmul %164, %163, %cst_70 {dimension_numbers = #tpu.dot_dimension_numbers<[1], [0], [0], [1], [0, 0, 1, 1], [], []>} : vector<16x32xbf16>, vector<32x32xbf16>, vector<16x32xf32> -> vector<16x32xf32>
    %166 = vector.broadcast %126 : vector<1x32xf32> to vector<16x32xf32>
    %167 = arith.addf %165, %166 : vector<16x32xf32>
    %168 = arith.addf %114, %167 : vector<16x32xf32>
    %cst_71 = arith.constant dense<0.000000e+00> : vector<16xf32>
    %169 = vector.multi_reduction <add>, %168, %cst_71 [1] : vector<16x32xf32> to vector<16xf32>
    %170 = vector.shape_cast %169 : vector<16xf32> to vector<16x1xf32>
    %cst_72 = arith.constant 3.200000e+01 : f32
    %171 = vector.broadcast %cst_72 : f32 to vector<16x1xf32>
    %172 = arith.divf %170, %171 : vector<16x1xf32>
    %173 = vector.broadcast %172 : vector<16x1xf32> to vector<16x32xf32>
    %174 = arith.subf %168, %173 : vector<16x32xf32>
    %175 = arith.mulf %174, %174 : vector<16x32xf32>
    %cst_73 = arith.constant dense<0.000000e+00> : vector<16xf32>
    %176 = vector.multi_reduction <add>, %175, %cst_73 [1] : vector<16x32xf32> to vector<16xf32>
    %177 = vector.shape_cast %176 : vector<16xf32> to vector<16x1xf32>
    %cst_74 = arith.constant 3.200000e+01 : f32
    %178 = vector.broadcast %cst_74 : f32 to vector<16x1xf32>
    %179 = arith.divf %177, %178 : vector<16x1xf32>
    %cst_75 = arith.constant 9.99999974E-6 : f32
    %180 = vector.broadcast %cst_75 : f32 to vector<16x1xf32>
    %181 = arith.addf %179, %180 : vector<16x1xf32>
    %182 = math.rsqrt %181 : vector<16x1xf32>
    %183 = vector.broadcast %182 : vector<16x1xf32> to vector<16x32xf32>
    %184 = arith.mulf %174, %183 : vector<16x32xf32>
    %185 = vector.broadcast %127 : vector<1x32xf32> to vector<16x32xf32>
    %186 = arith.mulf %184, %185 : vector<16x32xf32>
    %187 = vector.broadcast %128 : vector<1x32xf32> to vector<16x32xf32>
    %188 = arith.addf %186, %187 : vector<16x32xf32>
    %189 = arith.truncf %188 : vector<16x32xf32> to vector<16x32xbf16>
    %cst_76 = arith.constant dense<0.000000e+00> : vector<16x2048xf32>
    %190 = tpu.matmul %189, %122, %cst_76 {dimension_numbers = #tpu.dot_dimension_numbers<[1], [0], [0], [1], [0, 0, 1, 1], [], []>} : vector<16x32xbf16>, vector<32x2048xbf16>, vector<16x2048xf32> -> vector<16x2048xf32>
    %191 = vector.broadcast %120 : vector<1x2048xf32> to vector<16x2048xf32>
    %192 = arith.addf %190, %191 : vector<16x2048xf32>
    %cst_77 = arith.constant 0.000000e+00 : f32
    %193 = vector.broadcast %cst_77 : f32 to vector<16x2048xf32>
    %194 = arith.maximumf %192, %193 : vector<16x2048xf32>
    %195 = arith.truncf %194 : vector<16x2048xf32> to vector<16x2048xbf16>
    %cst_78 = arith.constant dense<0.000000e+00> : vector<16x32xf32>
    %196 = tpu.matmul %195, %124, %cst_78 {dimension_numbers = #tpu.dot_dimension_numbers<[1], [0], [0], [1], [0, 0, 1, 1], [], []>} : vector<16x2048xbf16>, vector<2048x32xbf16>, vector<16x32xf32> -> vector<16x32xf32>
    %197 = vector.broadcast %129 : vector<1x32xf32> to vector<16x32xf32>
    %198 = arith.addf %196, %197 : vector<16x32xf32>
    %199 = arith.addf %188, %198 : vector<16x32xf32>
    %cst_79 = arith.constant dense<0.000000e+00> : vector<16xf32>
    %200 = vector.multi_reduction <add>, %199, %cst_79 [1] : vector<16x32xf32> to vector<16xf32>
    %201 = vector.shape_cast %200 : vector<16xf32> to vector<16x1xf32>
    %cst_80 = arith.constant 3.200000e+01 : f32
    %202 = vector.broadcast %cst_80 : f32 to vector<16x1xf32>
    %203 = arith.divf %201, %202 : vector<16x1xf32>
    %204 = vector.broadcast %203 : vector<16x1xf32> to vector<16x32xf32>
    %205 = arith.subf %199, %204 : vector<16x32xf32>
    %206 = arith.mulf %205, %205 : vector<16x32xf32>
    %cst_81 = arith.constant dense<0.000000e+00> : vector<16xf32>
    %207 = vector.multi_reduction <add>, %206, %cst_81 [1] : vector<16x32xf32> to vector<16xf32>
    %208 = vector.shape_cast %207 : vector<16xf32> to vector<16x1xf32>
    %cst_82 = arith.constant 3.200000e+01 : f32
    %209 = vector.broadcast %cst_82 : f32 to vector<16x1xf32>
    %210 = arith.divf %208, %209 : vector<16x1xf32>
    %cst_83 = arith.constant 9.99999974E-6 : f32
    %211 = vector.broadcast %cst_83 : f32 to vector<16x1xf32>
    %212 = arith.addf %210, %211 : vector<16x1xf32>
    %213 = math.rsqrt %212 : vector<16x1xf32>
    %214 = vector.broadcast %213 : vector<16x1xf32> to vector<16x32xf32>
    %215 = arith.mulf %205, %214 : vector<16x32xf32>
    %216 = vector.broadcast %130 : vector<1x32xf32> to vector<16x32xf32>
    %217 = arith.mulf %215, %216 : vector<16x32xf32>
    %218 = vector.broadcast %131 : vector<1x32xf32> to vector<16x32xf32>
    %219 = arith.addf %217, %218 : vector<16x32xf32>
    %c0_84 = arith.constant 0 : index
    %c0_85 = arith.constant 0 : index
    %220 = vector.load %arg16[%c0_84, %c0_85] : memref<16x32xf32, #tpu.memory_space<vmem>>, vector<16x32xf32>
    tpu.vector_store %arg16[%c0_84, %c0_85], %219 {strides = array<i32>} : memref<16x32xf32, #tpu.memory_space<vmem>>, vector<16x32xf32>,
    %c2_i32 = arith.constant 2 : i32
    %221 = arith.cmpi eq, %arg0, %c2_i32 : i32
    %222 = arith.extui %221 : i1 to i32
    %c0_i32_86 = arith.constant 0 : i32
    %223 = arith.cmpi ne, %222, %c0_i32_86 : i32
    scf.if %223 {
      %c0_87 = arith.constant 0 : index
      %c0_88 = arith.constant 0 : index
      %224 = vector.load %arg13[%c0_87, %c0_88] : memref<32x128xbf16, #tpu.memory_space<vmem>>, vector<32x128xbf16>
      %225 = arith.truncf %219 : vector<16x32xf32> to vector<16x32xbf16>
      %cst_89 = arith.constant dense<0.000000e+00> : vector<16x128xf32>
      %226 = tpu.matmul %225, %224, %cst_89 {dimension_numbers = #tpu.dot_dimension_numbers<[1], [0], [0], [1], [0, 0, 1, 1], [], []>} : vector<16x32xbf16>, vector<32x128xbf16>, vector<16x128xf32> -> vector<16x128xf32>
      %c0_90 = arith.constant 0 : index
      %c0_91 = arith.constant 0 : index
      %227 = vector.load %arg14[%c0_90, %c0_91] : memref<1x128xf32, #tpu.memory_space<vmem>>, vector<1x128xf32>
      %228 = vector.broadcast %227 : vector<1x128xf32> to vector<16x128xf32>
      %229 = arith.addf %226, %228 : vector<16x128xf32>
      %c0_92 = arith.constant 0 : index
      %c0_93 = arith.constant 0 : index
      %230 = vector.load %arg15[%c0_92, %c0_93] : memref<16x128xf32, #tpu.memory_space<vmem>>, vector<16x128xf32>
      tpu.vector_store %arg15[%c0_92, %c0_93], %229 {strides = array<i32>} : memref<16x128xf32, #tpu.memory_space<vmem>>, vector<16x128xf32>,
    } else {
    }
    return
  }
  func.func @transform_0(%arg0: i32) -> (i32, i32) {
    %c0_i32 = arith.constant 0 : i32
    %c0_i32_0 = arith.constant 0 : i32
    %c0_i32_1 = arith.constant 0 : i32
    return %c0_i32, %c0_i32_0 : i32, i32
  }
  func.func @transform_1(%arg0: i32) -> (i32, i32) {
    %c0_i32 = arith.constant 0 : i32
    %c0_i32_0 = arith.constant 0 : i32
    %c0_i32_1 = arith.constant 0 : i32
    return %c0_i32, %c0_i32_0 : i32, i32
  }
  func.func @transform_2(%arg0: i32) -> (i32, i32) {
    %c0_i32 = arith.constant 0 : i32
    %c0_i32_0 = arith.constant 0 : i32
    %c0_i32_1 = arith.constant 0 : i32
    return %c0_i32, %c0_i32_0 : i32, i32
  }
  func.func @transform_3(%arg0: i32) -> (i32, i32) {
    %c0_i32 = arith.constant 0 : i32
    %c0_i32_0 = arith.constant 0 : i32
    %c0_i32_1 = arith.constant 0 : i32
    return %c0_i32, %c0_i32_0 : i32, i32
  }
  func.func @transform_4(%arg0: i32) -> (i32, i32) {
    %c0_i32 = arith.constant 0 : i32
    %c0_i32_0 = arith.constant 0 : i32
    %c0_i32_1 = arith.constant 0 : i32
    return %c0_i32, %c0_i32_0 : i32, i32
  }
  func.func @transform_5(%arg0: i32) -> (i32, i32) {
    %c0_i32 = arith.constant 0 : i32
    %c0_i32_0 = arith.constant 0 : i32
    %c0_i32_1 = arith.constant 0 : i32
    return %c0_i32, %c0_i32_0 : i32, i32
  }
  func.func @transform_6(%arg0: i32) -> (i32, i32) {
    %c0_i32 = arith.constant 0 : i32
    %c0_i32_0 = arith.constant 0 : i32
    %c0_i32_1 = arith.constant 0 : i32
    return %c0_i32, %c0_i32_0 : i32, i32
  }
  func.func @transform_7(%arg0: i32) -> (i32, i32, i32) {
    %c0_i32 = arith.constant 0 : i32
    %c0_i32_0 = arith.constant 0 : i32
    %c0_i32_1 = arith.constant 0 : i32
    return %arg0, %c0_i32, %c0_i32_0 : i32, i32, i32
  }
  func.func @transform_8(%arg0: i32) -> (i32, i32, i32) {
    %c0_i32 = arith.constant 0 : i32
    %c0_i32_0 = arith.constant 0 : i32
    %c0_i32_1 = arith.constant 0 : i32
    return %arg0, %c0_i32, %c0_i32_0 : i32, i32, i32
  }
  func.func @transform_9(%arg0: i32) -> (i32, i32, i32) {
    %c0_i32 = arith.constant 0 : i32
    %c0_i32_0 = arith.constant 0 : i32
    %c0_i32_1 = arith.constant 0 : i32
    return %arg0, %c0_i32, %c0_i32_0 : i32, i32, i32
  }
  func.func @transform_10(%arg0: i32) -> (i32, i32, i32) {
    %c0_i32 = arith.constant 0 : i32
    %c0_i32_0 = arith.constant 0 : i32
    %c0_i32_1 = arith.constant 0 : i32
    return %arg0, %c0_i32, %c0_i32_0 : i32, i32, i32
  }
  func.func @transform_11(%arg0: i32) -> (i32, i32, i32) {
    %c0_i32 = arith.constant 0 : i32
    %c0_i32_0 = arith.constant 0 : i32
    %c0_i32_1 = arith.constant 0 : i32
    return %arg0, %c0_i32, %c0_i32_0 : i32, i32, i32
  }
  func.func @transform_12(%arg0: i32) -> (i32, i32) {
    %c0_i32 = arith.constant 0 : i32
    %c0_i32_0 = arith.constant 0 : i32
    %c0_i32_1 = arith.constant 0 : i32
    return %c0_i32, %c0_i32_0 : i32, i32
  }
  func.func @transform_13(%arg0: i32) -> (i32, i32) {
    %c0_i32 = arith.constant 0 : i32
    %c0_i32_0 = arith.constant 0 : i32
    %c0_i32_1 = arith.constant 0 : i32
    return %c0_i32, %c0_i32_0 : i32, i32
  }
  func.func @transform_14(%arg0: i32) -> (i32, i32) {
    %c0_i32 = arith.constant 0 : i32
    %c0_i32_0 = arith.constant 0 : i32
    %c0_i32_1 = arith.constant 0 : i32
    return %c0_i32, %c0_i32_0 : i32, i32
  }
}

</mosaic_0001>

<bundles_post_ra>
// kernel: acoustic_token_generator.1
= control target key start
LH: loop header
LB: loop body
LE: loop exit
PB: predicated region body
PF: predicated region fallthrough
CT: control target
= control target key end

     0   :  { %s7884_s29 = smov 0   ;;  %s8911_s0 = inlined_call_operand.vmem [shape: f32[16,32], index: 0, kind: input, shape index: {}]   ;;  %s8912_s1 = inlined_call_operand.vmem [shape: f32[16,128], index: 1, kind: input, shape index: {}]   ;;  %s8913_s2 = inlined_call_operand.vmem [shape: f32[32,128], index: 2, kind: input, shape index: {}]   ;;  %s8914_s3 = inlined_call_operand.vmem [shape: f32[128,32], index: 3, kind: input, shape index: {}]   ;;  %s8915_s4 = inlined_call_operand.vmem [shape: bf16[128,128], index: 4, kind: input, shape index: {}]   ;;  %s8916_s5 = inlined_call_operand.vmem [shape: bf16[16,128], index: 5, kind: input, shape index: {}]   ;;  %s8917_s6 = inlined_call_operand.vmem [shape: bf16[128,16], index: 6, kind: input, shape index: {}]   ;;  %s8918_s7 = inlined_call_operand.vmem [shape: bf16[6,32,128], index: 7, kind: input, shape index: {}]   ;;  %s8919_s8 = inlined_call_operand.vmem [shape: f32[6,8,128], index: 8, kind: input, shape index: {}]   ;;  %s8920_s9 = inlined_call_operand.vmem [shape: f32[6,1,2048], index: 9, kind: input, shape index: {}]   ;;  %s8921_s10 = inlined_call_operand.vmem [shape: bf16[6,32,2048], index: 10, kind: input, shape index: {}]   ;;  %s8922_s11 = inlined_call_operand.vmem [shape: bf16[6,2048,32], index: 11, kind: input, shape index: {}]   ;;  %s8923_s12 = inlined_call_operand.vmem [shape: bf16[32,128], index: 12, kind: input, shape index: {}]   ;;  %s8924_s13 = inlined_call_operand.vmem [shape: f32[1,128], index: 13, kind: input, shape index: {}]   ;;  %s8925_s14 = inlined_call_operand.vmem [shape: f32[16,128], index: 14, kind: output, shape index: {}]  }
   0x1   :  { %8928 = sst [smem:[#allocation4_spill]] %s8918_s7 }
   0x2   :  { %8929 = sst [smem:[#allocation5_spill]] %s8924_s13 }
   0x3   :  { %8930 = sst [smem:[#allocation6_spill]] %s8925_s14 }
   0x4 LB: > { %8931 = sst [smem:[#allocation3_spill]] %s7799_s29  ;;  %s7890_s30 = sadd.s32 4294967295, %s7799_s29   ;;  %s7799_s29 = sphi %s7884_s29, %s24_s29  }
   0x5   : > { %p6101_p0 = scmp.ge.s32.totalorder %s7799_s29, 1  ;;  %p455_p1 = scmp.lt.s32.totalorder %s7799_s29, 4 }
   0x7   : > { %p456_p2 = pnand %p6101_p0, %p455_p1 }
   0x8   : > { %s6102_s15 = sshll.u32 (!%p456_p2), %s7890_s30, 1  ;;  %s8932_s7 = sld [smem:[#allocation4_spill]] (!%p456_p2) }
   0x9   : > { %459 = sbr.rel (%p456_p2) target bundleno = 6073 (0x17b9), region = 76  ;;  %p520_p3 = scmp.lt.s32.totalorder (!%p456_p2), %s6102_s15, 5 }
   0xa   : > { %p6115_p4 = scmp.ne.s32.totalorder (!%p456_p2), %s7890_s30, 0 }
  0x10   : > { %s8937_s15 = smov (!%p520_p3, %s6102_s15), 5  ;;  %556 = sbr.rel (%p6115_p4) target bundleno = 23 (0x17), region = 80 }
  0x11   : > { %s6801_s16 = sshll.u32 %s8937_s15, 4  ;;  %s6106_s17 = sshll.u32 %s8937_s15, 3  ;;  %v557_v0 = vld [vmem:[%s8911_s0] sm:$0xff] (!%p6115_p4)  ;;  %vm559_vm0 = vcmask (!%p6115_p4), 261120   ;;  %v558_v1 = vld [vmem:[%s8911_s0 + $0x8] sm:$0xff] (!%p6115_p4) }
  0x12   : > { %s7898_s20 = scalar_lea.vmem %s8932_s7, %s6801_s16  ;;  %s7903_s23 = scalar_lea.vmem %s8919_s8, %s6106_s17  ;;  %560 = vst.msk [vmem:[#allocation2] sm:$0xff] (!%p6115_p4), %vm559_vm0, %v557_v0  ;;  %561 = vst.msk [vmem:[#allocation2 + $0x8] sm:$0xff] (!%p6115_p4), %vm559_vm0, %v558_v1 }
  0x13   : > { %s7908_s26 = scalar_lea.vmem %s8920_s9, %s6801_s16  ;;  %s6802_s27 = sshll.u32 %s8937_s15, 8 }
  0x14   : > { %s7913_s14 = scalar_lea.vmem %s8921_s10, %s6802_s27  ;;  %s6803_s13 = sshll.u32 %s8937_s15, 10 }
  0x15   : > { %s7918_s7 = scalar_lea.vmem %s8922_s11, %s6803_s13 }
  0x17 PF: > { %v7437_v2 = vld [vmem:[%s7898_s20] sm:$0xff]   ;;  %v7801_v3 = vmov 0.0   ;;  %v7438_v4 = vld [vmem:[%s7898_s20 + $0x8] sm:$0xff]   ;;  %vm7802_vm1 = vmmov 0   ;;  %vm932_vm2 = vcmask 261120   ;;  %v916_v8 = vlaneseq  ;;  %s7803_s15 = smov 96  }
  0x18   : > { %7237 = vmatprep.subr.bf16.mxu0 %v7801_v3  ;;  %7241 = vmatprep.mubr.msk.bf16.mxu0 %vm7802_vm1, %v7801_v3  ;;  %v7943_v11 = vld [vmem:[%s7903_s23] sm:$0xff]  ;;  %s7804_s24 = smov 64   ;;  %vm1026_vm3 = vcmask 130048   ;;  %v568_v30 = vld [vmem:[%s8913_s2 + $0x10] sm:$0xff]  ;;  %v569_v32 = vld [vmem:[%s8913_s2 + $0x18] sm:$0xff]  ;;  %s7805_s29 = smov 32  }
  0x19   : > { %7238 = vmatpush3.bf16.msra.mxu0 %v7437_v2  ;;  %v562_v5 = vld [vmem:[#allocation2] sm:$0xff]  ;;  %v563_v6 = vld [vmem:[#allocation2 + $0x8] sm:$0xff]  ;;  %v7937_v9 = vshrl.u32 %v916_v8, 7  ;;  %v7442_v46 = vld [vmem:[%s8917_s6 + $0x10] sm:$0xff]   ;;  %p6794_p5 = scmp.ne.s32.totalorder %s7890_s30, 2 }
  0x1a   : > { %7239 = vmatprep.subr.bf16.mxu0 %v7801_v3  ;;  %v915_v7 = vpack.c.bf16 %v563_v6, %v562_v5  ;;  %v7439_v12 = vld [vmem:[%s8916_s5] sm:$0xff]   ;;  %v567_v35 = vld [vmem:[%s8913_s2 + $0x8] sm:$0xff]  ;;  %v7443_v49 = vld [vmem:[%s8917_s6 + $0x18] sm:$0xff]   ;;  %vm7808_vm4 = vmmov (!%p6794_p5), 0   ;;  %s8933_s13 = sld [smem:[#allocation5_spill]] (!%p6794_p5)  ;;  %s8934_s27 = sld [smem:[#allocation6_spill]] (!%p6794_p5) }
  0x1b   : > { %v7940_v10 = vsub.s32 0, %v7937_v9  ;;  %7245 = vmatprep.subr.bf16.mxu1 %v7439_v12  ;;  %v566_v33 = vld [vmem:[%s8913_s2] sm:$0xff]  ;;  %v7441_v45 = vld [vmem:[%s8917_s6 + $0x8] sm:$0xff]   ;;  %v7448_v51 = vld [vmem:[%s8915_s4 + $0x10] sm:$0xff]  }
  0x1c   : > { %7246 = vmatpush3.bf16.msra.mxu1 %v7439_v12  ;;  %v7440_v44 = vld [vmem:[%s8917_s6] sm:$0xff]   ;;  %v7445_v48 = vld [vmem:[%s8915_s4 + $0x8] sm:$0xff]   ;;  %v7449_v61 = vld [vmem:[%s8915_s4 + $0x18] sm:$0xff]  }
  0x1d   : > { %7240 = vmatpush3.bf16.msra.mxu0 %v7438_v4  ;;  %v919_v13 = vrot.slane %v7943_v11, %v7940_v10  ;;  %v7444_v47 = vld [vmem:[%s8915_s4] sm:$0xff]   ;;  %v7447_v52 = vld [vmem:[%s8917_s6 + $0x28] sm:$0xff]   ;;  %v7450_v62 = vld [vmem:[%s8917_s6 + $0x30] sm:$0xff]  }
  0x1e   : > { %7269 = vmatprep.subr.bf16.mxu0 %v7801_v3  ;;  %v7446_v50 = vld [vmem:[%s8917_s6 + $0x20] sm:$0xff]   ;;  %v565_v55 = vld [vmem:[%s8912_s1 + $0x8] sm:$0xff]  ;;  %v7451_v63 = vld [vmem:[%s8917_s6 + $0x38] sm:$0xff]  }
  0x1f   : > { %v564_v53 = vld [vmem:[%s8912_s1] sm:$0xff]  ;;  %v7453_v1 = vld [vmem:[%s8915_s4 + $0x28] sm:$0xff]   ;;  %v7454_v2 = vld [vmem:[%s8915_s4 + $0x30] sm:$0xff]  }
  0x20   : > { %7242 = vmatmul.mubr.msk.bf16.vlgmr.msra.gmra.mrb[0].mxu0 %vm932_vm2, %v915_v7  ;;  %v7452_v0 = vld [vmem:[%s8915_s4 + $0x20] sm:$0xff]   ;;  %v7455_v4 = vld [vmem:[%s8915_s4 + $0x38] sm:$0xff]   ;;  %v572_v5 = vld [vmem:[%s8914_s3 + $0x10] sm:$0xff] }
  0x21   : > { %7273 = vmatprep.mubr.msk.bf16.mxu0 %vm7802_vm1, %v7801_v3  ;;  %v570_v6 = vld [vmem:[%s8914_s3] sm:$0xff]  ;;  %v573_v8 = vld [vmem:[%s8914_s3 + $0x18] sm:$0xff] }
  0xf3   : > { %v970_v14 = vpop.f32.mrb[0].mxu0 }
  0xf4   : > { %v971_v15 = vadd.f32 %v970_v14, %v919_v13  ;;  %v7243_v16 = vpop.f32.mrb[1].mxu0  ;;  %v571_v14 = vld [vmem:[%s8914_s3 + $0x8] sm:$0xff] }
  0xf5   : > { %v973_v17 = vpop.f32.mrb[2].mxu0 }
  0xf6   : > { %v974_v18 = vadd.f32 %v973_v17, %v919_v13  ;;  %980 = vrot.lane.b32.xlu0 %v971_v15, %s7803_s15  ;;  %v7244_v19 = vpop.f32.mrb[3].mxu0 }
  0xf8   : > { %v977_v20 = vpack.c.bf16 %v974_v18, %v971_v15 }
  0xfa   : > { %982 = vrot.lane.b32.xlu0 %v974_v18, %s7803_s15 }
  0xfe   : > { %1127 = vrot.lane.b32.xlu0 %v977_v20, %s7804_s24 }
 0x168   : > { %v981_v21 = vpop.permute.xlu0 %980 }
 0x169   : > { %986 = vxpose.xlu1.b32.start [1/2] (short) (narrow) %v981_v21, 32 }
 0x16c   : > { %v983_v22 = vpop.permute.xlu0 %982 }
 0x16d   : > { %987 = vxpose.xlu1.b32.end [2/2] (short) (narrow) %v983_v22, 32  ;;  %v576_v22 = vld [vmem:[%s8914_s3 + $0x30] sm:$0xff] }
 0x170   : > { %v1128_v23 = vpop.permute.xlu0 %1127 }
 0x171   : > { %7251 = vmatprep.subr.bf16.mxu1 %v1128_v23 }
 0x1e9   : > { %v1002_v24 = vpop.trf.xlu1 }
 0x1ed   : > { %v1003_v25 = vpop.trf.xlu1 }
 0x1ee   : > { %v1018_v26 = vpack.c.bf16 %v1003_v25, %v1002_v24  ;;  %v577_v25 = vld [vmem:[%s8914_s3 + $0x38] sm:$0xff] }
 0x1f0   : > { %7247 = vmatprep.mubr.msk.bf16.mxu1 %vm1026_vm3, %v1018_v26 }
 0x1f1   : > { %v1004_v27 = vpop.trf.xlu1 }
 0x1f5   : > { %v1005_v28 = vpop.trf.xlu1 }
 0x1f6   : > { %v1019_v29 = vpack.c.bf16 %v1005_v28, %v1004_v27  ;;  %v575_v28 = vld [vmem:[%s8914_s3 + $0x28] sm:$0xff] }
 0x1f8   : > { %7248 = vmatmul.mubr.msk.bf16.vlgmr.msra.gmra.mrb[0].mxu1 %vm1026_vm3, %v1019_v29 }
 0x1f9   : > { %7252 = vmatpush3.bf16.msra.mxu1 %v1128_v23  ;;  %7253 = vmatprep.mubr.msk.bf16.mxu1 %vm1026_vm3, %v7440_v44  ;;  %v574_v23 = vld [vmem:[%s8914_s3 + $0x20] sm:$0xff] }
 0x1fa   : > { %7277 = vmatprep.subr.bf16.mxu1 %v7801_v3 }
 0x200   : > { %7254 = vmatmul.mubr.msk.bf16.vlgmr.msra.gmra.mrb[4].mxu1 %vm1026_vm3, %v7441_v45 }
 0x201   : > { %7257 = vmatprep.mubr.msk.bf16.mxu1 %vm1026_vm3, %v7442_v46  ;;  %7278 = vmatpush3.bf16.msra.mxu1 %v7444_v47 }
 0x202   : > { %7279 = vmatprep.subr.bf16.mxu1 %v7801_v3 }
 0x205   : > { %7280 = vmatpush3.bf16.msra.mxu1 %v7445_v48 }
 0x206   : > { %7281 = vmatprep.subr.bf16.mxu1 %v7801_v3 }
 0x208   : > { %7258 = vmatmul.mubr.msk.bf16.gmra.mrb[8].mxu1 %vm1026_vm3, %v7443_v49 }
 0x209   : > { %7261 = vmatprep.mubr.msk.bf16.mxu1 %vm1026_vm3, %v7446_v50  ;;  %7282 = vmatpush3.bf16.msra.mxu1 %v7448_v51 }
 0x20a   : > { %7283 = vmatprep.subr.bf16.mxu1 %v7801_v3 }
 0x20d   : > { %7284 = vmatpush3.bf16.msra.mxu1 %v7449_v61  ;;  %v584_v61 = vld [vmem:[%s8914_s3 + $0x70] sm:$0xff] }
 0x20e   : > { %7285 = vmatprep.subr.bf16.mxu1 %v7801_v3 }
 0x210   : > { %7262 = vmatmul.mubr.msk.bf16.gmra.mrb[12].mxu1 %vm1026_vm3, %v7447_v52 }
 0x211   : > { %7265 = vmatprep.mubr.msk.bf16.mxu1 %vm1026_vm3, %v7450_v62  ;;  %7286 = vmatpush3.bf16.msra.mxu1 %v7452_v0  ;;  %v585_v62 = vld [vmem:[%s8914_s3 + $0x78] sm:$0xff] }
 0x212   : > { %7287 = vmatprep.subr.bf16.mxu1 %v7801_v3 }
 0x215   : > { %7288 = vmatpush3.bf16.msra.mxu1 %v7453_v1  ;;  %v583_v1 = vld [vmem:[%s8914_s3 + $0x68] sm:$0xff] }
 0x216   : > { %7289 = vmatprep.subr.bf16.mxu1 %v7801_v3 }
 0x218   : > { %7266 = vmatmul.mubr.msk.bf16.gmra.mrb[16].mxu1 %vm1026_vm3, %v7451_v63 }
 0x219   : > { %7293 = vmatprep.mubr.msk.bf16.mxu1 %vm7802_vm1, %v7801_v3  ;;  %7290 = vmatpush3.bf16.msra.mxu1 %v7454_v2 }
 0x21a   : > { %7291 = vmatprep.subr.bf16.mxu1 %v7801_v3 }
 0x21d   : > { %7292 = vmatpush3.bf16.msra.mxu1 %v7455_v4 }
 0x21e   : > { %7317 = vmatprep.subr.bf16.mxu1 %v7801_v3 }
 0x2cb   : > { %v7249_v31 = vpop.f32.mrb[0].mxu1 }
 0x2cc   : > { %v1067_v34 = vpop.f32.mrb[1].mxu1  ;;  %v1084_v37 = vmul.f32 %v7249_v31, %v568_v30 }
 0x2cd   : > { %v7250_v36 = vpop.f32.mrb[2].mxu1  ;;  %v1082_v40 = vmul.f32 %v1067_v34, %v566_v33 }
 0x2ce   : > { %v1085_v38 = vmul.f32 %v7250_v36, %v569_v32  ;;  %v1070_v39 = vpop.f32.mrb[3].mxu1  ;;  %v580_v36 = vld [vmem:[%s8914_s3 + $0x50] sm:$0xff] }
 0x2cf   : > { %v1083_v41 = vmul.f32 %v1070_v39, %v567_v35  ;;  %v581_v39 = vld [vmem:[%s8914_s3 + $0x58] sm:$0xff] }
 0x2d0   : > { %v1268_v42 = vpack.c.bf16 %v1085_v38, %v1084_v37  ;;  %v578_v37 = vld [vmem:[%s8914_s3 + $0x40] sm:$0xff] }
 0x2d1   : > { %v1267_v43 = vpack.c.bf16 %v1083_v41, %v1082_v40 }
 0x2d3   : > { %7270 = vmatpush3.bf16.msra.mxu0 %v1267_v43  ;;  %v7255_v7 = vpop.f32.mrb[4].mxu1 }
 0x2d4   : > { %7271 = vmatprep.subr.bf16.mxu0 %v7801_v3  ;;  %v1253_v12 = vmul.f32 %v7255_v7, %v572_v5  ;;  %v1188_v13 = vpop.f32.mrb[5].mxu1 }
 0x2d5   : > { %v1251_v15 = vmul.f32 %v1188_v13, %v570_v6  ;;  %v7256_v16 = vpop.f32.mrb[6].mxu1  ;;  %v7746_v13 = vld [vmem:[%s7898_s20] sm:$0xff]  }
 0x2d6   : > { %v1254_v17 = vmul.f32 %v7256_v16, %v573_v8  ;;  %v1191_v18 = vpop.f32.mrb[7].mxu1 }
 0x2d7   : > { %7272 = vmatpush3.bf16.msra.mxu0 %v1268_v42  ;;  %v1252_v19 = vmul.f32 %v1191_v18, %v571_v14  ;;  %v579_v42 = vld [vmem:[%s8914_s3 + $0x48] sm:$0xff] }
 0x2d8   : > { %7297 = vmatprep.subr.bf16.mxu0 %v7801_v3  ;;  %v7747_v14 = vld [vmem:[%s7898_s20 + $0x8] sm:$0xff]  }
 0x2d9   : > { %v1418_v21 = vpack.c.bf16 %v1252_v19, %v1251_v15 }
 0x2da   : > { %7274 = vmatmul.mubr.msk.bf16.vlgmr.msra.gmra.mrb[4].mxu0 %vm932_vm2, %v977_v20  ;;  %v1419_v20 = vpack.c.bf16 %v1254_v17, %v1253_v12 }
 0x2db   : > { %7313 = vmatprep.mubr.msk.bf16.mxu0 %vm7802_vm1, %v7801_v3  ;;  %v7259_v24 = vpop.f32.mrb[8].mxu1  ;;  %7298 = vmatpush3.bf16.msra.mxu0 %v1418_v21 }
 0x2dc   : > { %v1257_v26 = vmul.f32 %v7259_v24, %v576_v22  ;;  %v1204_v27 = vpop.f32.mrb[9].mxu1  ;;  %7299 = vmatprep.subr.bf16.mxu0 %v7801_v3 }
 0x2dd   : > { %v1255_v29 = vmul.f32 %v1204_v27, %v574_v23  ;;  %v7260_v30 = vpop.f32.mrb[10].mxu1 }
 0x2de   : > { %v1258_v31 = vmul.f32 %v7260_v30, %v577_v25  ;;  %v1207_v32 = vpop.f32.mrb[11].mxu1 }
 0x2df   : > { %v1256_v33 = vmul.f32 %v1207_v32, %v575_v28  ;;  %7300 = vmatpush3.bf16.msra.mxu0 %v1419_v20 }
 0x2e0   : > { %v1421_v34 = vpack.c.bf16 %v1258_v31, %v1257_v26  ;;  %7301 = vmatprep.subr.bf16.mxu0 %v7801_v3  ;;  %v8117_v31 = vsub.s32 1, %v7937_v9 }
 0x2e1   : > { %v1420_v35 = vpack.c.bf16 %v1256_v33, %v1255_v29 }
 0x2e2   : > { %v1471_v32 = vrot.slane %v7943_v11, %v8117_v31 }
 0x2e3   : > { %v7263_v38 = vpop.f32.mrb[12].mxu1  ;;  %7302 = vmatpush3.bf16.msra.mxu0 %v1420_v35 }
 0x2e4   : > { %v1261_v40 = vmul.f32 %v7263_v38, %v580_v36  ;;  %v1220_v41 = vpop.f32.mrb[13].mxu1  ;;  %7303 = vmatprep.subr.bf16.mxu0 %v7801_v3 }
 0x2e5   : > { %v1259_v43 = vmul.f32 %v1220_v41, %v578_v37  ;;  %v7264_v44 = vpop.f32.mrb[14].mxu1 }
 0x2e6   : > { %v1262_v45 = vmul.f32 %v7264_v44, %v581_v39  ;;  %v1223_v46 = vpop.f32.mrb[15].mxu1  ;;  %v7748_v39 = vld [vmem:[#allocation2] sm:$0xff] }
 0x2e7   : > { %v1260_v47 = vmul.f32 %v1223_v46, %v579_v42  ;;  %7304 = vmatpush3.bf16.msra.mxu0 %v1421_v34  ;;  %v7749_v42 = vld [vmem:[#allocation2 + $0x8] sm:$0xff] }
 0x2e8   : > { %v1423_v48 = vpack.c.bf16 %v1262_v45, %v1261_v40  ;;  %7305 = vmatprep.subr.bf16.mxu0 %v7801_v3 }
 0x2e9   : > { %v1422_v49 = vpack.c.bf16 %v1260_v47, %v1259_v43 }
 0x2eb   : > { %7306 = vmatpush3.bf16.msra.mxu0 %v1422_v49 }
 0x2ec   : > { %7307 = vmatprep.subr.bf16.mxu0 %v7801_v3 }
 0x2ef   : > { %7308 = vmatpush3.bf16.msra.mxu0 %v1423_v48 }
 0x2f0   : > { %7309 = vmatprep.subr.bf16.mxu0 %v7801_v3 }
 0x3ad   : > { %v1306_v54 = vpop.f32.mrb[4].mxu0 }
 0x3ae   : > { %v8015_v56 = vadd.f32 %v1306_v54, %v564_v53  ;;  %v7275_v57 = vpop.f32.mrb[5].mxu0 }
 0x3af   : > { %v1309_v58 = vpop.f32.mrb[6].mxu0 }
 0x3b0   : > { %v8017_v59 = vadd.f32 %v1309_v58, %v565_v55  ;;  %1313 = vmax.xlane.f32.xlu1 %v8015_v56  ;;  %v7276_v60 = vpop.f32.mrb[7].mxu0 }
 0x3b2   : > { %1315 = vmax.xlane.f32.xlu0 %v8017_v59 }
 0x3c1   : > { %1474 = vrot.lane.b32.xlu1 %v7747_v14, %s7805_s29  ;;  %v7806_v14 = vmov 0  }
 0x3c8   : > { %1472 = vrot.lane.b32.xlu0 %v7746_v13, %s7805_s29  ;;  %v630_v13 = vld [vmem:[%s7913_s14 + $0x18] sm:$0xff] }
 0x43d   : > { %v1314_v50 = vpop.xlane.xlu1 %1313 }
 0x43e   : > { %v1317_v51 = vsub.f32 %v8015_v56, %v1314_v50  ;;  %v582_v56 = vld [vmem:[%s8914_s3 + $0x60] sm:$0xff] }
 0x43f   : > { %v1316_v52 = vpop.xlane.xlu0 %1315 }
 0x440   : > { %v1319_v53 = vmul.f32 1.442695, %v1317_v51  ;;  %v1318_v54 = vsub.f32 %v8017_v59, %v1316_v52  ;;  %v7267_v59 = vpop.f32.mrb[16].mxu1 }
 0x441   : > { %v1265_v63 = vmul.f32 %v7267_v59, %v584_v61  ;;  %v1236_v0 = vpop.f32.mrb[17].mxu1  ;;  %v1475_v25 = vpop.permute.xlu1 %1474  ;;  %v636_v61 = vld [vmem:[%s7913_s14 + $0x48] sm:$0xff] }
 0x442   : > { %v1321_v55 = vmul.f32 1.442695, %v1318_v54  ;;  %7714 = vpow2.f32 %v1319_v53  ;;  %v1263_v2 = vmul.f32 %v1236_v0, %v582_v56  ;;  %v7268_v4 = vpop.f32.mrb[18].mxu1  ;;  %v651_v0 = vld [vmem:[%s7913_s14 + $0xc0] sm:$0xff] }
 0x443   : > { %v1266_v5 = vmul.f32 %v7268_v4, %v585_v62  ;;  %v1239_v6 = vpop.f32.mrb[19].mxu1  ;;  %v1473_v19 = vpop.permute.xlu0 %1472  ;;  %v652_v4 = vld [vmem:[%s7913_s14 + $0xc8] sm:$0xff] }
 0x444   : > { %7716 = vpow2.f32 %v1321_v55  ;;  %v1264_v7 = vmul.f32 %v1239_v6, %v583_v1  ;;  %v627_v55 = vld [vmem:[%s7913_s14] sm:$0xff]  ;;  %v644_v1 = vld [vmem:[%s7913_s14 + $0x88] sm:$0xff] }
 0x445   : > { %v1425_v8 = vpack.c.bf16 %v1266_v5, %v1265_v63  ;;  %v643_v63 = vld [vmem:[%s7913_s14 + $0x80] sm:$0xff]  ;;  %v6166_v6 = vcombine.low %v644_v1, %v652_v4 }
 0x446   : > { %v1424_v12 = vpack.c.bf16 %v1264_v7, %v1263_v2  ;;  %v6165_v2 = vcombine.high %v643_v63, %v651_v0  ;;  %v6164_v5 = vcombine.low %v643_v63, %v651_v0  ;;  %v6167_v7 = vcombine.high %v644_v1, %v652_v4  ;;  %v634_v63 = vld [vmem:[%s7913_s14 + $0x38] sm:$0xff] }
 0x447   : > { %v642_v0 = vld [vmem:[%s7913_s14 + $0x78] sm:$0xff] }
 0x448   : > { %7310 = vmatpush3.bf16.msra.mxu0 %v1424_v12  ;;  %v637_v12 = vld [vmem:[%s7913_s14 + $0x50] sm:$0xff] }
 0x449   : > { %7311 = vmatprep.subr.bf16.mxu0 %v7801_v3 }
 0x44c   : > { %v7715_v57 = vpop.eup %7714  ;;  %7312 = vmatpush3.bf16.msra.mxu0 %v1425_v8  ;;  %v629_v8 = vld [vmem:[%s7913_s14 + $0x10] sm:$0xff] }
 0x44e   : > { %v7717_v58 = vpop.eup %7716 }
 0x44f   : > { %v1323_v60 = vpack.c.bf16 %v7717_v58, %v7715_v57 }
 0x451   : > { %7294 = vmatmul.mubr.bf16.vlgmr.msra.gmra.mrb[20].mxu1 %v1323_v60 }
 0x452   : > { %7321 = vmatprep.mubr.msk.bf16.mxu1 %vm7802_vm1, %v7801_v3  ;;  %7318 = vmatpush3.bf16.msra.mxu1 %v1473_v19 }
 0x453   : > { %7319 = vmatprep.subr.bf16.mxu1 %v7801_v3 }
 0x456   : > { %7320 = vmatpush3.bf16.msra.mxu1 %v1475_v25 }
 0x524   : > { %v1406_v15 = vpop.f32.mrb[20].mxu1 }
 0x525   : > { %7718 = vrcp.f32 %v1406_v15  ;;  %v7295_v16 = vpop.f32.mrb[21].mxu1  ;;  %v6153_v15 = vcombine.high %v629_v8, %v637_v12 }
 0x526   : > { %v1409_v17 = vpop.f32.mrb[22].mxu1  ;;  %v638_v16 = vld [vmem:[%s7913_s14 + $0x58] sm:$0xff] }
 0x527   : > { %7720 = vrcp.f32 %v1409_v17  ;;  %v7296_v18 = vpop.f32.mrb[23].mxu1  ;;  %v6152_v17 = vcombine.low %v629_v8, %v637_v12  ;;  %v6155_v19 = vcombine.high %v630_v13, %v638_v16  ;;  %v650_v8 = vld [vmem:[%s7913_s14 + $0xb8] sm:$0xff] }
 0x528   : > { %v6154_v18 = vcombine.low %v630_v13, %v638_v16  ;;  %v658_v12 = vld [vmem:[%s7913_s14 + $0xf8] sm:$0xff] }
 0x52f   : > { %v7719_v20 = vpop.eup %7718 }
 0x530   : > { %v1415_v22 = vmul.f32 %v7719_v20, %v7715_v57  ;;  %v635_v57 = vld [vmem:[%s7913_s14 + $0x40] sm:$0xff] }
 0x531   : > { %v7721_v21 = vpop.eup %7720  ;;  %v6149_v60 = vcombine.high %v627_v55, %v635_v57  ;;  %v6148_v56 = vcombine.low %v627_v55, %v635_v57  ;;  %v648_v55 = vld [vmem:[%s7913_s14 + $0xa8] sm:$0xff] }
 0x532   : > { %v1416_v23 = vmul.f32 %v7721_v21, %v7717_v58  ;;  %v628_v58 = vld [vmem:[%s7913_s14 + $0x8] sm:$0xff] }
 0x533   : > { %v6150_v59 = vcombine.low %v628_v58, %v636_v61  ;;  %v6151_v62 = vcombine.high %v628_v58, %v636_v61  ;;  %1809 = vmatprep.subr.bf16.mxu0 %v6149_v60  ;;  %v656_v57 = vld [vmem:[%s7913_s14 + $0xe8] sm:$0xff] }
 0x534   : > { %v1417_v24 = vpack.c.bf16 %v1416_v23, %v1415_v22 }
 0x535   : > { %1852 = vmatprep.subr.bf16.mxu1 %v6151_v62  ;;  %v641_v62 = vld [vmem:[%s7913_s14 + $0x70] sm:$0xff] }
 0x536   : > { %7314 = vmatmul.mubr.bf16.vlgmr.msra.gmra.mrb[8].mxu0 %v1417_v24 }
 0x537   : > { %1810 = vmatpush1.bf16.msra.mxu0 %v6148_v56  ;;  %1841 = vmatprep.mubr.bf16.mxu0 %v7806_v14  ;;  %v6175_v56 = vcombine.high %v648_v55, %v656_v57 }
 0x538   : > { %1811 = vmatprep.subr.bf16.mxu0 %v6165_v2  ;;  %v6174_v2 = vcombine.low %v648_v55, %v656_v57  ;;  %v7487_v55 = vld [vmem:[%s7918_s7 + $0xb8] sm:$0xff]   ;;  %v7488_v57 = vld [vmem:[%s7918_s7 + $0x140] sm:$0xff]  }
 0x53b   : > { %1812 = vmatpush1.bf16.msra.mxu0 %v6164_v5  ;;  %v6163_v5 = vcombine.high %v634_v63, %v642_v0 }
 0x53c   : > { %1895 = vmatprep.subr.bf16.mxu0 %v6153_v15  ;;  %v6162_v15 = vcombine.low %v634_v63, %v642_v0  ;;  %v8239_v63 = vsub.s32 4, %v7937_v9  ;;  %v8242_v0 = vsub.s32 6, %v7937_v9 }
 0x609   : > { %v1460_v26 = vpop.f32.mrb[8].mxu0 }
 0x60a   : > { %v7315_v27 = vpop.f32.mrb[9].mxu0 }
 0x60b   : > { %v1463_v28 = vpop.f32.mrb[10].mxu0 }
 0x60c   : > { %v1467_v29 = vpack.c.bf16 %v1463_v28, %v1460_v26  ;;  %v7316_v30 = vpop.f32.mrb[11].mxu0  ;;  %v8140_v26 = vsub.s32 2, %v7937_v9 }
 0x60e   : > { %7322 = vmatmul.mubr.msk.bf16.vlgmr.msra.gmra.mrb[24].mxu1 %vm932_vm2, %v1467_v29  ;;  %v1554_v28 = vrot.slane %v7943_v11, %v8140_v26  ;;  %v8145_v29 = vsub.s32 3, %v7937_v9 }
 0x60f   : > { %1853 = vmatpush1.bf16.msra.mxu1 %v6150_v59  ;;  %1884 = vmatprep.mubr.bf16.mxu1 %v7806_v14  ;;  %v633_v59 = vld [vmem:[%s7913_s14 + $0x30] sm:$0xff] }
 0x610   : > { %1854 = vmatprep.subr.bf16.mxu1 %v6167_v7  ;;  %v6161_v4 = vcombine.high %v633_v59, %v641_v62  ;;  %v657_v7 = vld [vmem:[%s7913_s14 + $0xf0] sm:$0xff]  ;;  %v6160_v13 = vcombine.low %v633_v59, %v641_v62 }
 0x613   : > { %1855 = vmatpush1.bf16.msra.mxu1 %v6166_v6  ;;  %v649_v6 = vld [vmem:[%s7913_s14 + $0xb0] sm:$0xff] }
 0x614   : > { %1938 = vmatprep.subr.bf16.mxu1 %v6155_v19  ;;  %v6177_v16 = vcombine.high %v649_v6, %v657_v7  ;;  %v6178_v19 = vcombine.low %v650_v8, %v658_v12 }
 0x6e1   : > { %v1515_v33 = vpop.f32.mrb[24].mxu1 }
 0x6e2   : > { %v1516_v34 = vadd.f32 %v1515_v33, %v1471_v32  ;;  %v7323_v35 = vpop.f32.mrb[25].mxu1  ;;  %v1560_v33 = vrot.slane %v7943_v11, %v8145_v29  ;;  %v631_v11 = vld [vmem:[%s7913_s14 + $0x20] sm:$0xff] }
 0x6e3   : > { %v1518_v36 = vpop.f32.mrb[26].mxu1 }
 0x6e4   : > { %v1519_v37 = vadd.f32 %v1518_v36, %v1471_v32  ;;  %v7324_v38 = vpop.f32.mrb[27].mxu1  ;;  %v1522_v40 = vadd.f32 %v7748_v39, %v1516_v34  ;;  %v646_v39 = vld [vmem:[%s7913_s14 + $0x98] sm:$0xff] }
 0x6e5   : > { %v653_v38 = vld [vmem:[%s7913_s14 + $0xd0] sm:$0xff] }
 0x6e6   : > { %v1524_v41 = vsel %vm932_vm2, %v1522_v40, 0.0  ;;  %v1523_v43 = vadd.f32 %v7749_v42, %v1519_v37  ;;  %v645_v37 = vld [vmem:[%s7913_s14 + $0x90] sm:$0xff] }
 0x6e7   : > { %1525 = vadd.xlane.f32.xlu0 %v1524_v41 }
 0x6e8   : > { %v1527_v44 = vsel %vm932_vm2, %v1523_v43, 0.0 }
 0x6e9   : > { %1528 = vadd.xlane.f32.xlu1 %v1527_v44  ;;  %v6169_v44 = vcombine.high %v645_v37, %v653_v38 }
 0x774   : > { %v1526_v45 = vpop.xlane.xlu0 %1525 }
 0x775   : > { %v1531_v46 = vmul.f32 0.03125, %v1526_v45 }
 0x776   : > { %v1529_v47 = vpop.xlane.xlu1 %1528 }
 0x777   : > { %v1533_v48 = vsub.f32 %v1522_v40, %v1531_v46  ;;  %v1532_v49 = vmul.f32 0.03125, %v1529_v47  ;;  %v654_v40 = vld [vmem:[%s7913_s14 + $0xd8] sm:$0xff]  ;;  %v639_v46 = vld [vmem:[%s7913_s14 + $0x60] sm:$0xff]  ;;  %v632_v47 = vld [vmem:[%s7913_s14 + $0x28] sm:$0xff] }
 0x778   : > { %v6171_v45 = vcombine.high %v646_v39, %v654_v40  ;;  %v6156_v58 = vcombine.low %v631_v11, %v639_v46 }
 0x779   : > { %v1534_v50 = vsub.f32 %v1523_v43, %v1532_v49  ;;  %v1535_v51 = vmul.f32 %v1533_v48, %v1533_v48  ;;  %v6168_v49 = vcombine.low %v645_v37, %v653_v38  ;;  %v7470_v37 = vld [vmem:[%s7918_s7 + $0x18] sm:$0xff]  }
 0x77a   : > { %v7471_v38 = vld [vmem:[%s7918_s7 + $0x98] sm:$0xff]  }
 0x77b   : > { %v1537_v52 = vsel %vm932_vm2, %v1535_v51, 0.0  ;;  %v1536_v53 = vmul.f32 %v1534_v50, %v1534_v50  ;;  %v6157_v51 = vcombine.high %v631_v11, %v639_v46  ;;  %v7477_v11 = vld [vmem:[%s7918_s7 + $0xe8] sm:$0xff]  }
 0x77c   : > { %1538 = vadd.xlane.f32.xlu0 %v1537_v52  ;;  %v7478_v46 = vld [vmem:[%s7918_s7 + $0x28] sm:$0xff]  }
 0x77d   : > { %v1540_v54 = vsel %vm932_vm2, %v1536_v53, 0.0  ;;  %v647_v53 = vld [vmem:[%s7913_s14 + $0xa0] sm:$0xff] }
 0x780   : > { %1541 = vadd.xlane.f32.xlu0 %v1540_v54  ;;  %v655_v54 = vld [vmem:[%s7913_s14 + $0xe0] sm:$0xff] }
 0x781   : > { %v6173_v61 = vcombine.high %v647_v53, %v655_v54  ;;  %v6172_v1 = vcombine.low %v647_v53, %v655_v54  ;;  %v7485_v53 = vld [vmem:[%s7918_s7 + $0xf8] sm:$0xff]  }
 0x782   : > { %v7486_v54 = vld [vmem:[%s7918_s7 + $0x38] sm:$0xff]  }
 0x809   : > { %v1539_v20 = vpop.xlane.xlu0 %1538 }
 0x80a   : > { %v1543_v21 = vmul.f32 0.03125, %v1539_v20  ;;  %v7456_v20 = vld [vmem:[%s7918_s7 + $0x40] sm:$0xff]  }
 0x80c   : > { %v1545_v22 = vadd.f32 1e-05, %v1543_v21  ;;  %v7457_v21 = vld [vmem:[%s7918_s7 + $0xc0] sm:$0xff]  }
 0x80d   : > { %v1542_v23 = vpop.xlane.xlu0 %1541 }
 0x80e   : > { %7722 = vrsqrt.f32 %v1545_v22  ;;  %v1544_v24 = vmul.f32 0.03125, %v1542_v23  ;;  %v7458_v22 = vld [vmem:[%s7918_s7] sm:$0xff]  }
 0x80f   : > { %v7459_v23 = vld [vmem:[%s7918_s7 + $0x80] sm:$0xff]  }
 0x810   : > { %v1546_v25 = vadd.f32 1e-05, %v1544_v24  ;;  %v7460_v24 = vld [vmem:[%s7918_s7 + $0x48] sm:$0xff]  }
 0x812   : > { %7724 = vrsqrt.f32 %v1546_v25  ;;  %v7461_v25 = vld [vmem:[%s7918_s7 + $0xc8] sm:$0xff]  }
 0x818   : > { %v7723_v27 = vpop.eup %7722 }
 0x819   : > { %v1549_v30 = vmul.f32 %v7723_v27, %v1533_v48  ;;  %v640_v48 = vld [vmem:[%s7913_s14 + $0x68] sm:$0xff] }
 0x81a   : > { %v6159_v52 = vcombine.high %v632_v47, %v640_v48  ;;  %v6158_v60 = vcombine.low %v632_v47, %v640_v48  ;;  %v7462_v27 = vld [vmem:[%s7918_s7 + $0x8] sm:$0xff]   ;;  %v7480_v48 = vld [vmem:[%s7918_s7 + $0x70] sm:$0xff]  }
 0x81b   : > { %v1555_v34 = vmul.f32 %v1554_v28, %v1549_v30  ;;  %v7464_v30 = vld [vmem:[%s7918_s7 + $0x50] sm:$0xff]   ;;  %v7479_v47 = vld [vmem:[%s7918_s7 + $0xa8] sm:$0xff]  }
 0x81c   : > { %v7725_v32 = vpop.eup %7724 }
 0x81d   : > { %v1550_v35 = vmul.f32 %v7725_v32, %v1534_v50  ;;  %v8153_v41 = vadd.f32 %v1560_v33, %v1555_v34  ;;  %v6170_v50 = vcombine.low %v646_v39, %v654_v40  ;;  %v7465_v32 = vld [vmem:[%s7918_s7 + $0xd0] sm:$0xff]   ;;  %v7472_v39 = vld [vmem:[%s7918_s7 + $0x60] sm:$0xff]  }
 0x81e   : > { %v7467_v34 = vld [vmem:[%s7918_s7 + $0x90] sm:$0xff]   ;;  %v7473_v40 = vld [vmem:[%s7918_s7 + $0xe0] sm:$0xff]  }
 0x81f   : > { %v1556_v36 = vmul.f32 %v1554_v28, %v1550_v35  ;;  %v7463_v28 = vld [vmem:[%s7918_s7 + $0x88] sm:$0xff]   ;;  %v7468_v35 = vld [vmem:[%s7918_s7 + $0x58] sm:$0xff]  }
 0x821   : > { %v8155_v42 = vadd.f32 %v1560_v33, %v1556_v36  ;;  %v7466_v33 = vld [vmem:[%s7918_s7 + $0x10] sm:$0xff]   ;;  %v7469_v36 = vld [vmem:[%s7918_s7 + $0xd8] sm:$0xff]  }
 0x823   : > { %v8159_v43 = vpack.c.bf16 %v8155_v42, %v8153_v41 }
 0x825   : > { %6180 = vmatmul.mubr.msk.bf16.vlgmr.msra.gmra.mrb[12].mxu0 %vm932_vm2, %v8159_v43  ;;  %6181 = vmatmul.mubr.msk.bf16.vlgmr.msra.gmra.mrb[28].mxu1 %vm932_vm2, %v8159_v43 }
 0x826   : > { %1896 = vmatpush1.bf16.msra.mxu0 %v6152_v17  ;;  %1939 = vmatpush1.bf16.msra.mxu1 %v6154_v18  ;;  %v6179_v17 = vcombine.high %v650_v8, %v658_v12  ;;  %v6176_v18 = vcombine.low %v649_v6, %v657_v7 }
 0x827   : > { %1897 = vmatprep.subr.bf16.mxu0 %v6169_v44  ;;  %1940 = vmatprep.subr.bf16.mxu1 %v6171_v45  ;;  %v7475_v44 = vld [vmem:[%s7918_s7 + $0xa0] sm:$0xff]   ;;  %v7476_v45 = vld [vmem:[%s7918_s7 + $0x68] sm:$0xff]  }
 0x828   : > { %1927 = vmatprep.mubr.bf16.mxu0 %v7806_v14  ;;  %1970 = vmatprep.mubr.bf16.mxu1 %v7806_v14 }
 0x82a   : > { %1898 = vmatpush1.bf16.msra.mxu0 %v6168_v49  ;;  %1941 = vmatpush1.bf16.msra.mxu1 %v6170_v50  ;;  %v7481_v49 = vld [vmem:[%s7918_s7 + $0xf0] sm:$0xff]  }
 0x82b   : > { %1981 = vmatprep.subr.bf16.mxu0 %v6157_v51  ;;  %2024 = vmatprep.subr.bf16.mxu1 %v6159_v52  ;;  %v7482_v50 = vld [vmem:[%s7918_s7 + $0x30] sm:$0xff]   ;;  %v7484_v52 = vld [vmem:[%s7918_s7 + $0x78] sm:$0xff]  }
 0x82c   : > { %v7483_v51 = vld [vmem:[%s7918_s7 + $0xb0] sm:$0xff]  }
 0x82d   : > { %6182 = vmatmul.mubr.msk.bf16.vlgmr.msra.gmra.mrb[16].mxu0 %vm932_vm2, %v8159_v43  ;;  %6183 = vmatmul.mubr.msk.bf16.vlgmr.msra.gmra.mrb[32].mxu1 %vm932_vm2, %v8159_v43 }
 0x82e   : > { %1982 = vmatpush1.bf16.msra.mxu0 %v6156_v58  ;;  %2025 = vmatpush1.bf16.msra.mxu1 %v6158_v60  ;;  %v7489_v58 = vld [vmem:[%s7918_s7 + $0x1c0] sm:$0xff]  }
 0x82f   : > { %1983 = vmatprep.subr.bf16.mxu0 %v6173_v61  ;;  %2026 = vmatprep.subr.bf16.mxu1 %v6175_v56  ;;  %v625_v60 = vld [vmem:[%s7908_s26] sm:$0xff] }
 0x830   : > { %2013 = vmatprep.mubr.bf16.mxu0 %v7806_v14  ;;  %2056 = vmatprep.mubr.bf16.mxu1 %v7806_v14  ;;  %v1569_v61 = vrot.slane %v625_v60, %v7940_v10  ;;  %v1577_v56 = vrot.slane %v625_v60, %v8140_v26  ;;  %v1573_v59 = vrot.slane %v625_v60, %v8117_v31 }
 0x831   : > { %v1581_v62 = vrot.slane %v625_v60, %v8145_v29 }
 0x832   : > { %1984 = vmatpush1.bf16.msra.mxu0 %v6172_v1  ;;  %2027 = vmatpush1.bf16.msra.mxu1 %v6174_v2 }
 0x833   : > { %2067 = vmatprep.subr.bf16.mxu0 %v6161_v4  ;;  %2110 = vmatprep.subr.bf16.mxu1 %v6163_v5  ;;  %v8245_v4 = vsub.s32 5, %v7937_v9  ;;  %v8248_v5 = vsub.s32 7, %v7937_v9 }
 0x835   : > { %6184 = vmatmul.mubr.msk.bf16.vlgmr.msra.gmra.mrb[20].mxu0 %vm932_vm2, %v8159_v43  ;;  %6185 = vmatmul.mubr.msk.bf16.vlgmr.msra.gmra.mrb[36].mxu1 %vm932_vm2, %v8159_v43 }
 0x836   : > { %2068 = vmatpush1.bf16.msra.mxu0 %v6160_v13  ;;  %2111 = vmatpush1.bf16.msra.mxu1 %v6162_v15 }
 0x837   : > { %2069 = vmatprep.subr.bf16.mxu0 %v6177_v16  ;;  %2112 = vmatprep.subr.bf16.mxu1 %v6179_v17 }
 0x838   : > { %2099 = vmatprep.mubr.bf16.mxu0 %v7806_v14  ;;  %2142 = vmatprep.mubr.bf16.mxu1 %v7806_v14 }
 0x83a   : > { %2070 = vmatpush1.bf16.msra.mxu0 %v6176_v18  ;;  %2113 = vmatpush1.bf16.msra.mxu1 %v6178_v19 }
 0x83b   : > { %6843 = vmatprep.subr.bf16.mxu0 %v7456_v20  ;;  %6865 = vmatprep.subr.bf16.mxu1 %v7457_v21 }
 0x83d   : > { %6186 = vmatmul.mubr.msk.bf16.vlgmr.msra.gmra.mrb[24].mxu0 %vm932_vm2, %v8159_v43  ;;  %6187 = vmatmul.mubr.msk.bf16.vlgmr.msra.gmra.mrb[40].mxu1 %vm932_vm2, %v8159_v43  ;;  %v7474_v43 = vld [vmem:[%s7918_s7 + $0x20] sm:$0xff]  }
 0x83e   : > { %6844 = vmatpush3.bf16.msra.mxu0 %v7458_v22  ;;  %6866 = vmatpush3.bf16.msra.mxu1 %v7459_v23  ;;  %v1585_v22 = vrot.slane %v625_v60, %v8239_v63  ;;  %v1593_v23 = vrot.slane %v625_v60, %v8242_v0 }
 0x83f   : > { %6845 = vmatprep.subr.bf16.mxu0 %v7460_v24  ;;  %6867 = vmatprep.subr.bf16.mxu1 %v7461_v25  ;;  %v1589_v25 = vrot.slane %v625_v60, %v8245_v4 }
 0x842   : > { %6846 = vmatpush3.bf16.msra.mxu0 %v7462_v27  ;;  %6868 = vmatpush3.bf16.msra.mxu1 %v7463_v28  ;;  %v1597_v27 = vrot.slane %v625_v60, %v8248_v5 }
 0x843   : > { %6847 = vmatprep.subr.bf16.mxu0 %v7464_v30  ;;  %6869 = vmatprep.subr.bf16.mxu1 %v7465_v32 }
 0x846   : > { %6848 = vmatpush3.bf16.msra.mxu0 %v7466_v33  ;;  %6870 = vmatpush3.bf16.msra.mxu1 %v7467_v34 }
 0x847   : > { %6849 = vmatprep.subr.bf16.mxu0 %v7468_v35  ;;  %6871 = vmatprep.subr.bf16.mxu1 %v7469_v36 }
 0x84a   : > { %6850 = vmatpush3.bf16.msra.mxu0 %v7470_v37  ;;  %6872 = vmatpush3.bf16.msra.mxu1 %v7471_v38  ;;  %v8255_v38 = vld [vmem:[%s7908_s26 + $0x8] sm:$0xff] }
 0x84b   : > { %6851 = vmatprep.subr.bf16.mxu0 %v7472_v39  ;;  %6873 = vmatprep.subr.bf16.mxu1 %v7473_v40 }
 0x84e   : > { %6852 = vmatpush3.bf16.msra.mxu0 %v7474_v43  ;;  %6874 = vmatpush3.bf16.msra.mxu1 %v7475_v44 }
 0x84f   : > { %6853 = vmatprep.subr.bf16.mxu0 %v7476_v45  ;;  %6875 = vmatprep.subr.bf16.mxu1 %v7477_v11 }
 0x852   : > { %6854 = vmatpush3.bf16.msra.mxu0 %v7478_v46  ;;  %6876 = vmatpush3.bf16.msra.mxu1 %v7479_v47  ;;  %v7490_v46 = vld [vmem:[%s7918_s7 + $0x100] sm:$0xff]  }
 0x853   : > { %6855 = vmatprep.subr.bf16.mxu0 %v7480_v48  ;;  %6877 = vmatprep.subr.bf16.mxu1 %v7481_v49  ;;  %v7491_v47 = vld [vmem:[%s7918_s7 + $0x180] sm:$0xff]  }
 0x856   : > { %6856 = vmatpush3.bf16.msra.mxu0 %v7482_v50  ;;  %6878 = vmatpush3.bf16.msra.mxu1 %v7483_v51 }
 0x857   : > { %6857 = vmatprep.subr.bf16.mxu0 %v7484_v52  ;;  %6879 = vmatprep.subr.bf16.mxu1 %v7485_v53  ;;  %v7492_v52 = vld [vmem:[%s7918_s7 + $0x148] sm:$0xff]  }
 0x858   : > { %v7493_v53 = vld [vmem:[%s7918_s7 + $0x1c8] sm:$0xff]  }
 0x85a   : > { %6858 = vmatpush3.bf16.msra.mxu0 %v7486_v54  ;;  %6880 = vmatpush3.bf16.msra.mxu1 %v7487_v55  ;;  %v1601_v54 = vrot.slane %v8255_v38, %v7940_v10 }
 0x85b   : > { %6887 = vmatprep.subr.bf16.mxu0 %v7488_v57  ;;  %6909 = vmatprep.subr.bf16.mxu1 %v7489_v58 }
 0x8f8   : > { %v1843_v1 = vpop.f32.mrb[12].mxu0  ;;  %v1886_v2 = vpop.f32.mrb[28].mxu1 }
 0x8f9   : > { %v1844_v6 = vadd.f32 %v1843_v1, %v1569_v61  ;;  %v1887_v7 = vadd.f32 %v1886_v2, %v1577_v56  ;;  %v1845_v8 = vpop.f32.mrb[13].mxu0  ;;  %v1888_v12 = vpop.f32.mrb[29].mxu1  ;;  %v1605_v2 = vrot.slane %v8255_v38, %v8117_v31 }
 0x8fa   : > { %v1846_v13 = vadd.f32 %v1845_v8, %v1573_v59  ;;  %v1889_v15 = vadd.f32 %v1888_v12, %v1581_v62  ;;  %v1847_v16 = vpop.f32.mrb[14].mxu0  ;;  %v1890_v17 = vpop.f32.mrb[30].mxu1  ;;  %v7494_v8 = vld [vmem:[%s7918_s7 + $0x108] sm:$0xff]  }
 0x8fb   : > { %v1848_v18 = vadd.f32 %v1847_v16, %v1569_v61  ;;  %v1891_v19 = vadd.f32 %v1890_v17, %v1577_v56  ;;  %v1849_v20 = vpop.f32.mrb[15].mxu0  ;;  %v1892_v21 = vpop.f32.mrb[31].mxu1  ;;  %v2153_v28 = vmax.f32 %v1844_v6, 0.0  ;;  %v2155_v30 = vmax.f32 %v1887_v7, 0.0  ;;  %v7495_v12 = vld [vmem:[%s7918_s7 + $0x188] sm:$0xff]  }
 0x8fc   : > { %v1850_v24 = vadd.f32 %v1849_v20, %v1573_v59  ;;  %v1893_v9 = vadd.f32 %v1892_v21, %v1581_v62  ;;  %v2154_v34 = vmax.f32 %v1846_v13, 0.0  ;;  %v2156_v35 = vmax.f32 %v1889_v15, 0.0  ;;  %v7497_v20 = vld [vmem:[%s7918_s7 + $0x1d0] sm:$0xff]  }
 0x8fd   : > { %v2169_v32 = vmax.f32 %v1848_v18, 0.0  ;;  %v2171_v33 = vmax.f32 %v1891_v19, 0.0  ;;  %v1609_v61 = vrot.slane %v8255_v38, %v8140_v26  ;;  %v1613_v13 = vrot.slane %v8255_v38, %v8145_v29  ;;  %v7496_v19 = vld [vmem:[%s7918_s7 + $0x150] sm:$0xff]  }
 0x8fe   : > { %v2170_v36 = vmax.f32 %v1850_v24, 0.0  ;;  %v2172_v37 = vmax.f32 %v1893_v9, 0.0 }
 0x8ff   : > { %v2185_v39 = vpack.c.bf16 %v2169_v32, %v2153_v28  ;;  %v2187_v40 = vpack.c.bf16 %v2171_v33, %v2155_v30  ;;  %v7498_v33 = vld [vmem:[%s7918_s7 + $0x110] sm:$0xff]  }
 0x900   : > { %v2186_v43 = vpack.c.bf16 %v2170_v36, %v2154_v34  ;;  %v2188_v44 = vpack.c.bf16 %v2172_v37, %v2156_v35  ;;  %v1929_v45 = vpop.f32.mrb[16].mxu0  ;;  %v1972_v11 = vpop.f32.mrb[32].mxu1  ;;  %v7499_v34 = vld [vmem:[%s7918_s7 + $0x190] sm:$0xff]  }
 0x901   : > { %v1930_v48 = vadd.f32 %v1929_v45, %v1585_v22  ;;  %v1973_v49 = vadd.f32 %v1972_v11, %v1593_v23  ;;  %v1931_v50 = vpop.f32.mrb[17].mxu0  ;;  %v1974_v51 = vpop.f32.mrb[33].mxu1 }
 0x902   : > { %v1932_v55 = vadd.f32 %v1931_v50, %v1589_v25  ;;  %v1975_v57 = vadd.f32 %v1974_v51, %v1597_v27  ;;  %v1933_v58 = vpop.f32.mrb[18].mxu0  ;;  %v1976_v60 = vpop.f32.mrb[34].mxu1  ;;  %3005 = vmatprep.mubr.bf16.mxu0 %v2186_v43  ;;  %3046 = vmatprep.mubr.bf16.mxu1 %v2188_v44  ;;  %v7501_v43 = vld [vmem:[%s7918_s7 + $0x1d8] sm:$0xff]  }
 0x903   : > { %v1934_v56 = vadd.f32 %v1933_v58, %v1585_v22  ;;  %v1977_v59 = vadd.f32 %v1976_v60, %v1593_v23  ;;  %v1935_v62 = vpop.f32.mrb[19].mxu0  ;;  %v1978_v1 = vpop.f32.mrb[35].mxu1  ;;  %3006 = vmatmul.mubr.bf16.vlgmr.msra.gmra.mrb[28].mxu0 %v2185_v39  ;;  %3047 = vmatmul.mubr.bf16.vlgmr.msra.gmra.mrb[44].mxu1 %v2187_v40  ;;  %v2157_v15 = vmax.f32 %v1930_v48, 0.0  ;;  %v2159_v16 = vmax.f32 %v1973_v49, 0.0  ;;  %v7500_v40 = vld [vmem:[%s7918_s7 + $0x158] sm:$0xff]  }
 0x904   : > { %v1936_v6 = vadd.f32 %v1935_v62, %v1589_v25  ;;  %v1979_v7 = vadd.f32 %v1978_v1, %v1597_v27  ;;  %6888 = vmatpush3.bf16.msra.mxu0 %v7490_v46  ;;  %6910 = vmatpush3.bf16.msra.mxu1 %v7491_v47  ;;  %v2158_v21 = vmax.f32 %v1932_v55, 0.0  ;;  %v2160_v22 = vmax.f32 %v1975_v57, 0.0  ;;  %v7502_v58 = vld [vmem:[%s7918_s7 + $0x118] sm:$0xff]   ;;  %v7504_v1 = vld [vmem:[%s7918_s7 + $0x160] sm:$0xff]  }
 0x905   : > { %v2173_v17 = vmax.f32 %v1934_v56, 0.0  ;;  %v2175_v18 = vmax.f32 %v1977_v59, 0.0  ;;  %6889 = vmatprep.subr.bf16.mxu0 %v7492_v52  ;;  %6911 = vmatprep.subr.bf16.mxu1 %v7493_v53  ;;  %v1617_v47 = vrot.slane %v8255_v38, %v8239_v63  ;;  %v1625_v52 = vrot.slane %v8255_v38, %v8242_v0  ;;  %v7503_v60 = vld [vmem:[%s7918_s7 + $0x198] sm:$0xff]  }
 0x906   : > { %v2174_v23 = vmax.f32 %v1936_v6, 0.0  ;;  %v2176_v24 = vmax.f32 %v1979_v7, 0.0  ;;  %v1621_v53 = vrot.slane %v8255_v38, %v8245_v4  ;;  %v7505_v6 = vld [vmem:[%s7918_s7 + $0x1e0] sm:$0xff]  }
 0x907   : > { %v8273_v9 = vpack.c.bf16 %v2173_v17, %v2157_v15  ;;  %v8275_v25 = vpack.c.bf16 %v2175_v18, %v2159_v16 }
 0x908   : > { %v2190_v27 = vpack.c.bf16 %v2174_v23, %v2158_v21  ;;  %v2192_v28 = vpack.c.bf16 %v2176_v24, %v2160_v22  ;;  %6890 = vmatpush3.bf16.msra.mxu0 %v7494_v8  ;;  %6912 = vmatpush3.bf16.msra.mxu1 %v7495_v12  ;;  %v2015_v30 = vpop.f32.mrb[20].mxu0  ;;  %v2058_v32 = vpop.f32.mrb[36].mxu1 }
 0x909   : > { %v2016_v35 = vadd.f32 %v2015_v30, %v1601_v54  ;;  %v2059_v36 = vadd.f32 %v2058_v32, %v1609_v61  ;;  %v2017_v37 = vpop.f32.mrb[21].mxu0  ;;  %v2060_v39 = vpop.f32.mrb[37].mxu1  ;;  %6891 = vmatprep.subr.bf16.mxu0 %v7496_v19  ;;  %6913 = vmatprep.subr.bf16.mxu1 %v7497_v20  ;;  %v7506_v19 = vld [vmem:[%s7918_s7 + $0x120] sm:$0xff]  }
 0x90a   : > { %v2018_v44 = vadd.f32 %v2017_v37, %v1605_v2  ;;  %v2061_v45 = vadd.f32 %v2060_v39, %v1613_v13  ;;  %v2019_v11 = vpop.f32.mrb[22].mxu0  ;;  %v2062_v46 = vpop.f32.mrb[38].mxu1  ;;  %3087 = vmatprep.mubr.bf16.mxu0 %v2190_v27  ;;  %3128 = vmatprep.mubr.bf16.mxu1 %v2192_v28  ;;  %v7507_v20 = vld [vmem:[%s7918_s7 + $0x1a0] sm:$0xff]   ;;  %v7508_v27 = vld [vmem:[%s7918_s7 + $0x168] sm:$0xff]  }
 0x90b   : > { %v2020_v48 = vadd.f32 %v2019_v11, %v1601_v54  ;;  %v2063_v49 = vadd.f32 %v2062_v46, %v1609_v61  ;;  %v2021_v50 = vpop.f32.mrb[23].mxu0  ;;  %v2064_v51 = vpop.f32.mrb[39].mxu1  ;;  %v1629_v54 = vrot.slane %v8255_v38, %v8248_v5  ;;  %v2161_v61 = vmax.f32 %v2016_v35, 0.0  ;;  %v7509_v28 = vld [vmem:[%s7918_s7 + $0x1e8] sm:$0xff]  }
 0x90c   : > { %v2022_v55 = vadd.f32 %v2021_v50, %v1605_v2  ;;  %v2065_v57 = vadd.f32 %v2064_v51, %v1613_v13  ;;  %6892 = vmatpush3.bf16.msra.mxu0 %v7498_v33  ;;  %6914 = vmatpush3.bf16.msra.mxu1 %v7499_v34  ;;  %v2163_v56 = vmax.f32 %v2059_v36, 0.0  ;;  %v2162_v7 = vmax.f32 %v2018_v44, 0.0  ;;  %v7510_v44 = vld [vmem:[%s7918_s7 + $0x128] sm:$0xff]   ;;  %v7513_v50 = vld [vmem:[%s7918_s7 + $0x1f0] sm:$0xff]  }
 0x90d   : > { %v2177_v59 = vmax.f32 %v2020_v48, 0.0  ;;  %v2179_v62 = vmax.f32 %v2063_v49, 0.0  ;;  %6893 = vmatprep.subr.bf16.mxu0 %v7500_v40  ;;  %6915 = vmatprep.subr.bf16.mxu1 %v7501_v43  ;;  %v2164_v2 = vmax.f32 %v2061_v45, 0.0  ;;  %v7511_v45 = vld [vmem:[%s7918_s7 + $0x1a8] sm:$0xff]  }
 0x90e   : > { %v2178_v8 = vmax.f32 %v2022_v55, 0.0  ;;  %v2180_v12 = vmax.f32 %v2065_v57, 0.0 }
 0x90f   : > { %v8293_v13 = vpack.c.bf16 %v2177_v59, %v2161_v61  ;;  %v8295_v15 = vpack.c.bf16 %v2179_v62, %v2163_v56  ;;  %v7514_v61 = vld [vmem:[%s7918_s7 + $0x130] sm:$0xff]   ;;  %v7516_v59 = vld [vmem:[%s7918_s7 + $0x178] sm:$0xff]  }
 0x910   : > { %v8297_v38 = vpack.c.bf16 %v2178_v8, %v2162_v7  ;;  %v8299_v16 = vpack.c.bf16 %v2180_v12, %v2164_v2  ;;  %6894 = vmatpush3.bf16.msra.mxu0 %v7502_v58  ;;  %6916 = vmatpush3.bf16.msra.mxu1 %v7503_v60  ;;  %v2101_v17 = vpop.f32.mrb[24].mxu0  ;;  %v2144_v18 = vpop.f32.mrb[40].mxu1  ;;  %v7515_v56 = vld [vmem:[%s7918_s7 + $0x1b0] sm:$0xff]   ;;  %v7517_v62 = vld [vmem:[%s7918_s7 + $0x1f8] sm:$0xff]   ;;  %v7520_v7 = vld [vmem:[%s7918_s7 + $0x240] sm:$0xff]  }
 0x911   : > { %v2102_v21 = vadd.f32 %v2101_v17, %v1617_v47  ;;  %v2145_v22 = vadd.f32 %v2144_v18, %v1625_v52  ;;  %v2103_v23 = vpop.f32.mrb[25].mxu0  ;;  %v2146_v24 = vpop.f32.mrb[41].mxu1  ;;  %6895 = vmatprep.subr.bf16.mxu0 %v7504_v1  ;;  %6917 = vmatprep.subr.bf16.mxu1 %v7505_v6  ;;  %v7518_v1 = vld [vmem:[%s7918_s7 + $0x138] sm:$0xff]   ;;  %v7521_v2 = vld [vmem:[%s7918_s7 + $0x2c0] sm:$0xff]   ;;  %v7524_v17 = vld [vmem:[%s7918_s7 + $0x248] sm:$0xff]  }
 0x912   : > { %v2104_v30 = vadd.f32 %v2103_v23, %v1621_v53  ;;  %v2147_v32 = vadd.f32 %v2146_v24, %v1629_v54  ;;  %v2105_v33 = vpop.f32.mrb[26].mxu0  ;;  %v2148_v34 = vpop.f32.mrb[42].mxu1  ;;  %v7519_v6 = vld [vmem:[%s7918_s7 + $0x1b8] sm:$0xff]   ;;  %v7522_v8 = vld [vmem:[%s7918_s7 + $0x200] sm:$0xff]   ;;  %v7525_v18 = vld [vmem:[%s7918_s7 + $0x2c8] sm:$0xff]  }
 0x913   : > { %v2106_v35 = vadd.f32 %v2105_v33, %v1617_v47  ;;  %v2149_v36 = vadd.f32 %v2148_v34, %v1625_v52  ;;  %v2107_v37 = vpop.f32.mrb[27].mxu0  ;;  %v2150_v39 = vpop.f32.mrb[43].mxu1  ;;  %v2165_v11 = vmax.f32 %v2102_v21, 0.0  ;;  %v2167_v46 = vmax.f32 %v2145_v22, 0.0  ;;  %v7512_v47 = vld [vmem:[%s7918_s7 + $0x170] sm:$0xff]   ;;  %v7523_v12 = vld [vmem:[%s7918_s7 + $0x280] sm:$0xff]  }
 0x914   : > { %v2108_v40 = vadd.f32 %v2107_v37, %v1621_v53  ;;  %v2151_v43 = vadd.f32 %v2150_v39, %v1629_v54  ;;  %6896 = vmatpush3.bf16.msra.mxu0 %v7506_v19  ;;  %6918 = vmatpush3.bf16.msra.mxu1 %v7507_v20  ;;  %v2166_v51 = vmax.f32 %v2104_v30, 0.0  ;;  %v2168_v52 = vmax.f32 %v2147_v32, 0.0  ;;  %v7526_v19 = vld [vmem:[%s7918_s7 + $0x208] sm:$0xff]   ;;  %v7528_v21 = vld [vmem:[%s7918_s7 + $0x250] sm:$0xff]   ;;  %v7532_v22 = vld [vmem:[%s7918_s7 + $0x258] sm:$0xff]  }
 0x915   : > { %v2181_v48 = vmax.f32 %v2106_v35, 0.0  ;;  %v2183_v49 = vmax.f32 %v2149_v36, 0.0  ;;  %6897 = vmatprep.subr.bf16.mxu0 %v7508_v27  ;;  %6919 = vmatprep.subr.bf16.mxu1 %v7509_v28  ;;  %v7527_v20 = vld [vmem:[%s7918_s7 + $0x288] sm:$0xff]   ;;  %v7533_v23 = vld [vmem:[%s7918_s7 + $0x2d8] sm:$0xff]   ;;  %v7536_v27 = vld [vmem:[%s7918_s7 + $0x260] sm:$0xff]  }
 0x916   : > { %v2182_v53 = vmax.f32 %v2108_v40, 0.0  ;;  %v2184_v55 = vmax.f32 %v2151_v43, 0.0  ;;  %v7535_v24 = vld [vmem:[%s7918_s7 + $0x298] sm:$0xff]   ;;  %v7537_v28 = vld [vmem:[%s7918_s7 + $0x2e0] sm:$0xff]   ;;  %v7540_v33 = vld [vmem:[%s7918_s7 + $0x268] sm:$0xff]  }
 0x917   : > { %v8309_v57 = vpack.c.bf16 %v2181_v48, %v2165_v11  ;;  %v8311_v58 = vpack.c.bf16 %v2183_v49, %v2167_v46  ;;  %v7538_v30 = vld [vmem:[%s7918_s7 + $0x220] sm:$0xff]   ;;  %v7541_v34 = vld [vmem:[%s7918_s7 + $0x2e8] sm:$0xff]   ;;  %v7544_v37 = vld [vmem:[%s7918_s7 + $0x270] sm:$0xff]  }
 0x918   : > { %v8313_v60 = vpack.c.bf16 %v2182_v53, %v2166_v51  ;;  %v8315_v54 = vpack.c.bf16 %v2184_v55, %v2168_v52  ;;  %6898 = vmatpush3.bf16.msra.mxu0 %v7510_v44  ;;  %6920 = vmatpush3.bf16.msra.mxu1 %v7511_v45  ;;  %v7539_v32 = vld [vmem:[%s7918_s7 + $0x2a0] sm:$0xff]   ;;  %v7542_v35 = vld [vmem:[%s7918_s7 + $0x228] sm:$0xff]   ;;  %v7545_v39 = vld [vmem:[%s7918_s7 + $0x2f0] sm:$0xff]  }
 0x919   : > { %6899 = vmatprep.subr.bf16.mxu0 %v7512_v47  ;;  %6921 = vmatprep.subr.bf16.mxu1 %v7513_v50  ;;  %v7543_v36 = vld [vmem:[%s7918_s7 + $0x2a8] sm:$0xff]   ;;  %v7546_v40 = vld [vmem:[%s7918_s7 + $0x230] sm:$0xff]   ;;  %v7548_v44 = vld [vmem:[%s7918_s7 + $0x278] sm:$0xff]  }
 0x91a   : > { %v7547_v43 = vld [vmem:[%s7918_s7 + $0x2b0] sm:$0xff]   ;;  %v7549_v45 = vld [vmem:[%s7918_s7 + $0x2f8] sm:$0xff]   ;;  %v7552_v48 = vld [vmem:[%s7918_s7 + $0x340] sm:$0xff]  }
 0x91b   : > { %v7550_v11 = vld [vmem:[%s7918_s7 + $0x238] sm:$0xff]   ;;  %v7553_v49 = vld [vmem:[%s7918_s7 + $0x3c0] sm:$0xff]   ;;  %v7556_v51 = vld [vmem:[%s7918_s7 + $0x348] sm:$0xff]  }
 0x91c   : > { %6900 = vmatpush3.bf16.msra.mxu0 %v7514_v61  ;;  %6922 = vmatpush3.bf16.msra.mxu1 %v7515_v56  ;;  %v7551_v46 = vld [vmem:[%s7918_s7 + $0x2b8] sm:$0xff]   ;;  %v7554_v47 = vld [vmem:[%s7918_s7 + $0x300] sm:$0xff]   ;;  %v7557_v52 = vld [vmem:[%s7918_s7 + $0x3c8] sm:$0xff]  }
 0x91d   : > { %6901 = vmatprep.subr.bf16.mxu0 %v7516_v59  ;;  %6923 = vmatprep.subr.bf16.mxu1 %v7517_v62  ;;  %v7555_v50 = vld [vmem:[%s7918_s7 + $0x380] sm:$0xff]   ;;  %v7558_v53 = vld [vmem:[%s7918_s7 + $0x308] sm:$0xff]   ;;  %v7560_v61 = vld [vmem:[%s7918_s7 + $0x350] sm:$0xff]  }
 0x91e   : > { %v7559_v55 = vld [vmem:[%s7918_s7 + $0x388] sm:$0xff]   ;;  %v7563_v56 = vld [vmem:[%s7918_s7 + $0x390] sm:$0xff]   ;;  %v7565_v59 = vld [vmem:[%s7918_s7 + $0x3d8] sm:$0xff]  }
 0x91f   : > { %v7567_v62 = vld [vmem:[%s7918_s7 + $0x398] sm:$0xff]  }
 0x920   : > { %6902 = vmatpush3.bf16.msra.mxu0 %v7518_v1  ;;  %6924 = vmatpush3.bf16.msra.mxu1 %v7519_v6  ;;  %v7568_v1 = vld [vmem:[%s7918_s7 + $0x360] sm:$0xff]  }
 0x921   : > { %6931 = vmatprep.subr.bf16.mxu0 %v7520_v7  ;;  %6953 = vmatprep.subr.bf16.mxu1 %v7521_v2  ;;  %v7569_v6 = vld [vmem:[%s7918_s7 + $0x3e0] sm:$0xff]  }
 0x922   : > { %v7570_v7 = vld [vmem:[%s7918_s7 + $0x320] sm:$0xff]  }
 0x923   : > { %3088 = vmatmul.mubr.bf16.vlgmr.msra.gmra.mrb[32].mxu0 %v8273_v9  ;;  %3129 = vmatmul.mubr.bf16.vlgmr.msra.gmra.mrb[48].mxu1 %v8275_v25  ;;  %v7529_v9 = vld [vmem:[%s7918_s7 + $0x2d0] sm:$0xff]   ;;  %v7571_v2 = vld [vmem:[%s7918_s7 + $0x3a0] sm:$0xff]  }
 0x924   : > { %6932 = vmatpush3.bf16.msra.mxu0 %v7522_v8  ;;  %3169 = vmatprep.mubr.bf16.mxu0 %v8297_v38  ;;  %v7530_v25 = vld [vmem:[%s7918_s7 + $0x210] sm:$0xff]   ;;  %v7572_v8 = vld [vmem:[%s7918_s7 + $0x368] sm:$0xff]  }
 0x925   : > { %6954 = vmatpush3.bf16.msra.mxu1 %v7523_v12  ;;  %3210 = vmatprep.mubr.bf16.mxu1 %v8299_v16  ;;  %v7531_v38 = vld [vmem:[%s7918_s7 + $0x290] sm:$0xff]   ;;  %v7534_v16 = vld [vmem:[%s7918_s7 + $0x218] sm:$0xff]   ;;  %v7573_v12 = vld [vmem:[%s7918_s7 + $0x3e8] sm:$0xff]  }
 0x926   : > { %6933 = vmatprep.subr.bf16.mxu0 %v7524_v17  ;;  %6955 = vmatprep.subr.bf16.mxu1 %v7525_v18  ;;  %v7574_v17 = vld [vmem:[%s7918_s7 + $0x328] sm:$0xff]  }
 0x927   : > { %v7575_v18 = vld [vmem:[%s7918_s7 + $0x3a8] sm:$0xff]  }
 0x928   : > { %6934 = vmatpush3.bf16.msra.mxu0 %v7526_v19  ;;  %v7576_v19 = vld [vmem:[%s7918_s7 + $0x370] sm:$0xff]  }
 0x929   : > { %6956 = vmatpush3.bf16.msra.mxu1 %v7527_v20  ;;  %6935 = vmatprep.subr.bf16.mxu0 %v7528_v21  ;;  %v7577_v20 = vld [vmem:[%s7918_s7 + $0x3f0] sm:$0xff]  }
 0x92a   : > { %6957 = vmatprep.subr.bf16.mxu1 %v7529_v9  ;;  %v7578_v21 = vld [vmem:[%s7918_s7 + $0x330] sm:$0xff]  }
 0x92b   : > { %v7579_v9 = vld [vmem:[%s7918_s7 + $0x3b0] sm:$0xff]  }
 0x92c   : > { %6936 = vmatpush3.bf16.msra.mxu0 %v7530_v25  ;;  %v7580_v25 = vld [vmem:[%s7918_s7 + $0x378] sm:$0xff]  }
 0x92d   : > { %6958 = vmatpush3.bf16.msra.mxu1 %v7531_v38  ;;  %6937 = vmatprep.subr.bf16.mxu0 %v7532_v22  ;;  %v7581_v38 = vld [vmem:[%s7918_s7 + $0x3f8] sm:$0xff]  }
 0x92e   : > { %6959 = vmatprep.subr.bf16.mxu1 %v7533_v23  ;;  %v7582_v22 = vld [vmem:[%s7918_s7 + $0x338] sm:$0xff]  }
 0x92f   : > { %v7583_v23 = vld [vmem:[%s7918_s7 + $0x3b8] sm:$0xff]  }
 0x930   : > { %6938 = vmatpush3.bf16.msra.mxu0 %v7534_v16  ;;  %v7750_v16 = vld [vmem:[%s8916_s5] sm:$0xff]  }
 0x931   : > { %6960 = vmatpush3.bf16.msra.mxu1 %v7535_v24  ;;  %6939 = vmatprep.subr.bf16.mxu0 %v7536_v27 }
 0x932   : > { %6961 = vmatprep.subr.bf16.mxu1 %v7537_v28  ;;  %v8405_v28 = vld [vmem:[%s7903_s23] sm:$0xff] }
 0x934   : > { %6940 = vmatpush3.bf16.msra.mxu0 %v7538_v30  ;;  %v2204_v30 = vrot.slane %v8405_v28, %v8239_v63 }
 0x935   : > { %6962 = vmatpush3.bf16.msra.mxu1 %v7539_v32  ;;  %6941 = vmatprep.subr.bf16.mxu0 %v7540_v33 }
 0x936   : > { %6963 = vmatprep.subr.bf16.mxu1 %v7541_v34 }
 0x938   : > { %6942 = vmatpush3.bf16.msra.mxu0 %v7542_v35 }
 0x939   : > { %6964 = vmatpush3.bf16.msra.mxu1 %v7543_v36  ;;  %6943 = vmatprep.subr.bf16.mxu0 %v7544_v37 }
 0x93a   : > { %6965 = vmatprep.subr.bf16.mxu1 %v7545_v39 }
 0x93c   : > { %6944 = vmatpush3.bf16.msra.mxu0 %v7546_v40 }
 0x93d   : > { %6966 = vmatpush3.bf16.msra.mxu1 %v7547_v43  ;;  %6945 = vmatprep.subr.bf16.mxu0 %v7548_v44 }
 0x93e   : > { %6967 = vmatprep.subr.bf16.mxu1 %v7549_v45 }
 0x940   : > { %6946 = vmatpush3.bf16.msra.mxu0 %v7550_v11 }
 0x941   : > { %6968 = vmatpush3.bf16.msra.mxu1 %v7551_v46  ;;  %6975 = vmatprep.subr.bf16.mxu0 %v7552_v48 }
 0x942   : > { %6997 = vmatprep.subr.bf16.mxu1 %v7553_v49 }
 0x943   : > { %3170 = vmatmul.mubr.bf16.vlgmr.msra.gmra.mrb[36].mxu0 %v8293_v13  ;;  %v7561_v13 = vld [vmem:[%s7918_s7 + $0x3d0] sm:$0xff]  }
 0x944   : > { %3211 = vmatmul.mubr.bf16.vlgmr.msra.gmra.mrb[52].mxu1 %v8295_v15  ;;  %6976 = vmatpush3.bf16.msra.mxu0 %v7554_v47  ;;  %v7562_v15 = vld [vmem:[%s7918_s7 + $0x310] sm:$0xff]  }
 0x945   : > { %3251 = vmatprep.mubr.bf16.mxu0 %v8313_v60  ;;  %6998 = vmatpush3.bf16.msra.mxu1 %v7555_v50  ;;  %v7564_v60 = vld [vmem:[%s7918_s7 + $0x358] sm:$0xff]  }
 0x946   : > { %3292 = vmatprep.mubr.bf16.mxu1 %v8315_v54  ;;  %6977 = vmatprep.subr.bf16.mxu0 %v7556_v51  ;;  %v7566_v54 = vld [vmem:[%s7918_s7 + $0x318] sm:$0xff]  }
 0x947   : > { %6999 = vmatprep.subr.bf16.mxu1 %v7557_v52 }
 0x948   : > { %6978 = vmatpush3.bf16.msra.mxu0 %v7558_v53 }
 0x949   : > { %7000 = vmatpush3.bf16.msra.mxu1 %v7559_v55  ;;  %6979 = vmatprep.subr.bf16.mxu0 %v7560_v61 }
 0x94a   : > { %7001 = vmatprep.subr.bf16.mxu1 %v7561_v13 }
 0x94c   : > { %6980 = vmatpush3.bf16.msra.mxu0 %v7562_v15 }
 0x94d   : > { %7002 = vmatpush3.bf16.msra.mxu1 %v7563_v56  ;;  %6981 = vmatprep.subr.bf16.mxu0 %v7564_v60 }
 0x94e   : > { %7003 = vmatprep.subr.bf16.mxu1 %v7565_v59 }
 0x950   : > { %6982 = vmatpush3.bf16.msra.mxu0 %v7566_v54 }
 0x951   : > { %7004 = vmatpush3.bf16.msra.mxu1 %v7567_v62  ;;  %6983 = vmatprep.subr.bf16.mxu0 %v7568_v1 }
 0x952   : > { %7005 = vmatprep.subr.bf16.mxu1 %v7569_v6 }
 0x954   : > { %6984 = vmatpush3.bf16.msra.mxu0 %v7570_v7 }
 0x955   : > { %7006 = vmatpush3.bf16.msra.mxu1 %v7571_v2  ;;  %6985 = vmatprep.subr.bf16.mxu0 %v7572_v8 }
 0x956   : > { %7007 = vmatprep.subr.bf16.mxu1 %v7573_v12 }
 0x958   : > { %6986 = vmatpush3.bf16.msra.mxu0 %v7574_v17 }
 0x959   : > { %7008 = vmatpush3.bf16.msra.mxu1 %v7575_v18  ;;  %6987 = vmatprep.subr.bf16.mxu0 %v7576_v19 }
 0x95a   : > { %7009 = vmatprep.subr.bf16.mxu1 %v7577_v20 }
 0x95c   : > { %6988 = vmatpush3.bf16.msra.mxu0 %v7578_v21 }
 0x95d   : > { %7010 = vmatpush3.bf16.msra.mxu1 %v7579_v9  ;;  %6989 = vmatprep.subr.bf16.mxu0 %v7580_v25 }
 0x95e   : > { %7011 = vmatprep.subr.bf16.mxu1 %v7581_v38 }
 0x960   : > { %6990 = vmatpush3.bf16.msra.mxu0 %v7582_v22 }
 0x961   : > { %7012 = vmatpush3.bf16.msra.mxu1 %v7583_v23  ;;  %7325 = vmatprep.subr.bf16.mxu0 %v7801_v3 }
 0x962   : > { %7333 = vmatprep.subr.bf16.mxu1 %v7750_v16 }
 0x963   : > { %3252 = vmatmul.mubr.bf16.vlgmr.msra.gmra.mrb[40].mxu0 %v8309_v57 }
 0x964   : > { %3293 = vmatmul.mubr.bf16.vlgmr.msra.gmra.mrb[56].mxu1 %v8311_v58  ;;  %7329 = vmatprep.mubr.msk.bf16.mxu0 %vm7802_vm1, %v7801_v3 }
 0x965   : > { %7334 = vmatpush3.bf16.msra.mxu1 %v7750_v16 }
 0x966   : > { %7357 = vmatprep.subr.bf16.mxu1 %v7801_v3 }
 0x9d6   : > { %v6859_v24 = vpop.f32.mrb[28].mxu0  ;;  %v6881_v27 = vpop.f32.mrb[44].mxu1 }
 0x9d7   : > { %v6860_v32 = vpop.f32.mrb[29].mxu0  ;;  %v6882_v33 = vpop.f32.mrb[45].mxu1 }
 0x9d8   : > { %v6861_v34 = vadd.f32 %v6860_v32, %v6859_v24  ;;  %v6883_v35 = vadd.f32 %v6882_v33, %v6881_v27  ;;  %v6862_v57 = vpop.f32.mrb[30].mxu0  ;;  %v6884_v36 = vpop.f32.mrb[46].mxu1 }
 0x9d9   : > { %v6863_v58 = vpop.f32.mrb[31].mxu0  ;;  %v6885_v37 = vpop.f32.mrb[47].mxu1 }
 0x9da   : > { %v3008_v39 = vadd.f32 %v6861_v34, %v2204_v30  ;;  %v6864_v40 = vadd.f32 %v6863_v58, %v6862_v57  ;;  %v6886_v43 = vadd.f32 %v6885_v37, %v6884_v36 }
 0x9dc   : > { %v3049_v44 = vadd.f32 %v6883_v35, %v3008_v39  ;;  %v3011_v45 = vadd.f32 %v6864_v40, %v2204_v30 }
 0x9de   : > { %v3052_v11 = vadd.f32 %v6886_v43, %v3011_v45 }
 0x9f6   : > { %v6903_v46 = vpop.f32.mrb[32].mxu0  ;;  %v6925_v48 = vpop.f32.mrb[48].mxu1 }
 0x9f7   : > { %v6904_v49 = vpop.f32.mrb[33].mxu0  ;;  %v6926_v47 = vpop.f32.mrb[49].mxu1 }
 0x9f8   : > { %v6905_v50 = vadd.f32 %v6904_v49, %v6903_v46  ;;  %v6927_v51 = vadd.f32 %v6926_v47, %v6925_v48  ;;  %v6906_v52 = vpop.f32.mrb[34].mxu0  ;;  %v6928_v53 = vpop.f32.mrb[50].mxu1 }
 0x9f9   : > { %v6907_v55 = vpop.f32.mrb[35].mxu0  ;;  %v6929_v61 = vpop.f32.mrb[51].mxu1 }
 0x9fa   : > { %v3090_v13 = vadd.f32 %v6905_v50, %v3049_v44  ;;  %v6908_v15 = vadd.f32 %v6907_v55, %v6906_v52  ;;  %v6930_v56 = vadd.f32 %v6929_v61, %v6928_v53 }
 0x9fc   : > { %v3131_v60 = vadd.f32 %v6927_v51, %v3090_v13  ;;  %v3093_v59 = vadd.f32 %v6908_v15, %v3052_v11  ;;  %v8420_v13 = vld [vmem:[%s7898_s20 + $0x18] sm:$0xff]  }
 0x9fe   : > { %v3134_v54 = vadd.f32 %v6930_v56, %v3093_v59 }
 0xa16   : > { %v6947_v62 = vpop.f32.mrb[36].mxu0 }
 0xa17   : > { %v6969_v1 = vpop.f32.mrb[52].mxu1  ;;  %v6948_v6 = vpop.f32.mrb[37].mxu0 }
 0xa18   : > { %v6949_v7 = vadd.f32 %v6948_v6, %v6947_v62  ;;  %v6970_v2 = vpop.f32.mrb[53].mxu1  ;;  %v6950_v8 = vpop.f32.mrb[38].mxu0  ;;  %v3332_v6 = vrot.slane %v8405_v28, %v8245_v4 }
 0xa19   : > { %v6971_v12 = vadd.f32 %v6970_v2, %v6969_v1  ;;  %v6972_v17 = vpop.f32.mrb[54].mxu1  ;;  %v6951_v18 = vpop.f32.mrb[39].mxu0 }
 0xa1a   : > { %v3172_v19 = vadd.f32 %v6949_v7, %v3131_v60  ;;  %v6952_v20 = vadd.f32 %v6951_v18, %v6950_v8  ;;  %v6973_v21 = vpop.f32.mrb[55].mxu1 }
 0xa1b   : > { %v6974_v9 = vadd.f32 %v6973_v21, %v6972_v17  ;;  %v3338_v17 = vrot.slane %v8405_v28, %v8242_v0 }
 0xa1c   : > { %v3213_v25 = vadd.f32 %v6971_v12, %v3172_v19  ;;  %v3175_v38 = vadd.f32 %v6952_v20, %v3134_v54 }
 0xa1e   : > { %v3216_v22 = vadd.f32 %v6974_v9, %v3175_v38  ;;  %v7752_v9 = vld [vmem:[%s8917_s6] sm:$0xff]  }
 0xa36   : > { %v6991_v23 = vpop.f32.mrb[40].mxu0 }
 0xa37   : > { %v7013_v16 = vpop.f32.mrb[56].mxu1  ;;  %v6992_v24 = vpop.f32.mrb[41].mxu0 }
 0xa38   : > { %v6993_v27 = vadd.f32 %v6992_v24, %v6991_v23  ;;  %v7014_v30 = vpop.f32.mrb[57].mxu1  ;;  %v6994_v32 = vpop.f32.mrb[42].mxu0 }
 0xa39   : > { %v7015_v33 = vadd.f32 %v7014_v30, %v7013_v16  ;;  %v7016_v34 = vpop.f32.mrb[58].mxu1  ;;  %v6995_v35 = vpop.f32.mrb[43].mxu0 }
 0xa3a   : > { %v3254_v57 = vadd.f32 %v6993_v27, %v3213_v25  ;;  %v6996_v36 = vadd.f32 %v6995_v35, %v6994_v32  ;;  %v7017_v58 = vpop.f32.mrb[59].mxu1  ;;  %v8440_v25 = vld [vmem:[%s7903_s23 + $0x8] sm:$0xff] }
 0xa3b   : > { %v7018_v37 = vadd.f32 %v7017_v58, %v7016_v34  ;;  %v3645_v28 = vrot.slane %v8440_v25, %v7940_v10  ;;  %v7753_v35 = vld [vmem:[%s8917_s6 + $0x8] sm:$0xff]  }
 0xa3c   : > { %v3295_v39 = vadd.f32 %v7015_v33, %v3254_v57  ;;  %v3257_v40 = vadd.f32 %v6996_v36, %v3216_v22  ;;  %v7754_v57 = vld [vmem:[%s8917_s6 + $0x10] sm:$0xff]   ;;  %v7755_v36 = vld [vmem:[%s8915_s4] sm:$0xff]   ;;  %v7756_v58 = vld [vmem:[%s8915_s4 + $0x8] sm:$0xff]  }
 0xa3e   : > { %v3298_v43 = vadd.f32 %v7018_v37, %v3257_v40  ;;  %v3301_v44 = vadd.f32 %v3295_v39, %v8153_v41  ;;  %v7757_v37 = vld [vmem:[%s8917_s6 + $0x18] sm:$0xff]   ;;  %v7758_v39 = vld [vmem:[%s8917_s6 + $0x20] sm:$0xff]   ;;  %v7759_v40 = vld [vmem:[%s8915_s4 + $0x10] sm:$0xff]  }
 0xa40   : > { %v3303_v45 = vsel %vm932_vm2, %v3301_v44, 0.0  ;;  %v3302_v11 = vadd.f32 %v3298_v43, %v8155_v42  ;;  %v8416_v42 = vld [vmem:[%s7898_s20 + $0x10] sm:$0xff]   ;;  %v7760_v43 = vld [vmem:[%s8915_s4 + $0x18] sm:$0xff]  }
 0xa41   : > { %3304 = vadd.xlane.f32.xlu0 %v3303_v45  ;;  %7326 = vmatpush3.bf16.msra.mxu0 %v8416_v42  ;;  %v7762_v45 = vld [vmem:[%s8917_s6 + $0x30] sm:$0xff]  }
 0xa42   : > { %v3306_v46 = vsel %vm932_vm2, %v3302_v11, 0.0  ;;  %7327 = vmatprep.subr.bf16.mxu0 %v7801_v3 }
 0xa45   : > { %3307 = vadd.xlane.f32.xlu0 %v3306_v46  ;;  %7328 = vmatpush3.bf16.msra.mxu0 %v8420_v13  ;;  %v7764_v46 = vld [vmem:[%s8915_s4 + $0x28] sm:$0xff]  }
 0xace   : > { %v3305_v48 = vpop.xlane.xlu0 %3304 }
 0xacf   : > { %v3309_v49 = vmul.f32 0.03125, %v3305_v48  ;;  %v7765_v48 = vld [vmem:[%s8917_s6 + $0x38] sm:$0xff]  }
 0xad1   : > { %v3311_v47 = vsub.f32 %v3301_v44, %v3309_v49  ;;  %v7761_v44 = vld [vmem:[%s8917_s6 + $0x28] sm:$0xff]   ;;  %v7766_v49 = vld [vmem:[%s8915_s4 + $0x30] sm:$0xff]  }
 0xad2   : > { %v3308_v50 = vpop.xlane.xlu0 %3307 }
 0xad3   : > { %v3310_v51 = vmul.f32 0.03125, %v3308_v50  ;;  %v3313_v52 = vmul.f32 %v3311_v47, %v3311_v47 }
 0xad5   : > { %v3312_v53 = vsub.f32 %v3302_v11, %v3310_v51  ;;  %v3315_v55 = vsel %vm932_vm2, %v3313_v52, 0.0  ;;  %v7763_v11 = vld [vmem:[%s8915_s4 + $0x20] sm:$0xff]  }
 0xad6   : > { %3316 = vadd.xlane.f32.xlu1 %v3315_v55 }
 0xad7   : > { %v3314_v41 = vmul.f32 %v3312_v53, %v3312_v53 }
 0xad9   : > { %v3318_v61 = vsel %vm932_vm2, %v3314_v41, 0.0 }
 0xada   : > { %3319 = vadd.xlane.f32.xlu0 %v3318_v61 }
 0xb63   : > { %v3317_v15 = vpop.xlane.xlu1 %3316 }
 0xb64   : > { %v3321_v56 = vmul.f32 0.03125, %v3317_v15 }
 0xb66   : > { %v3323_v60 = vadd.f32 1e-05, %v3321_v56 }
 0xb67   : > { %v3320_v59 = vpop.xlane.xlu0 %3319 }
 0xb68   : > { %7726 = vrsqrt.f32 %v3323_v60  ;;  %v3322_v54 = vmul.f32 0.03125, %v3320_v59  ;;  %v7769_v59 = vld [vmem:[%s8913_s2 + $0x18] sm:$0xff] }
 0xb6a   : > { %v3324_v62 = vadd.f32 1e-05, %v3322_v54 }
 0xb6c   : > { %7728 = vrsqrt.f32 %v3324_v62 }
 0xb72   : > { %v7727_v1 = vpop.eup %7726 }
 0xb73   : > { %v3327_v7 = vmul.f32 %v7727_v1, %v3311_v47  ;;  %v7767_v47 = vld [vmem:[%s8915_s4 + $0x38] sm:$0xff]   ;;  %v7770_v1 = vld [vmem:[%s8913_s2] sm:$0xff] }
 0xb75   : > { %v3333_v8 = vmul.f32 %v3332_v6, %v3327_v7  ;;  %v7771_v7 = vld [vmem:[%s8913_s2 + $0x8] sm:$0xff] }
 0xb76   : > { %v7729_v2 = vpop.eup %7728 }
 0xb77   : > { %v3328_v12 = vmul.f32 %v7729_v2, %v3312_v53  ;;  %v8428_v19 = vadd.f32 %v3338_v17, %v3333_v8 }
 0xb79   : > { %v3334_v18 = vmul.f32 %v3332_v6, %v3328_v12 }
 0xb7b   : > { %v8430_v20 = vadd.f32 %v3338_v17, %v3334_v18  ;;  %v7772_v18 = vld [vmem:[%s8912_s1] sm:$0xff] }
 0xb7d   : > { %v3641_v21 = vpack.c.bf16 %v8430_v20, %v8428_v19 }
 0xb7f   : > { %7330 = vmatmul.mubr.msk.bf16.vlgmr.msra.gmra.mrb[44].mxu0 %vm932_vm2, %v3641_v21 }
 0xb80   : > { %7341 = vmatprep.mubr.msk.bf16.mxu0 %vm1026_vm3, %v7752_v9 }
 0xc52   : > { %v3695_v38 = vpop.f32.mrb[44].mxu0 }
 0xc53   : > { %v3696_v22 = vadd.f32 %v3695_v38, %v3645_v28  ;;  %v7331_v23 = vpop.f32.mrb[45].mxu0 }
 0xc54   : > { %v3698_v16 = vpop.f32.mrb[46].mxu0 }
 0xc55   : > { %v3699_v24 = vadd.f32 %v3698_v16, %v3645_v28  ;;  %3705 = vrot.lane.b32.xlu1 %v3696_v22, %s7803_s15  ;;  %v7332_v27 = vpop.f32.mrb[47].mxu0 }
 0xc57   : > { %v8445_v30 = vpack.c.bf16 %v3699_v24, %v3696_v22  ;;  %3707 = vrot.lane.b32.xlu0 %v3699_v24, %s7803_s15  ;;  %v7773_v22 = vld [vmem:[%s8912_s1 + $0x8] sm:$0xff]  ;;  %v7774_v24 = vld [vmem:[%s8914_s3 + $0x10] sm:$0xff] }
 0xc5b   : > { %3805 = vrot.lane.b32.xlu0 %v8445_v30, %s7804_s24 }
 0xcc7   : > { %v3706_v32 = vpop.permute.xlu1 %3705 }
 0xcc8   : > { %3711 = vxpose.xlu1.b32.start [1/2] (short) (narrow) %v3706_v32, 32  ;;  %v7775_v32 = vld [vmem:[%s8914_s3] sm:$0xff] }
 0xcc9   : > { %v3708_v33 = vpop.permute.xlu0 %3707 }
 0xccc   : > { %3712 = vxpose.xlu1.b32.end [2/2] (short) (narrow) %v3708_v33, 32 }
 0xccd   : > { %v3806_v34 = vpop.permute.xlu0 %3805 }
 0xcce   : > { %7339 = vmatprep.subr.bf16.mxu0 %v3806_v34 }
 0xccf   : > { %7340 = vmatpush3.bf16.msra.mxu0 %v3806_v34 }
 0xcd0   : > { %7365 = vmatprep.subr.bf16.mxu0 %v7801_v3 }
 0xcd2   : > { %7342 = vmatmul.mubr.msk.bf16.vlgmr.msra.gmra.mrb[48].mxu0 %vm1026_vm3, %v7753_v35  ;;  %v7776_v35 = vld [vmem:[%s8914_s3 + $0x18] sm:$0xff] }
 0xcd3   : > { %7345 = vmatprep.mubr.msk.bf16.mxu0 %vm1026_vm3, %v7754_v57  ;;  %7366 = vmatpush3.bf16.msra.mxu0 %v7755_v36 }
 0xcd4   : > { %7367 = vmatprep.subr.bf16.mxu0 %v7801_v3 }
 0xcd7   : > { %7368 = vmatpush3.bf16.msra.mxu0 %v7756_v58 }
 0xcd8   : > { %7369 = vmatprep.subr.bf16.mxu0 %v7801_v3 }
 0xcda   : > { %7346 = vmatmul.mubr.msk.bf16.gmra.mrb[52].mxu0 %vm1026_vm3, %v7757_v37 }
 0xcdb   : > { %7349 = vmatprep.mubr.msk.bf16.mxu0 %vm1026_vm3, %v7758_v39  ;;  %7370 = vmatpush3.bf16.msra.mxu0 %v7759_v40  ;;  %v7778_v40 = vld [vmem:[%s8914_s3 + $0x30] sm:$0xff] }
 0xcdc   : > { %7371 = vmatprep.subr.bf16.mxu0 %v7801_v3 }
 0xcdf   : > { %7372 = vmatpush3.bf16.msra.mxu0 %v7760_v43 }
 0xce0   : > { %7373 = vmatprep.subr.bf16.mxu0 %v7801_v3 }
 0xce2   : > { %7350 = vmatmul.mubr.msk.bf16.gmra.mrb[56].mxu0 %vm1026_vm3, %v7761_v44 }
 0xce3   : > { %7353 = vmatprep.mubr.msk.bf16.mxu0 %vm1026_vm3, %v7762_v45  ;;  %7374 = vmatpush3.bf16.msra.mxu0 %v7763_v11  ;;  %v7779_v11 = vld [vmem:[%s8914_s3 + $0x20] sm:$0xff] }
 0xce4   : > { %7375 = vmatprep.subr.bf16.mxu0 %v7801_v3 }
 0xce7   : > { %7376 = vmatpush3.bf16.msra.mxu0 %v7764_v46 }
 0xce8   : > { %7377 = vmatprep.subr.bf16.mxu0 %v7801_v3 }
 0xcea   : > { %7354 = vmatmul.mubr.msk.bf16.gmra.mrb[60].mxu0 %vm1026_vm3, %v7765_v48 }
 0xceb   : > { %7378 = vmatpush3.bf16.msra.mxu0 %v7766_v49  ;;  %7381 = vmatprep.mubr.msk.bf16.mxu0 %vm7802_vm1, %v7801_v3  ;;  %v7780_v49 = vld [vmem:[%s8914_s3 + $0x38] sm:$0xff] }
 0xcec   : > { %7379 = vmatprep.subr.bf16.mxu0 %v7801_v3 }
 0xcef   : > { %7380 = vmatpush3.bf16.msra.mxu0 %v7767_v47 }
 0xcf0   : > { %7405 = vmatprep.subr.bf16.mxu0 %v7801_v3 }
 0xcf2   : > { %4078 = vrot.lane.b32.xlu1 %v8416_v42, %s7805_s29  ;;  %v7768_v42 = vld [vmem:[%s8913_s2 + $0x10] sm:$0xff] }
 0xd48   : > { %v3727_v50 = vpop.trf.xlu1 }
 0xd4c   : > { %v3728_v51 = vpop.trf.xlu1 }
 0xd4d   : > { %v3743_v52 = vpack.c.bf16 %v3728_v51, %v3727_v50  ;;  %v7781_v51 = vld [vmem:[%s8914_s3 + $0x28] sm:$0xff] }
 0xd4f   : > { %7335 = vmatprep.mubr.msk.bf16.mxu1 %vm1026_vm3, %v3743_v52 }
 0xd50   : > { %v3729_v53 = vpop.trf.xlu1 }
 0xd54   : > { %v3730_v55 = vpop.trf.xlu1 }
 0xd55   : > { %v3744_v41 = vpack.c.bf16 %v3730_v55, %v3729_v53 }
 0xd57   : > { %7336 = vmatmul.mubr.msk.bf16.vlgmr.msra.gmra.mrb[60].mxu1 %vm1026_vm3, %v3744_v41  ;;  %v7782_v41 = vld [vmem:[%s8914_s3 + $0x50] sm:$0xff] }
 0xd58   : > { %7361 = vmatprep.mubr.msk.bf16.mxu1 %vm7802_vm1, %v7801_v3 }
 0xda5   : > { %v7343_v16 = vpop.f32.mrb[48].mxu0 }
 0xda6   : > { %v3907_v27 = vmul.f32 %v7774_v24, %v7343_v16  ;;  %v7788_v16 = vld [vmem:[%s8914_s3 + $0x78] sm:$0xff] }
 0xe2a   : > { %v7337_v61 = vpop.f32.mrb[60].mxu1 }
 0xe2b   : > { %v3785_v15 = vpop.f32.mrb[61].mxu1  ;;  %v3802_v60 = vmul.f32 %v7768_v42, %v7337_v61  ;;  %v7783_v42 = vld [vmem:[%s8914_s3 + $0x40] sm:$0xff] }
 0xe2c   : > { %v7338_v56 = vpop.f32.mrb[62].mxu1  ;;  %v3800_v6 = vmul.f32 %v7770_v1, %v3785_v15 }
 0xe2d   : > { %v3803_v54 = vmul.f32 %v7769_v59, %v7338_v56  ;;  %v3788_v62 = vpop.f32.mrb[63].mxu1 }
 0xe2e   : > { %v3801_v2 = vmul.f32 %v7771_v7, %v3788_v62 }
 0xe2f   : > { %v3922_v8 = vpack.c.bf16 %v3803_v54, %v3802_v60  ;;  %v7784_v54 = vld [vmem:[%s8914_s3 + $0x58] sm:$0xff] }
 0xe30   : > { %v3921_v12 = vpack.c.bf16 %v3801_v2, %v3800_v6  ;;  %v7785_v6 = vld [vmem:[%s8914_s3 + $0x48] sm:$0xff] }
 0xe32   : > { %7358 = vmatpush3.bf16.msra.mxu1 %v3921_v12  ;;  %v7786_v12 = vld [vmem:[%s8914_s3 + $0x70] sm:$0xff] }
 0xe33   : > { %7359 = vmatprep.subr.bf16.mxu1 %v7801_v3 }
 0xe36   : > { %7360 = vmatpush3.bf16.msra.mxu1 %v3922_v8 }
 0xe37   : > { %7385 = vmatprep.subr.bf16.mxu1 %v7801_v3 }
 0xe39   : > { %7362 = vmatmul.mubr.msk.bf16.vlgmr.msra.gmra.mrb[64].mxu1 %vm932_vm2, %v8445_v30  ;;  %v3842_v30 = vpop.f32.mrb[49].mxu0 }
 0xe3a   : > { %7401 = vmatprep.mubr.msk.bf16.mxu1 %vm7802_vm1, %v7801_v3  ;;  %v3905_v33 = vmul.f32 %v7775_v32, %v3842_v30  ;;  %v7344_v34 = vpop.f32.mrb[50].mxu0  ;;  %v7789_v30 = vld [vmem:[%s8914_s3 + $0x68] sm:$0xff] }
 0xe3b   : > { %v3908_v57 = vmul.f32 %v7776_v35, %v7344_v34  ;;  %v3845_v36 = vpop.f32.mrb[51].mxu0 }
 0xe3c   : > { %v7347_v37 = vpop.f32.mrb[52].mxu0 }
 0xe3d   : > { %v4025_v39 = vpack.c.bf16 %v3908_v57, %v3907_v27  ;;  %v3911_v43 = vmul.f32 %v7778_v40, %v7347_v37  ;;  %v3858_v44 = vpop.f32.mrb[53].mxu0 }
 0xe3e   : > { %v3909_v46 = vmul.f32 %v7779_v11, %v3858_v44  ;;  %v7348_v48 = vpop.f32.mrb[54].mxu0  ;;  %v4079_v44 = vpop.permute.xlu1 %4078 }
 0xe3f   : > { %v3912_v47 = vmul.f32 %v7780_v49, %v7348_v48  ;;  %v3861_v50 = vpop.f32.mrb[55].mxu0 }
 0xe40   : > { %v3910_v52 = vmul.f32 %v7781_v51, %v3861_v50  ;;  %v7351_v53 = vpop.f32.mrb[56].mxu0 }
 0xe41   : > { %v4027_v55 = vpack.c.bf16 %v3912_v47, %v3911_v43  ;;  %v3915_v61 = vmul.f32 %v7782_v41, %v7351_v53  ;;  %v3874_v15 = vpop.f32.mrb[57].mxu0 }
 0xe42   : > { %v4026_v56 = vpack.c.bf16 %v3910_v52, %v3909_v46  ;;  %v3913_v60 = vmul.f32 %v7783_v42, %v3874_v15  ;;  %v7352_v59 = vpop.f32.mrb[58].mxu0 }
 0xe43   : > { %v3916_v62 = vmul.f32 %v7784_v54, %v7352_v59  ;;  %v3877_v1 = vpop.f32.mrb[59].mxu0 }
 0xe44   : > { %v3914_v7 = vmul.f32 %v7785_v6, %v3877_v1  ;;  %v7355_v2 = vpop.f32.mrb[60].mxu0 }
 0xe45   : > { %v4029_v8 = vpack.c.bf16 %v3916_v62, %v3915_v61  ;;  %v4077_v61 = vrot.slane %v8440_v25, %v8117_v31 }
 0xf0c   : > { %v3960_v17 = vpop.f32.mrb[64].mxu1 }
 0xf0d   : > { %v8540_v21 = vadd.f32 %v7772_v18, %v3960_v17  ;;  %v7363_v9 = vpop.f32.mrb[65].mxu1  ;;  %v3919_v17 = vmul.f32 %v7786_v12, %v7355_v2  ;;  %v3890_v18 = vpop.f32.mrb[61].mxu0 }
 0xf0e   : > { %v3963_v28 = vpop.f32.mrb[66].mxu1  ;;  %v4028_v9 = vpack.c.bf16 %v3914_v7, %v3913_v60 }
 0xf0f   : > { %3967 = vmax.xlane.f32.xlu0 %v8540_v21  ;;  %v7364_v38 = vpop.f32.mrb[67].mxu1  ;;  %v8546_v23 = vadd.f32 %v7773_v22, %v3963_v28  ;;  %v7787_v28 = vld [vmem:[%s8914_s3 + $0x60] sm:$0xff]  ;;  %v7356_v22 = vpop.f32.mrb[62].mxu0 }
 0xf10   : > { %v3917_v38 = vmul.f32 %v7787_v28, %v3890_v18  ;;  %v3920_v24 = vmul.f32 %v7788_v16, %v7356_v22  ;;  %v3893_v27 = vpop.f32.mrb[63].mxu0  ;;  %v6323_v22 = vld [vmem:[%s7913_s14 + $0x100] sm:$0xff] }
 0xf11   : > { %v3918_v32 = vmul.f32 %v7789_v30, %v3893_v27  ;;  %v6331_v16 = vld [vmem:[%s7913_s14 + $0x140] sm:$0xff]  ;;  %v6332_v30 = vld [vmem:[%s7913_s14 + $0x148] sm:$0xff] }
 0xf12   : > { %v6627_v27 = vcombine.high %v6323_v22, %v6331_v16 }
 0xf13   : > { %3969 = vmax.xlane.f32.xlu0 %v8546_v23  ;;  %v4030_v34 = vpack.c.bf16 %v3918_v32, %v3917_v38  ;;  %v6626_v32 = vcombine.low %v6323_v22, %v6331_v16  ;;  %v6343_v22 = vld [vmem:[%s7913_s14 + $0x1a0] sm:$0xff] }
 0xf14   : > { %v6351_v16 = vld [vmem:[%s7913_s14 + $0x1e0] sm:$0xff] }
 0xf29   : > { %4080 = vrot.lane.b32.xlu0 %v8420_v13, %s7805_s29  ;;  %v7777_v13 = vld [vmem:[%s8914_s3 + $0x8] sm:$0xff] }
 0xf2a   : > { %v3906_v58 = vmul.f32 %v7777_v13, %v3845_v36 }
 0xf2c   : > { %v4024_v45 = vpack.c.bf16 %v3906_v58, %v3905_v33  ;;  %v4031_v33 = vpack.c.bf16 %v3920_v24, %v3919_v17  ;;  %v6324_v24 = vld [vmem:[%s7913_s14 + $0x108] sm:$0xff] }
 0xf2e   : > { %7386 = vmatpush3.bf16.msra.mxu1 %v4024_v45 }
 0xf2f   : > { %7387 = vmatprep.subr.bf16.mxu1 %v7801_v3 }
 0xf32   : > { %7388 = vmatpush3.bf16.msra.mxu1 %v4025_v39 }
 0xf33   : > { %7389 = vmatprep.subr.bf16.mxu1 %v7801_v3 }
 0xf36   : > { %7390 = vmatpush3.bf16.msra.mxu1 %v4026_v56 }
 0xf37   : > { %7391 = vmatprep.subr.bf16.mxu1 %v7801_v3 }
 0xf3a   : > { %7392 = vmatpush3.bf16.msra.mxu1 %v4027_v55 }
 0xf3b   : > { %7393 = vmatprep.subr.bf16.mxu1 %v7801_v3 }
 0xf3e   : > { %7394 = vmatpush3.bf16.msra.mxu1 %v4028_v9 }
 0xf3f   : > { %7395 = vmatprep.subr.bf16.mxu1 %v7801_v3 }
 0xf42   : > { %7396 = vmatpush3.bf16.msra.mxu1 %v4029_v8 }
 0xf43   : > { %7397 = vmatprep.subr.bf16.mxu1 %v7801_v3 }
 0xf46   : > { %7398 = vmatpush3.bf16.msra.mxu1 %v4030_v34  ;;  %v6629_v34 = vcombine.high %v6324_v24, %v6332_v30 }
 0xf47   : > { %7399 = vmatprep.subr.bf16.mxu1 %v7801_v3 }
 0xf4a   : > { %7400 = vmatpush3.bf16.msra.mxu1 %v4031_v33  ;;  %v6628_v33 = vcombine.low %v6324_v24, %v6332_v30  ;;  %v6344_v24 = vld [vmem:[%s7913_s14 + $0x1a8] sm:$0xff] }
 0xf4b   : > { %4414 = vmatprep.subr.bf16.mxu1 %v6627_v27  ;;  %v6352_v27 = vld [vmem:[%s7913_s14 + $0x1e8] sm:$0xff] }
 0xf9c   : > { %v3968_v35 = vpop.xlane.xlu0 %3967 }
 0xf9d   : > { %v3971_v57 = vsub.f32 %v8540_v21, %v3968_v35  ;;  %v6339_v35 = vld [vmem:[%s7913_s14 + $0x180] sm:$0xff] }
 0xf9f   : > { %v3973_v36 = vmul.f32 1.442695, %v3971_v57  ;;  %v6347_v57 = vld [vmem:[%s7913_s14 + $0x1c0] sm:$0xff] }
 0xfa0   : > { %v3970_v13 = vpop.xlane.xlu0 %3969 }
 0xfa1   : > { %v3972_v58 = vsub.f32 %v8546_v23, %v3970_v13  ;;  %7730 = vpow2.f32 %v3973_v36  ;;  %v6340_v36 = vld [vmem:[%s7913_s14 + $0x188] sm:$0xff]  ;;  %v6643_v13 = vcombine.high %v6339_v35, %v6347_v57 }
 0xfa3   : > { %v3975_v37 = vmul.f32 1.442695, %v3972_v58  ;;  %v6348_v58 = vld [vmem:[%s7913_s14 + $0x1c8] sm:$0xff] }
 0xfa4   : > { %v4081_v51 = vpop.permute.xlu0 %4080 }
 0xfa5   : > { %7732 = vpow2.f32 %v3975_v37  ;;  %v6642_v37 = vcombine.low %v6339_v35, %v6347_v57  ;;  %v6329_v35 = vld [vmem:[%s7913_s14 + $0x130] sm:$0xff] }
 0xfa6   : > { %v6337_v57 = vld [vmem:[%s7913_s14 + $0x170] sm:$0xff] }
 0xfab   : > { %v7731_v39 = vpop.eup %7730 }
 0xfaf   : > { %v7733_v40 = vpop.eup %7732 }
 0xfb0   : > { %v3977_v43 = vpack.c.bf16 %v7733_v40, %v7731_v39 }
 0xfb2   : > { %7382 = vmatmul.mubr.bf16.vlgmr.msra.gmra.mrb[64].mxu0 %v3977_v43  ;;  %v6325_v43 = vld [vmem:[%s7913_s14 + $0x110] sm:$0xff] }
 0xfb3   : > { %7409 = vmatprep.mubr.msk.bf16.mxu0 %vm7802_vm1, %v7801_v3  ;;  %7406 = vmatpush3.bf16.msra.mxu0 %v4079_v44  ;;  %v6333_v44 = vld [vmem:[%s7913_s14 + $0x150] sm:$0xff] }
 0xfb4   : > { %7407 = vmatprep.subr.bf16.mxu0 %v7801_v3 }
 0xfb7   : > { %7408 = vmatpush3.bf16.msra.mxu0 %v4081_v51 }
 0xfb8   : > { %4457 = vmatprep.subr.bf16.mxu0 %v6629_v34  ;;  %v6653_v34 = vcombine.high %v6344_v24, %v6352_v27 }
0x1085   : > { %v4012_v45 = vpop.f32.mrb[64].mxu0 }
0x1086   : > { %7734 = vrcp.f32 %v4012_v45  ;;  %v7383_v21 = vpop.f32.mrb[65].mxu0  ;;  %v6326_v45 = vld [vmem:[%s7913_s14 + $0x118] sm:$0xff] }
0x1087   : > { %v4015_v11 = vpop.f32.mrb[66].mxu0  ;;  %v6630_v21 = vcombine.low %v6325_v43, %v6333_v44 }
0x1088   : > { %7736 = vrcp.f32 %v4015_v11  ;;  %v7384_v23 = vpop.f32.mrb[67].mxu0  ;;  %v6631_v11 = vcombine.high %v6325_v43, %v6333_v44  ;;  %v6345_v43 = vld [vmem:[%s7913_s14 + $0x1b0] sm:$0xff] }
0x1089   : > { %v6334_v23 = vld [vmem:[%s7913_s14 + $0x158] sm:$0xff]  ;;  %v6353_v44 = vld [vmem:[%s7913_s14 + $0x1f0] sm:$0xff] }
0x1090   : > { %v7735_v46 = vpop.eup %7734 }
0x1091   : > { %v4021_v49 = vmul.f32 %v7735_v46, %v7731_v39  ;;  %v6644_v39 = vcombine.low %v6340_v36, %v6348_v58  ;;  %v6632_v46 = vcombine.low %v6326_v45, %v6334_v23 }
0x1092   : > { %v7737_v48 = vpop.eup %7736 }
0x1093   : > { %v4022_v47 = vmul.f32 %v7737_v48, %v7733_v40  ;;  %v6645_v40 = vcombine.high %v6340_v36, %v6348_v58  ;;  %v6633_v48 = vcombine.high %v6326_v45, %v6334_v23  ;;  %v6330_v36 = vld [vmem:[%s7913_s14 + $0x138] sm:$0xff]  ;;  %v6650_v58 = vcombine.low %v6343_v22, %v6351_v16 }
0x1094   : > { %v6346_v45 = vld [vmem:[%s7913_s14 + $0x1b8] sm:$0xff] }
0x1095   : > { %v4023_v50 = vpack.c.bf16 %v4022_v47, %v4021_v49 }
0x1097   : > { %7402 = vmatmul.mubr.bf16.vlgmr.msra.gmra.mrb[68].mxu1 %v4023_v50 }
0x1098   : > { %4446 = vmatprep.mubr.bf16.mxu1 %v7806_v14  ;;  %4415 = vmatpush1.bf16.msra.mxu1 %v6626_v32 }
0x1099   : > { %4416 = vmatprep.subr.bf16.mxu1 %v6643_v13  ;;  %v6338_v13 = vld [vmem:[%s7913_s14 + $0x178] sm:$0xff] }
0x109a   : > { %v6640_v23 = vcombine.low %v6330_v36, %v6338_v13 }
0x109c   : > { %4417 = vmatpush1.bf16.msra.mxu1 %v6642_v37  ;;  %v6652_v37 = vcombine.low %v6344_v24, %v6352_v27  ;;  %v7616_v24 = vld [vmem:[%s7918_s7 + $0x438] sm:$0xff]  }
0x109d   : > { %4500 = vmatprep.subr.bf16.mxu1 %v6631_v11  ;;  %v6638_v11 = vcombine.low %v6329_v35, %v6337_v57  ;;  %v7617_v27 = vld [vmem:[%s7918_s7 + $0x4b8] sm:$0xff]  }
0x116a   : > { %v4066_v52 = vpop.f32.mrb[68].mxu1 }
0x116b   : > { %v7403_v53 = vpop.f32.mrb[69].mxu1 }
0x116c   : > { %v4069_v55 = vpop.f32.mrb[70].mxu1 }
0x116d   : > { %v4073_v3 = vpack.c.bf16 %v4069_v55, %v4066_v52  ;;  %v7404_v41 = vpop.f32.mrb[71].mxu1 }
0x116f   : > { %7410 = vmatmul.mubr.msk.bf16.vlgmr.msra.gmra.mrb[68].mxu0 %vm932_vm2, %v4073_v3  ;;  %v4159_v3 = vrot.slane %v8440_v25, %v8140_v26 }
0x1170   : > { %4489 = vmatprep.mubr.bf16.mxu0 %v7806_v14  ;;  %4458 = vmatpush1.bf16.msra.mxu0 %v6628_v33  ;;  %v6651_v33 = vcombine.high %v6343_v22, %v6351_v16  ;;  %v7614_v22 = vld [vmem:[%s7918_s7 + $0x478] sm:$0xff]  }
0x1171   : > { %4459 = vmatprep.subr.bf16.mxu0 %v6645_v40  ;;  %v6641_v40 = vcombine.high %v6330_v36, %v6338_v13  ;;  %v7615_v16 = vld [vmem:[%s7918_s7 + $0x4f8] sm:$0xff]  }
0x1174   : > { %4460 = vmatpush1.bf16.msra.mxu0 %v6644_v39  ;;  %v6639_v39 = vcombine.high %v6329_v35, %v6337_v57 }
0x1175   : > { %4543 = vmatprep.subr.bf16.mxu0 %v6633_v48 }
0x1242   : > { %v4121_v15 = vpop.f32.mrb[68].mxu0 }
0x1243   : > { %v4122_v56 = vadd.f32 %v4121_v15, %v4077_v61  ;;  %v7411_v42 = vpop.f32.mrb[69].mxu0  ;;  %v4165_v15 = vrot.slane %v8440_v25, %v8145_v29  ;;  %v6327_v25 = vld [vmem:[%s7913_s14 + $0x120] sm:$0xff] }
0x1244   : > { %v4124_v60 = vpop.f32.mrb[70].mxu0 }
0x1245   : > { %v4125_v59 = vadd.f32 %v4124_v60, %v4077_v61  ;;  %v7412_v54 = vpop.f32.mrb[71].mxu0  ;;  %v4128_v62 = vadd.f32 %v4122_v56, %v8428_v19 }
0x1246   : > { %v6349_v54 = vld [vmem:[%s7913_s14 + $0x1d0] sm:$0xff] }
0x1247   : > { %v4130_v1 = vsel %vm932_vm2, %v4128_v62, 0.0  ;;  %v4129_v6 = vadd.f32 %v4125_v59, %v8430_v20  ;;  %v6341_v59 = vld [vmem:[%s7913_s14 + $0x190] sm:$0xff] }
0x1248   : > { %4131 = vadd.xlane.f32.xlu0 %v4130_v1  ;;  %v6350_v1 = vld [vmem:[%s7913_s14 + $0x1d8] sm:$0xff] }
0x1249   : > { %v4133_v7 = vsel %vm932_vm2, %v4129_v6, 0.0 }
0x124a   : > { %4134 = vadd.xlane.f32.xlu1 %v4133_v7 }
0x12d5   : > { %v4132_v2 = vpop.xlane.xlu0 %4131 }
0x12d6   : > { %v4136_v8 = vmul.f32 0.03125, %v4132_v2 }
0x12d7   : > { %v4135_v12 = vpop.xlane.xlu1 %4134 }
0x12d8   : > { %v4138_v17 = vsub.f32 %v4128_v62, %v4136_v8  ;;  %v4137_v18 = vmul.f32 0.03125, %v4135_v12  ;;  %v6342_v62 = vld [vmem:[%s7913_s14 + $0x198] sm:$0xff]  ;;  %v6647_v8 = vcombine.high %v6341_v59, %v6349_v54 }
0x12d9   : > { %v6649_v12 = vcombine.high %v6342_v62, %v6350_v1 }
0x12da   : > { %v4139_v9 = vsub.f32 %v4129_v6, %v4137_v18  ;;  %v4140_v28 = vmul.f32 %v4138_v17, %v4138_v17  ;;  %v6328_v18 = vld [vmem:[%s7913_s14 + $0x128] sm:$0xff] }
0x12dc   : > { %v4142_v19 = vsel %vm932_vm2, %v4140_v28, 0.0  ;;  %v4141_v38 = vmul.f32 %v4139_v9, %v4139_v9  ;;  %v6646_v28 = vcombine.low %v6341_v59, %v6349_v54  ;;  %v7599_v59 = vld [vmem:[%s7918_s7 + $0x4d8] sm:$0xff]  }
0x12dd   : > { %4143 = vadd.xlane.f32.xlu0 %v4142_v19  ;;  %v6648_v19 = vcombine.low %v6342_v62, %v6350_v1  ;;  %v7600_v54 = vld [vmem:[%s7918_s7 + $0x418] sm:$0xff]   ;;  %v7602_v1 = vld [vmem:[%s7918_s7 + $0x460] sm:$0xff]  }
0x12de   : > { %v4145_v20 = vsel %vm932_vm2, %v4141_v38, 0.0  ;;  %v7601_v62 = vld [vmem:[%s7918_s7 + $0x498] sm:$0xff]  }
0x12e1   : > { %4146 = vadd.xlane.f32.xlu0 %v4145_v20 }
0x136a   : > { %v4144_v49 = vpop.xlane.xlu0 %4143 }
0x136b   : > { %v4148_v47 = vmul.f32 0.03125, %v4144_v49  ;;  %v6654_v49 = vcombine.low %v6345_v43, %v6353_v44 }
0x136d   : > { %v4150_v50 = vadd.f32 1e-05, %v4148_v47 }
0x136e   : > { %v4147_v51 = vpop.xlane.xlu0 %4146 }
0x136f   : > { %7738 = vrsqrt.f32 %v4150_v50  ;;  %v4149_v52 = vmul.f32 0.03125, %v4147_v51  ;;  %v7586_v50 = vld [vmem:[%s7918_s7 + $0x440] sm:$0xff]  }
0x1370   : > { %v7587_v51 = vld [vmem:[%s7918_s7 + $0x4c0] sm:$0xff]  }
0x1371   : > { %v4151_v53 = vadd.f32 1e-05, %v4149_v52  ;;  %v7588_v52 = vld [vmem:[%s7918_s7 + $0x400] sm:$0xff]  }
0x1373   : > { %7740 = vrsqrt.f32 %v4151_v53  ;;  %v7589_v53 = vld [vmem:[%s7918_s7 + $0x480] sm:$0xff]  }
0x1379   : > { %v7739_v55 = vpop.eup %7738 }
0x137a   : > { %v4154_v41 = vmul.f32 %v7739_v55, %v4138_v17  ;;  %v6335_v17 = vld [vmem:[%s7913_s14 + $0x160] sm:$0xff]  ;;  %v7590_v55 = vld [vmem:[%s7918_s7 + $0x448] sm:$0xff]  }
0x137b   : > { %v6635_v38 = vcombine.high %v6327_v25, %v6335_v17  ;;  %v6634_v30 = vcombine.low %v6327_v25, %v6335_v17  ;;  %v7606_v25 = vld [vmem:[%s7918_s7 + $0x468] sm:$0xff]  }
0x137c   : > { %v4160_v56 = vmul.f32 %v4159_v3, %v4154_v41  ;;  %v7593_v41 = vld [vmem:[%s7918_s7 + $0x488] sm:$0xff]  }
0x137d   : > { %v7741_v61 = vpop.eup %7740  ;;  %v7607_v17 = vld [vmem:[%s7918_s7 + $0x4e8] sm:$0xff]  }
0x137e   : > { %v4155_v42 = vmul.f32 %v7741_v61, %v4139_v9  ;;  %v8642_v6 = vadd.f32 %v4165_v15, %v4160_v56  ;;  %v6336_v9 = vld [vmem:[%s7913_s14 + $0x168] sm:$0xff]  ;;  %v7594_v61 = vld [vmem:[%s7918_s7 + $0x450] sm:$0xff]  }
0x137f   : > { %v6637_v20 = vcombine.high %v6328_v18, %v6336_v9  ;;  %v6636_v32 = vcombine.low %v6328_v18, %v6336_v9  ;;  %v7596_v56 = vld [vmem:[%s7918_s7 + $0x410] sm:$0xff]   ;;  %v7608_v18 = vld [vmem:[%s7918_s7 + $0x428] sm:$0xff]  }
0x1380   : > { %v4161_v60 = vmul.f32 %v4159_v3, %v4155_v42  ;;  %v7591_v3 = vld [vmem:[%s7918_s7 + $0x4c8] sm:$0xff]   ;;  %v7597_v42 = vld [vmem:[%s7918_s7 + $0x490] sm:$0xff]  }
0x1381   : > { %v7609_v9 = vld [vmem:[%s7918_s7 + $0x4a8] sm:$0xff]  }
0x1382   : > { %v8644_v7 = vadd.f32 %v4165_v15, %v4161_v60  ;;  %v7595_v15 = vld [vmem:[%s7918_s7 + $0x4d0] sm:$0xff]   ;;  %v7598_v60 = vld [vmem:[%s7918_s7 + $0x458] sm:$0xff]  }
0x1384   : > { %v8648_v2 = vpack.c.bf16 %v8644_v7, %v8642_v6 }
0x1386   : > { %6658 = vmatmul.mubr.msk.bf16.vlgmr.msra.gmra.mrb[72].mxu1 %vm932_vm2, %v8648_v2  ;;  %6659 = vmatmul.mubr.msk.bf16.vlgmr.msra.gmra.mrb[72].mxu0 %vm932_vm2, %v8648_v2 }
0x1387   : > { %4501 = vmatpush1.bf16.msra.mxu1 %v6630_v21  ;;  %4544 = vmatpush1.bf16.msra.mxu0 %v6632_v46  ;;  %v6354_v21 = vld [vmem:[%s7913_s14 + $0x1f8] sm:$0xff]  ;;  %v6655_v46 = vcombine.high %v6345_v43, %v6353_v44 }
0x1388   : > { %4502 = vmatprep.subr.bf16.mxu1 %v6647_v8  ;;  %4545 = vmatprep.subr.bf16.mxu0 %v6649_v12  ;;  %v6657_v48 = vcombine.high %v6346_v45, %v6354_v21  ;;  %v6656_v47 = vcombine.low %v6346_v45, %v6354_v21  ;;  %v7604_v8 = vld [vmem:[%s7918_s7 + $0x420] sm:$0xff]  }
0x1389   : > { %4532 = vmatprep.mubr.bf16.mxu1 %v7806_v14  ;;  %4575 = vmatprep.mubr.bf16.mxu0 %v7806_v14  ;;  %v7605_v12 = vld [vmem:[%s7918_s7 + $0x4a0] sm:$0xff]  }
0x138b   : > { %4503 = vmatpush1.bf16.msra.mxu1 %v6646_v28  ;;  %4546 = vmatpush1.bf16.msra.mxu0 %v6648_v19  ;;  %v7610_v28 = vld [vmem:[%s7918_s7 + $0x470] sm:$0xff]  }
0x138c   : > { %4586 = vmatprep.subr.bf16.mxu1 %v6635_v38  ;;  %4629 = vmatprep.subr.bf16.mxu0 %v6637_v20  ;;  %v7611_v19 = vld [vmem:[%s7918_s7 + $0x4f0] sm:$0xff]  }
0x138d   : > { %v7612_v38 = vld [vmem:[%s7918_s7 + $0x430] sm:$0xff]  }
0x138e   : > { %6660 = vmatmul.mubr.msk.bf16.vlgmr.msra.gmra.mrb[76].mxu1 %vm932_vm2, %v8648_v2  ;;  %6661 = vmatmul.mubr.msk.bf16.vlgmr.msra.gmra.mrb[76].mxu0 %vm932_vm2, %v8648_v2  ;;  %v7613_v20 = vld [vmem:[%s7918_s7 + $0x4b0] sm:$0xff]  }
0x138f   : > { %4587 = vmatpush1.bf16.msra.mxu1 %v6634_v30  ;;  %4630 = vmatpush1.bf16.msra.mxu0 %v6636_v32  ;;  %v7618_v30 = vld [vmem:[%s7918_s7 + $0x540] sm:$0xff]  }
0x1390   : > { %4588 = vmatprep.subr.bf16.mxu1 %v6651_v33  ;;  %4631 = vmatprep.subr.bf16.mxu0 %v6653_v34  ;;  %v7619_v32 = vld [vmem:[%s7918_s7 + $0x5c0] sm:$0xff]   ;;  %v6321_v33 = vld [vmem:[%s7908_s26 + $0x10] sm:$0xff] }
0x1391   : > { %4618 = vmatprep.mubr.bf16.mxu1 %v7806_v14  ;;  %4661 = vmatprep.mubr.bf16.mxu0 %v7806_v14  ;;  %v4174_v34 = vrot.slane %v6321_v33, %v7940_v10  ;;  %v4182_v35 = vrot.slane %v6321_v33, %v8140_v26  ;;  %v4178_v57 = vrot.slane %v6321_v33, %v8117_v31 }
0x1392   : > { %v4186_v36 = vrot.slane %v6321_v33, %v8145_v29 }
0x1393   : > { %4589 = vmatpush1.bf16.msra.mxu1 %v6650_v58  ;;  %4632 = vmatpush1.bf16.msra.mxu0 %v6652_v37 }
0x1394   : > { %4672 = vmatprep.subr.bf16.mxu1 %v6639_v39  ;;  %4715 = vmatprep.subr.bf16.mxu0 %v6641_v40 }
0x1396   : > { %6662 = vmatmul.mubr.msk.bf16.vlgmr.msra.gmra.mrb[80].mxu1 %vm932_vm2, %v8648_v2  ;;  %6663 = vmatmul.mubr.msk.bf16.vlgmr.msra.gmra.mrb[80].mxu0 %vm932_vm2, %v8648_v2 }
0x1397   : > { %4673 = vmatpush1.bf16.msra.mxu1 %v6638_v11  ;;  %4716 = vmatpush1.bf16.msra.mxu0 %v6640_v23 }
0x1398   : > { %4674 = vmatprep.subr.bf16.mxu1 %v6655_v46  ;;  %4717 = vmatprep.subr.bf16.mxu0 %v6657_v48 }
0x1399   : > { %4704 = vmatprep.mubr.bf16.mxu1 %v7806_v14  ;;  %4747 = vmatprep.mubr.bf16.mxu0 %v7806_v14  ;;  %v7592_v14 = vld [vmem:[%s7918_s7 + $0x408] sm:$0xff]  }
0x139b   : > { %4675 = vmatpush1.bf16.msra.mxu1 %v6654_v49  ;;  %4718 = vmatpush1.bf16.msra.mxu0 %v6656_v47  ;;  %v4190_v47 = vrot.slane %v6321_v33, %v8239_v63 }
0x139c   : > { %7058 = vmatprep.subr.bf16.mxu1 %v7586_v50  ;;  %7080 = vmatprep.subr.bf16.mxu0 %v7587_v51  ;;  %v4198_v50 = vrot.slane %v6321_v33, %v8242_v0 }
0x139e   : > { %6664 = vmatmul.mubr.msk.bf16.vlgmr.msra.gmra.mrb[84].mxu1 %vm932_vm2, %v8648_v2  ;;  %6665 = vmatmul.mubr.msk.bf16.vlgmr.msra.gmra.mrb[84].mxu0 %vm932_vm2, %v8648_v2  ;;  %v7603_v2 = vld [vmem:[%s7918_s7 + $0x4e0] sm:$0xff]  }
0x139f   : > { %7059 = vmatpush3.bf16.msra.mxu1 %v7588_v52  ;;  %7081 = vmatpush3.bf16.msra.mxu0 %v7589_v53  ;;  %v4194_v53 = vrot.slane %v6321_v33, %v8245_v4 }
0x13a0   : > { %7060 = vmatprep.subr.bf16.mxu1 %v7590_v55  ;;  %7082 = vmatprep.subr.bf16.mxu0 %v7591_v3  ;;  %v4202_v55 = vrot.slane %v6321_v33, %v8248_v5 }
0x13a3   : > { %7061 = vmatpush3.bf16.msra.mxu1 %v7592_v14  ;;  %7083 = vmatpush3.bf16.msra.mxu0 %v7593_v41 }
0x13a4   : > { %7062 = vmatprep.subr.bf16.mxu1 %v7594_v61  ;;  %7084 = vmatprep.subr.bf16.mxu0 %v7595_v15 }
0x13a7   : > { %7063 = vmatpush3.bf16.msra.mxu1 %v7596_v56  ;;  %7085 = vmatpush3.bf16.msra.mxu0 %v7597_v42 }
0x13a8   : > { %7064 = vmatprep.subr.bf16.mxu1 %v7598_v60  ;;  %7086 = vmatprep.subr.bf16.mxu0 %v7599_v59  ;;  %v8732_v59 = vld [vmem:[%s7908_s26 + $0x18] sm:$0xff] }
0x13ab   : > { %7065 = vmatpush3.bf16.msra.mxu1 %v7600_v54  ;;  %7087 = vmatpush3.bf16.msra.mxu0 %v7601_v62 }
0x13ac   : > { %7066 = vmatprep.subr.bf16.mxu1 %v7602_v1  ;;  %7088 = vmatprep.subr.bf16.mxu0 %v7603_v2 }
0x13af   : > { %7067 = vmatpush3.bf16.msra.mxu1 %v7604_v8  ;;  %7089 = vmatpush3.bf16.msra.mxu0 %v7605_v12 }
0x13b0   : > { %7068 = vmatprep.subr.bf16.mxu1 %v7606_v25  ;;  %7090 = vmatprep.subr.bf16.mxu0 %v7607_v17  ;;  %v7620_v25 = vld [vmem:[%s7918_s7 + $0x500] sm:$0xff]  }
0x13b1   : > { %v7621_v17 = vld [vmem:[%s7918_s7 + $0x580] sm:$0xff]  }
0x13b3   : > { %7069 = vmatpush3.bf16.msra.mxu1 %v7608_v18  ;;  %7091 = vmatpush3.bf16.msra.mxu0 %v7609_v9 }
0x13b4   : > { %7070 = vmatprep.subr.bf16.mxu1 %v7610_v28  ;;  %7092 = vmatprep.subr.bf16.mxu0 %v7611_v19 }
0x13b7   : > { %7071 = vmatpush3.bf16.msra.mxu1 %v7612_v38  ;;  %7093 = vmatpush3.bf16.msra.mxu0 %v7613_v20  ;;  %v7622_v38 = vld [vmem:[%s7918_s7 + $0x548] sm:$0xff]  }
0x13b8   : > { %7072 = vmatprep.subr.bf16.mxu1 %v7614_v22  ;;  %7094 = vmatprep.subr.bf16.mxu0 %v7615_v16  ;;  %v7623_v20 = vld [vmem:[%s7918_s7 + $0x5c8] sm:$0xff]   ;;  %v4206_v22 = vrot.slane %v8732_v59, %v7940_v10  ;;  %v4210_v10 = vrot.slane %v8732_v59, %v8117_v31 }
0x13bb   : > { %7073 = vmatpush3.bf16.msra.mxu1 %v7616_v24  ;;  %7095 = vmatpush3.bf16.msra.mxu0 %v7617_v27 }
0x13bc   : > { %7102 = vmatprep.subr.bf16.mxu1 %v7618_v30  ;;  %7124 = vmatprep.subr.bf16.mxu0 %v7619_v32  ;;  %v4214_v32 = vrot.slane %v8732_v59, %v8140_v26  ;;  %v4218_v26 = vrot.slane %v8732_v59, %v8145_v29 }
0x1459   : > { %v4448_v13 = vpop.f32.mrb[72].mxu1  ;;  %v4491_v58 = vpop.f32.mrb[72].mxu0 }
0x145a   : > { %v4449_v37 = vadd.f32 %v4448_v13, %v4174_v34  ;;  %v4492_v39 = vadd.f32 %v4491_v58, %v4182_v35  ;;  %v4450_v40 = vpop.f32.mrb[73].mxu1  ;;  %v4493_v43 = vpop.f32.mrb[73].mxu0  ;;  %v7624_v58 = vld [vmem:[%s7918_s7 + $0x508] sm:$0xff]  }
0x145b   : > { %v4451_v44 = vadd.f32 %v4450_v40, %v4178_v57  ;;  %v4494_v45 = vadd.f32 %v4493_v43, %v4186_v36  ;;  %v4452_v21 = vpop.f32.mrb[74].mxu1  ;;  %v4495_v11 = vpop.f32.mrb[74].mxu0 }
0x145c   : > { %v4453_v23 = vadd.f32 %v4452_v21, %v4174_v34  ;;  %v4496_v46 = vadd.f32 %v4495_v11, %v4182_v35  ;;  %v4454_v48 = vpop.f32.mrb[75].mxu1  ;;  %v4497_v49 = vpop.f32.mrb[75].mxu0  ;;  %v4758_v3 = vmax.f32 %v4449_v37, 0.0  ;;  %v4760_v14 = vmax.f32 %v4492_v39, 0.0  ;;  %v7625_v37 = vld [vmem:[%s7918_s7 + $0x588] sm:$0xff]   ;;  %v7627_v21 = vld [vmem:[%s7918_s7 + $0x5d0] sm:$0xff]  }
0x145d   : > { %v4455_v51 = vadd.f32 %v4454_v48, %v4178_v57  ;;  %v4498_v52 = vadd.f32 %v4497_v49, %v4186_v36  ;;  %v4759_v15 = vmax.f32 %v4451_v44, 0.0  ;;  %v4761_v56 = vmax.f32 %v4494_v45, 0.0  ;;  %v7626_v45 = vld [vmem:[%s7918_s7 + $0x550] sm:$0xff]  }
0x145e   : > { %v4774_v41 = vmax.f32 %v4453_v23, 0.0  ;;  %v4776_v61 = vmax.f32 %v4496_v46, 0.0 }
0x145f   : > { %v4775_v42 = vmax.f32 %v4455_v51, 0.0  ;;  %v4777_v60 = vmax.f32 %v4498_v52, 0.0  ;;  %v7628_v52 = vld [vmem:[%s7918_s7 + $0x510] sm:$0xff]  }
0x1460   : > { %v4790_v54 = vpack.c.bf16 %v4774_v41, %v4758_v3  ;;  %v4792_v62 = vpack.c.bf16 %v4776_v61, %v4760_v14  ;;  %v7630_v61 = vld [vmem:[%s7918_s7 + $0x558] sm:$0xff]  }
0x1461   : > { %v4791_v1 = vpack.c.bf16 %v4775_v42, %v4759_v15  ;;  %v4793_v2 = vpack.c.bf16 %v4777_v60, %v4761_v56  ;;  %v4534_v8 = vpop.f32.mrb[76].mxu1  ;;  %v4577_v12 = vpop.f32.mrb[76].mxu0  ;;  %v7631_v15 = vld [vmem:[%s7918_s7 + $0x5d8] sm:$0xff]  }
0x1462   : > { %v4535_v18 = vadd.f32 %v4534_v8, %v4190_v47  ;;  %v4578_v9 = vadd.f32 %v4577_v12, %v4198_v50  ;;  %v4536_v28 = vpop.f32.mrb[77].mxu1  ;;  %v4579_v19 = vpop.f32.mrb[77].mxu0 }
0x1463   : > { %v4537_v16 = vadd.f32 %v4536_v28, %v4194_v53  ;;  %v4580_v24 = vadd.f32 %v4579_v19, %v4202_v55  ;;  %v4538_v27 = vpop.f32.mrb[78].mxu1  ;;  %v4581_v30 = vpop.f32.mrb[78].mxu0  ;;  %5610 = vmatprep.mubr.bf16.mxu1 %v4791_v1  ;;  %5651 = vmatprep.mubr.bf16.mxu0 %v4793_v2  ;;  %v7632_v28 = vld [vmem:[%s7918_s7 + $0x518] sm:$0xff]  }
0x1464   : > { %v4539_v33 = vadd.f32 %v4538_v27, %v4190_v47  ;;  %v4582_v34 = vadd.f32 %v4581_v30, %v4198_v50  ;;  %v4540_v35 = vpop.f32.mrb[79].mxu1  ;;  %v4583_v57 = vpop.f32.mrb[79].mxu0  ;;  %5611 = vmatmul.mubr.bf16.vlgmr.msra.gmra.mrb[88].mxu1 %v4790_v54  ;;  %5652 = vmatmul.mubr.bf16.vlgmr.msra.gmra.mrb[88].mxu0 %v4792_v62  ;;  %v4762_v39 = vmax.f32 %v4535_v18, 0.0  ;;  %v4764_v40 = vmax.f32 %v4578_v9, 0.0  ;;  %v7633_v19 = vld [vmem:[%s7918_s7 + $0x598] sm:$0xff]   ;;  %v7634_v27 = vld [vmem:[%s7918_s7 + $0x560] sm:$0xff]  }
0x1465   : > { %v4541_v36 = vadd.f32 %v4540_v35, %v4194_v53  ;;  %v4584_v13 = vadd.f32 %v4583_v57, %v4202_v55  ;;  %7103 = vmatpush3.bf16.msra.mxu1 %v7620_v25  ;;  %7125 = vmatpush3.bf16.msra.mxu0 %v7621_v17  ;;  %v4763_v31 = vmax.f32 %v4537_v16, 0.0  ;;  %v4765_v11 = vmax.f32 %v4580_v24, 0.0  ;;  %v7629_v53 = vld [vmem:[%s7918_s7 + $0x590] sm:$0xff]   ;;  %v7635_v30 = vld [vmem:[%s7918_s7 + $0x5e0] sm:$0xff]  }
0x1466   : > { %v4778_v43 = vmax.f32 %v4539_v33, 0.0  ;;  %v4780_v44 = vmax.f32 %v4582_v34, 0.0  ;;  %7104 = vmatprep.subr.bf16.mxu1 %v7622_v38  ;;  %7126 = vmatprep.subr.bf16.mxu0 %v7623_v20  ;;  %v4222_v62 = vrot.slane %v8732_v59, %v8239_v63  ;;  %v4230_v25 = vrot.slane %v8732_v59, %v8242_v0 }
0x1467   : > { %v4779_v23 = vmax.f32 %v4541_v36, 0.0  ;;  %v4781_v46 = vmax.f32 %v4584_v13, 0.0  ;;  %v4226_v17 = vrot.slane %v8732_v59, %v8245_v4  ;;  %v4234_v38 = vrot.slane %v8732_v59, %v8248_v5 }
0x1468   : > { %v8750_v48 = vpack.c.bf16 %v4778_v43, %v4762_v39  ;;  %v8752_v49 = vpack.c.bf16 %v4780_v44, %v4764_v40  ;;  %v7638_v44 = vld [vmem:[%s7918_s7 + $0x568] sm:$0xff]  }
0x1469   : > { %v4795_v29 = vpack.c.bf16 %v4779_v23, %v4763_v31  ;;  %v4797_v47 = vpack.c.bf16 %v4781_v46, %v4765_v11  ;;  %7105 = vmatpush3.bf16.msra.mxu1 %v7624_v58  ;;  %7127 = vmatpush3.bf16.msra.mxu0 %v7625_v37  ;;  %v4620_v50 = vpop.f32.mrb[80].mxu1  ;;  %v4663_v51 = vpop.f32.mrb[80].mxu0  ;;  %v7636_v58 = vld [vmem:[%s7918_s7 + $0x520] sm:$0xff]  }
0x146a   : > { %v4621_v55 = vadd.f32 %v4620_v50, %v4206_v22  ;;  %v4664_v3 = vadd.f32 %v4663_v51, %v4214_v32  ;;  %v4622_v14 = vpop.f32.mrb[81].mxu1  ;;  %v4665_v41 = vpop.f32.mrb[81].mxu0  ;;  %7106 = vmatprep.subr.bf16.mxu1 %v7626_v45  ;;  %7128 = vmatprep.subr.bf16.mxu0 %v7627_v21  ;;  %v7637_v37 = vld [vmem:[%s7918_s7 + $0x5a0] sm:$0xff]   ;;  %v7639_v45 = vld [vmem:[%s7918_s7 + $0x5e8] sm:$0xff]  }
0x146b   : > { %v4623_v56 = vadd.f32 %v4622_v14, %v4210_v10  ;;  %v4666_v42 = vadd.f32 %v4665_v41, %v4218_v26  ;;  %v4624_v60 = vpop.f32.mrb[82].mxu1  ;;  %v4667_v54 = vpop.f32.mrb[82].mxu0  ;;  %5692 = vmatprep.mubr.bf16.mxu1 %v4795_v29  ;;  %5733 = vmatprep.mubr.bf16.mxu0 %v4797_v47 }
0x146c   : > { %v4625_v1 = vadd.f32 %v4624_v60, %v4206_v22  ;;  %v4668_v2 = vadd.f32 %v4667_v54, %v4214_v32  ;;  %v4626_v8 = vpop.f32.mrb[83].mxu1  ;;  %v4669_v12 = vpop.f32.mrb[83].mxu0  ;;  %v4766_v20 = vmax.f32 %v4621_v55, 0.0  ;;  %v4768_v22 = vmax.f32 %v4664_v3, 0.0  ;;  %v7641_v55 = vld [vmem:[%s7918_s7 + $0x5a8] sm:$0xff]  }
0x146d   : > { %v4627_v18 = vadd.f32 %v4626_v8, %v4210_v10  ;;  %v4670_v9 = vadd.f32 %v4669_v12, %v4218_v26  ;;  %7107 = vmatpush3.bf16.msra.mxu1 %v7628_v52  ;;  %7129 = vmatpush3.bf16.msra.mxu0 %v7629_v53  ;;  %v4767_v32 = vmax.f32 %v4623_v56, 0.0  ;;  %v4769_v33 = vmax.f32 %v4666_v42, 0.0  ;;  %v7640_v53 = vld [vmem:[%s7918_s7 + $0x528] sm:$0xff]   ;;  %v7643_v56 = vld [vmem:[%s7918_s7 + $0x5f0] sm:$0xff]  }
0x146e   : > { %v4782_v16 = vmax.f32 %v4625_v1, 0.0  ;;  %v4784_v24 = vmax.f32 %v4668_v2, 0.0  ;;  %7108 = vmatprep.subr.bf16.mxu1 %v7630_v61  ;;  %7130 = vmatprep.subr.bf16.mxu0 %v7631_v15  ;;  %v7642_v15 = vld [vmem:[%s7918_s7 + $0x570] sm:$0xff]  }
0x146f   : > { %v4783_v34 = vmax.f32 %v4627_v18, 0.0  ;;  %v4785_v35 = vmax.f32 %v4670_v9, 0.0  ;;  %v7646_v18 = vld [vmem:[%s7918_s7 + $0x578] sm:$0xff]  }
0x1470   : > { %v8770_v57 = vpack.c.bf16 %v4782_v16, %v4766_v20  ;;  %v8772_v10 = vpack.c.bf16 %v4784_v24, %v4768_v22  ;;  %v7647_v9 = vld [vmem:[%s7918_s7 + $0x5f8] sm:$0xff]   ;;  %v7651_v20 = vld [vmem:[%s7918_s7 + $0x6c0] sm:$0xff]   ;;  %v7654_v24 = vld [vmem:[%s7918_s7 + $0x648] sm:$0xff]  }
0x1471   : > { %v8774_v5 = vpack.c.bf16 %v4783_v34, %v4767_v32  ;;  %v8776_v59 = vpack.c.bf16 %v4785_v35, %v4769_v33  ;;  %7109 = vmatpush3.bf16.msra.mxu1 %v7632_v28  ;;  %7131 = vmatpush3.bf16.msra.mxu0 %v7633_v19  ;;  %v4706_v36 = vpop.f32.mrb[84].mxu1  ;;  %v4749_v13 = vpop.f32.mrb[84].mxu0  ;;  %v7648_v28 = vld [vmem:[%s7918_s7 + $0x538] sm:$0xff]   ;;  %v7652_v22 = vld [vmem:[%s7918_s7 + $0x600] sm:$0xff]   ;;  %v7657_v32 = vld [vmem:[%s7918_s7 + $0x688] sm:$0xff]  }
0x1472   : > { %v4707_v26 = vadd.f32 %v4706_v36, %v4222_v62  ;;  %v4750_v39 = vadd.f32 %v4749_v13, %v4230_v25  ;;  %v4708_v40 = vpop.f32.mrb[85].mxu1  ;;  %v4751_v43 = vpop.f32.mrb[85].mxu0  ;;  %7110 = vmatprep.subr.bf16.mxu1 %v7634_v27  ;;  %7132 = vmatprep.subr.bf16.mxu0 %v7635_v30  ;;  %v7649_v19 = vld [vmem:[%s7918_s7 + $0x5b8] sm:$0xff]   ;;  %v7653_v16 = vld [vmem:[%s7918_s7 + $0x680] sm:$0xff]   ;;  %v7655_v27 = vld [vmem:[%s7918_s7 + $0x6c8] sm:$0xff]  }
0x1473   : > { %v4709_v21 = vadd.f32 %v4708_v40, %v4226_v17  ;;  %v4752_v31 = vadd.f32 %v4751_v43, %v4234_v38  ;;  %v4710_v11 = vpop.f32.mrb[86].mxu1  ;;  %v4753_v23 = vpop.f32.mrb[86].mxu0  ;;  %v7656_v30 = vld [vmem:[%s7918_s7 + $0x608] sm:$0xff]   ;;  %v7658_v33 = vld [vmem:[%s7918_s7 + $0x650] sm:$0xff]   ;;  %v7662_v35 = vld [vmem:[%s7918_s7 + $0x658] sm:$0xff]  }
0x1474   : > { %v4711_v46 = vadd.f32 %v4710_v11, %v4222_v62  ;;  %v4754_v29 = vadd.f32 %v4753_v23, %v4230_v25  ;;  %v4712_v47 = vpop.f32.mrb[87].mxu1  ;;  %v4755_v50 = vpop.f32.mrb[87].mxu0  ;;  %v4770_v3 = vmax.f32 %v4707_v26, 0.0  ;;  %v4772_v14 = vmax.f32 %v4750_v39, 0.0  ;;  %v7644_v25 = vld [vmem:[%s7918_s7 + $0x530] sm:$0xff]   ;;  %v7665_v36 = vld [vmem:[%s7918_s7 + $0x698] sm:$0xff]  }
0x1475   : > { %v4713_v51 = vadd.f32 %v4712_v47, %v4226_v17  ;;  %v4756_v52 = vadd.f32 %v4755_v50, %v4234_v38  ;;  %7111 = vmatpush3.bf16.msra.mxu1 %v7636_v58  ;;  %7133 = vmatpush3.bf16.msra.mxu0 %v7637_v37  ;;  %v4771_v42 = vmax.f32 %v4709_v21, 0.0  ;;  %v4773_v60 = vmax.f32 %v4752_v31, 0.0  ;;  %v7645_v17 = vld [vmem:[%s7918_s7 + $0x5b0] sm:$0xff]   ;;  %v7650_v38 = vld [vmem:[%s7918_s7 + $0x640] sm:$0xff]   ;;  %v7670_v39 = vld [vmem:[%s7918_s7 + $0x668] sm:$0xff]  }
0x1476   : > { %v4786_v41 = vmax.f32 %v4711_v46, 0.0  ;;  %v4788_v61 = vmax.f32 %v4754_v29, 0.0  ;;  %7112 = vmatprep.subr.bf16.mxu1 %v7638_v44  ;;  %7134 = vmatprep.subr.bf16.mxu0 %v7639_v45  ;;  %v7661_v34 = vld [vmem:[%s7918_s7 + $0x690] sm:$0xff]   ;;  %v7666_v13 = vld [vmem:[%s7918_s7 + $0x660] sm:$0xff]   ;;  %v7671_v40 = vld [vmem:[%s7918_s7 + $0x6e8] sm:$0xff]  }
0x1477   : > { %v4787_v54 = vmax.f32 %v4713_v51, 0.0  ;;  %v4789_v62 = vmax.f32 %v4756_v52, 0.0  ;;  %v7667_v58 = vld [vmem:[%s7918_s7 + $0x6e0] sm:$0xff]   ;;  %v7672_v43 = vld [vmem:[%s7918_s7 + $0x628] sm:$0xff]   ;;  %v7674_v45 = vld [vmem:[%s7918_s7 + $0x670] sm:$0xff]  }
0x1478   : > { %v8786_v1 = vpack.c.bf16 %v4786_v41, %v4770_v3  ;;  %v8788_v2 = vpack.c.bf16 %v4788_v61, %v4772_v14  ;;  %v7668_v37 = vld [vmem:[%s7918_s7 + $0x620] sm:$0xff]   ;;  %v7673_v44 = vld [vmem:[%s7918_s7 + $0x6a8] sm:$0xff]   ;;  %v7675_v21 = vld [vmem:[%s7918_s7 + $0x6f0] sm:$0xff]  }
0x1479   : > { %v8790_v8 = vpack.c.bf16 %v4787_v54, %v4771_v42  ;;  %v8792_v12 = vpack.c.bf16 %v4789_v62, %v4773_v60  ;;  %7113 = vmatpush3.bf16.msra.mxu1 %v7640_v53  ;;  %7135 = vmatpush3.bf16.msra.mxu0 %v7641_v55  ;;  %v7669_v26 = vld [vmem:[%s7918_s7 + $0x6a0] sm:$0xff]   ;;  %v7676_v31 = vld [vmem:[%s7918_s7 + $0x630] sm:$0xff]   ;;  %v7678_v23 = vld [vmem:[%s7918_s7 + $0x678] sm:$0xff]  }
0x147a   : > { %7114 = vmatprep.subr.bf16.mxu1 %v7642_v15  ;;  %7136 = vmatprep.subr.bf16.mxu0 %v7643_v56  ;;  %v7677_v11 = vld [vmem:[%s7918_s7 + $0x6b0] sm:$0xff]   ;;  %v7679_v46 = vld [vmem:[%s7918_s7 + $0x6f8] sm:$0xff]   ;;  %v7682_v50 = vld [vmem:[%s7918_s7 + $0x740] sm:$0xff]  }
0x147b   : > { %v7680_v29 = vld [vmem:[%s7918_s7 + $0x638] sm:$0xff]   ;;  %v7683_v51 = vld [vmem:[%s7918_s7 + $0x7c0] sm:$0xff]   ;;  %v7686_v55 = vld [vmem:[%s7918_s7 + $0x748] sm:$0xff]  }
0x147c   : > { %v7681_v47 = vld [vmem:[%s7918_s7 + $0x6b8] sm:$0xff]   ;;  %v7684_v52 = vld [vmem:[%s7918_s7 + $0x700] sm:$0xff]   ;;  %v7687_v3 = vld [vmem:[%s7918_s7 + $0x7c8] sm:$0xff]  }
0x147d   : > { %7115 = vmatpush3.bf16.msra.mxu1 %v7644_v25  ;;  %7137 = vmatpush3.bf16.msra.mxu0 %v7645_v17  ;;  %v7685_v53 = vld [vmem:[%s7918_s7 + $0x780] sm:$0xff]   ;;  %v7688_v14 = vld [vmem:[%s7918_s7 + $0x708] sm:$0xff]   ;;  %v7690_v61 = vld [vmem:[%s7918_s7 + $0x750] sm:$0xff]  }
0x147e   : > { %7116 = vmatprep.subr.bf16.mxu1 %v7646_v18  ;;  %7138 = vmatprep.subr.bf16.mxu0 %v7647_v9  ;;  %v7689_v41 = vld [vmem:[%s7918_s7 + $0x788] sm:$0xff]   ;;  %v7693_v15 = vld [vmem:[%s7918_s7 + $0x790] sm:$0xff]   ;;  %v7694_v56 = vld [vmem:[%s7918_s7 + $0x758] sm:$0xff]  }
0x147f   : > { %v7695_v42 = vld [vmem:[%s7918_s7 + $0x7d8] sm:$0xff]   ;;  %v7698_v62 = vld [vmem:[%s7918_s7 + $0x760] sm:$0xff]   ;;  %v7702_v17 = vld [vmem:[%s7918_s7 + $0x768] sm:$0xff]  }
0x1480   : > { %v7696_v60 = vld [vmem:[%s7918_s7 + $0x718] sm:$0xff]   ;;  %v7701_v25 = vld [vmem:[%s7918_s7 + $0x7a0] sm:$0xff]   ;;  %v7703_v18 = vld [vmem:[%s7918_s7 + $0x7e8] sm:$0xff]  }
0x1481   : > { %7117 = vmatpush3.bf16.msra.mxu1 %v7648_v28  ;;  %7139 = vmatpush3.bf16.msra.mxu0 %v7649_v19  ;;  %v7697_v54 = vld [vmem:[%s7918_s7 + $0x798] sm:$0xff]   ;;  %v7704_v9 = vld [vmem:[%s7918_s7 + $0x728] sm:$0xff]   ;;  %v7706_v19 = vld [vmem:[%s7918_s7 + $0x770] sm:$0xff]  }
0x1482   : > { %7146 = vmatprep.subr.bf16.mxu1 %v7650_v38  ;;  %7168 = vmatprep.subr.bf16.mxu0 %v7651_v20  ;;  %v7705_v28 = vld [vmem:[%s7918_s7 + $0x7a8] sm:$0xff]   ;;  %v7707_v38 = vld [vmem:[%s7918_s7 + $0x7f0] sm:$0xff]  }
0x1483   : > { %v7708_v20 = vld [vmem:[%s7918_s7 + $0x730] sm:$0xff]  }
0x1484   : > { %5693 = vmatmul.mubr.bf16.vlgmr.msra.gmra.mrb[92].mxu1 %v8750_v48  ;;  %5734 = vmatmul.mubr.bf16.vlgmr.msra.gmra.mrb[92].mxu0 %v8752_v49  ;;  %v7659_v48 = vld [vmem:[%s7918_s7 + $0x6d0] sm:$0xff]  }
0x1485   : > { %7147 = vmatpush3.bf16.msra.mxu1 %v7652_v22  ;;  %5774 = vmatprep.mubr.bf16.mxu1 %v8774_v5  ;;  %v7660_v49 = vld [vmem:[%s7918_s7 + $0x610] sm:$0xff]   ;;  %v7663_v5 = vld [vmem:[%s7918_s7 + $0x6d8] sm:$0xff]  }
0x1486   : > { %7169 = vmatpush3.bf16.msra.mxu0 %v7653_v16  ;;  %5815 = vmatprep.mubr.bf16.mxu0 %v8776_v59  ;;  %v7664_v59 = vld [vmem:[%s7918_s7 + $0x618] sm:$0xff]   ;;  %v7709_v22 = vld [vmem:[%s7918_s7 + $0x7b0] sm:$0xff]  }
0x1487   : > { %7148 = vmatprep.subr.bf16.mxu1 %v7654_v24  ;;  %7170 = vmatprep.subr.bf16.mxu0 %v7655_v27  ;;  %v7710_v16 = vld [vmem:[%s7918_s7 + $0x778] sm:$0xff]  }
0x1488   : > { %v7711_v24 = vld [vmem:[%s7918_s7 + $0x7f8] sm:$0xff]  }
0x1489   : > { %7149 = vmatpush3.bf16.msra.mxu1 %v7656_v30  ;;  %v7712_v27 = vld [vmem:[%s7918_s7 + $0x738] sm:$0xff]  }
0x148a   : > { %7171 = vmatpush3.bf16.msra.mxu0 %v7657_v32  ;;  %7150 = vmatprep.subr.bf16.mxu1 %v7658_v33  ;;  %v7713_v30 = vld [vmem:[%s7918_s7 + $0x7b8] sm:$0xff]  }
0x148b   : > { %7172 = vmatprep.subr.bf16.mxu0 %v7659_v48  ;;  %v8875_v48 = vld [vmem:[%s7903_s23 + $0x8] sm:$0xff] }
0x148d   : > { %7151 = vmatpush3.bf16.msra.mxu1 %v7660_v49  ;;  %v4809_v49 = vrot.slane %v8875_v48, %v8239_v63 }
0x148e   : > { %7173 = vmatpush3.bf16.msra.mxu0 %v7661_v34  ;;  %7152 = vmatprep.subr.bf16.mxu1 %v7662_v35 }
0x148f   : > { %7174 = vmatprep.subr.bf16.mxu0 %v7663_v5 }
0x1491   : > { %7153 = vmatpush3.bf16.msra.mxu1 %v7664_v59 }
0x1492   : > { %7175 = vmatpush3.bf16.msra.mxu0 %v7665_v36  ;;  %7154 = vmatprep.subr.bf16.mxu1 %v7666_v13 }
0x1493   : > { %7176 = vmatprep.subr.bf16.mxu0 %v7667_v58 }
0x1495   : > { %7155 = vmatpush3.bf16.msra.mxu1 %v7668_v37 }
0x1496   : > { %7177 = vmatpush3.bf16.msra.mxu0 %v7669_v26  ;;  %7156 = vmatprep.subr.bf16.mxu1 %v7670_v39 }
0x1497   : > { %7178 = vmatprep.subr.bf16.mxu0 %v7671_v40 }
0x1499   : > { %7157 = vmatpush3.bf16.msra.mxu1 %v7672_v43 }
0x149a   : > { %7179 = vmatpush3.bf16.msra.mxu0 %v7673_v44  ;;  %7158 = vmatprep.subr.bf16.mxu1 %v7674_v45 }
0x149b   : > { %7180 = vmatprep.subr.bf16.mxu0 %v7675_v21 }
0x149d   : > { %7159 = vmatpush3.bf16.msra.mxu1 %v7676_v31 }
0x149e   : > { %7181 = vmatpush3.bf16.msra.mxu0 %v7677_v11  ;;  %7160 = vmatprep.subr.bf16.mxu1 %v7678_v23 }
0x149f   : > { %7182 = vmatprep.subr.bf16.mxu0 %v7679_v46 }
0x14a1   : > { %7161 = vmatpush3.bf16.msra.mxu1 %v7680_v29 }
0x14a2   : > { %7183 = vmatpush3.bf16.msra.mxu0 %v7681_v47  ;;  %7190 = vmatprep.subr.bf16.mxu1 %v7682_v50 }
0x14a3   : > { %7212 = vmatprep.subr.bf16.mxu0 %v7683_v51 }
0x14a4   : > { %5775 = vmatmul.mubr.bf16.vlgmr.msra.gmra.mrb[96].mxu1 %v8770_v57  ;;  %v7691_v57 = vld [vmem:[%s7918_s7 + $0x7d0] sm:$0xff]  }
0x14a5   : > { %5816 = vmatmul.mubr.bf16.vlgmr.msra.gmra.mrb[96].mxu0 %v8772_v10  ;;  %7191 = vmatpush3.bf16.msra.mxu1 %v7684_v52  ;;  %v7692_v10 = vld [vmem:[%s7918_s7 + $0x710] sm:$0xff]  }
0x14a6   : > { %5856 = vmatprep.mubr.bf16.mxu1 %v8790_v8  ;;  %7213 = vmatpush3.bf16.msra.mxu0 %v7685_v53  ;;  %v7699_v8 = vld [vmem:[%s7918_s7 + $0x7e0] sm:$0xff]  }
0x14a7   : > { %5897 = vmatprep.mubr.bf16.mxu0 %v8792_v12  ;;  %7192 = vmatprep.subr.bf16.mxu1 %v7686_v55  ;;  %v7700_v12 = vld [vmem:[%s7918_s7 + $0x720] sm:$0xff]  }
0x14a8   : > { %7214 = vmatprep.subr.bf16.mxu0 %v7687_v3 }
0x14a9   : > { %7193 = vmatpush3.bf16.msra.mxu1 %v7688_v14 }
0x14aa   : > { %7215 = vmatpush3.bf16.msra.mxu0 %v7689_v41  ;;  %7194 = vmatprep.subr.bf16.mxu1 %v7690_v61 }
0x14ab   : > { %7216 = vmatprep.subr.bf16.mxu0 %v7691_v57 }
0x14ad   : > { %7195 = vmatpush3.bf16.msra.mxu1 %v7692_v10 }
0x14ae   : > { %7217 = vmatpush3.bf16.msra.mxu0 %v7693_v15  ;;  %7196 = vmatprep.subr.bf16.mxu1 %v7694_v56 }
0x14af   : > { %7218 = vmatprep.subr.bf16.mxu0 %v7695_v42 }
0x14b1   : > { %7197 = vmatpush3.bf16.msra.mxu1 %v7696_v60 }
0x14b2   : > { %7219 = vmatpush3.bf16.msra.mxu0 %v7697_v54  ;;  %7198 = vmatprep.subr.bf16.mxu1 %v7698_v62 }
0x14b3   : > { %7220 = vmatprep.subr.bf16.mxu0 %v7699_v8 }
0x14b5   : > { %7199 = vmatpush3.bf16.msra.mxu1 %v7700_v12 }
0x14b6   : > { %7221 = vmatpush3.bf16.msra.mxu0 %v7701_v25  ;;  %7200 = vmatprep.subr.bf16.mxu1 %v7702_v17 }
0x14b7   : > { %7222 = vmatprep.subr.bf16.mxu0 %v7703_v18 }
0x14b9   : > { %7201 = vmatpush3.bf16.msra.mxu1 %v7704_v9 }
0x14ba   : > { %7223 = vmatpush3.bf16.msra.mxu0 %v7705_v28  ;;  %7202 = vmatprep.subr.bf16.mxu1 %v7706_v19 }
0x14bb   : > { %7224 = vmatprep.subr.bf16.mxu0 %v7707_v38 }
0x14bd   : > { %7203 = vmatpush3.bf16.msra.mxu1 %v7708_v20 }
0x14be   : > { %7225 = vmatpush3.bf16.msra.mxu0 %v7709_v22  ;;  %7204 = vmatprep.subr.bf16.mxu1 %v7710_v16 }
0x14bf   : > { %7226 = vmatprep.subr.bf16.mxu0 %v7711_v24 }
0x14c1   : > { %7205 = vmatpush3.bf16.msra.mxu1 %v7712_v27 }
0x14c2   : > { %7227 = vmatpush3.bf16.msra.mxu0 %v7713_v30 }
0x14c4   : > { %5857 = vmatmul.mubr.bf16.vlgmr.msra.gmra.mrb[100].mxu1 %v8786_v1 }
0x14c5   : > { %5898 = vmatmul.mubr.bf16.vlgmr.msra.gmra.mrb[100].mxu0 %v8788_v2 }
0x1537   : > { %v7074_v32 = vpop.f32.mrb[88].mxu1  ;;  %v7096_v33 = vpop.f32.mrb[88].mxu0 }
0x1538   : > { %v7075_v34 = vpop.f32.mrb[89].mxu1  ;;  %v7097_v35 = vpop.f32.mrb[89].mxu0 }
0x1539   : > { %v7076_v5 = vadd.f32 %v7075_v34, %v7074_v32  ;;  %v7098_v59 = vadd.f32 %v7097_v35, %v7096_v33  ;;  %v7077_v36 = vpop.f32.mrb[90].mxu1  ;;  %v7099_v13 = vpop.f32.mrb[90].mxu0 }
0x153a   : > { %v7078_v58 = vpop.f32.mrb[91].mxu1  ;;  %v7100_v37 = vpop.f32.mrb[91].mxu0 }
0x153b   : > { %v5613_v26 = vadd.f32 %v7076_v5, %v4809_v49  ;;  %v7079_v39 = vadd.f32 %v7078_v58, %v7077_v36  ;;  %v7101_v1 = vadd.f32 %v7100_v37, %v7099_v13 }
0x153d   : > { %v5654_v40 = vadd.f32 %v7098_v59, %v5613_v26  ;;  %v5616_v2 = vadd.f32 %v7079_v39, %v4809_v49 }
0x153f   : > { %v5657_v43 = vadd.f32 %v7101_v1, %v5616_v2 }
0x1557   : > { %v7118_v44 = vpop.f32.mrb[92].mxu1  ;;  %v7140_v45 = vpop.f32.mrb[92].mxu0 }
0x1558   : > { %v7119_v21 = vpop.f32.mrb[93].mxu1  ;;  %v7141_v31 = vpop.f32.mrb[93].mxu0 }
0x1559   : > { %v7120_v11 = vadd.f32 %v7119_v21, %v7118_v44  ;;  %v7142_v63 = vadd.f32 %v7141_v31, %v7140_v45  ;;  %v7121_v23 = vpop.f32.mrb[94].mxu1  ;;  %v7143_v46 = vpop.f32.mrb[94].mxu0 }
0x155a   : > { %v7122_v29 = vpop.f32.mrb[95].mxu1  ;;  %v7144_v47 = vpop.f32.mrb[95].mxu0 }
0x155b   : > { %v5695_v50 = vadd.f32 %v7120_v11, %v5654_v40  ;;  %v7123_v51 = vadd.f32 %v7122_v29, %v7121_v23  ;;  %v7145_v52 = vadd.f32 %v7144_v47, %v7143_v46  ;;  %v5937_v46 = vrot.slane %v8875_v48, %v8245_v4  ;;  %v7791_v4 = vld [vmem:[%s8923_s12] sm:$0xff] (!%p6794_p5)  }
0x155c   : > { %v5943_v47 = vrot.slane %v8875_v48, %v8242_v0  ;;  %v7792_v0 = vld [vmem:[%s8923_s12 + $0x8] sm:$0xff] (!%p6794_p5)  }
0x155d   : > { %v5736_v53 = vadd.f32 %v7142_v63, %v5695_v50  ;;  %v5698_v55 = vadd.f32 %v7123_v51, %v5657_v43 }
0x155f   : > { %v5739_v3 = vadd.f32 %v7145_v52, %v5698_v55 }
0x1577   : > { %v7162_v14 = vpop.f32.mrb[96].mxu1 }
0x1578   : > { %v7184_v41 = vpop.f32.mrb[96].mxu0  ;;  %v7163_v61 = vpop.f32.mrb[97].mxu1 }
0x1579   : > { %v7164_v57 = vadd.f32 %v7163_v61, %v7162_v14  ;;  %v7185_v10 = vpop.f32.mrb[97].mxu0  ;;  %v7165_v15 = vpop.f32.mrb[98].mxu1  ;;  %v6795_v61 = vld [vmem:[%s8933_s13] ss:$0 sm:$0xff] (!%p6794_p5) }
0x157a   : > { %v7186_v56 = vadd.f32 %v7185_v10, %v7184_v41  ;;  %v7187_v42 = vpop.f32.mrb[98].mxu0  ;;  %v7166_v60 = vpop.f32.mrb[99].mxu1  ;;  %v7807_v41 = vmov (!%p6794_p5), 0.0  }
0x157b   : > { %v5777_v54 = vadd.f32 %v7164_v57, %v5736_v53  ;;  %v7167_v62 = vadd.f32 %v7166_v60, %v7165_v15  ;;  %v7188_v8 = vpop.f32.mrb[99].mxu0  ;;  %7413 = vmatprep.subr.bf16.mxu0 (!%p6794_p5), %v7807_v41  ;;  %7417 = vmatprep.mubr.msk.bf16.mxu0 (!%p6794_p5), %vm7808_vm4, %v7807_v41 }
0x157c   : > { %v7189_v12 = vadd.f32 %v7188_v8, %v7187_v42  ;;  %7414 = vmatpush3.bf16.msra.mxu0 (!%p6794_p5), %v7791_v4 }
0x157d   : > { %v5818_v25 = vadd.f32 %v7186_v56, %v5777_v54  ;;  %v5780_v17 = vadd.f32 %v7167_v62, %v5739_v3  ;;  %7415 = vmatprep.subr.bf16.mxu0 (!%p6794_p5), %v7807_v41 }
0x157f   : > { %v5821_v18 = vadd.f32 %v7189_v12, %v5780_v17 }
0x1580   : > { %7416 = vmatpush3.bf16.msra.mxu0 (!%p6794_p5), %v7792_v0 }
0x1597   : > { %v7206_v9 = vpop.f32.mrb[100].mxu1 }
0x1598   : > { %v7228_v28 = vpop.f32.mrb[100].mxu0  ;;  %v7207_v19 = vpop.f32.mrb[101].mxu1 }
0x1599   : > { %v7208_v38 = vadd.f32 %v7207_v19, %v7206_v9  ;;  %v7229_v20 = vpop.f32.mrb[101].mxu0  ;;  %v7209_v22 = vpop.f32.mrb[102].mxu1 }
0x159a   : > { %v7230_v16 = vadd.f32 %v7229_v20, %v7228_v28  ;;  %v7231_v24 = vpop.f32.mrb[102].mxu0  ;;  %v7210_v27 = vpop.f32.mrb[103].mxu1 }
0x159b   : > { %v5859_v30 = vadd.f32 %v7208_v38, %v5818_v25  ;;  %v7211_v32 = vadd.f32 %v7210_v27, %v7209_v22  ;;  %v7232_v33 = vpop.f32.mrb[103].mxu0 }
0x159c   : > { %v7233_v49 = vadd.f32 %v7232_v33, %v7231_v24 }
0x159d   : > { %v5900_v34 = vadd.f32 %v7230_v16, %v5859_v30  ;;  %v5862_v35 = vadd.f32 %v7211_v32, %v5821_v18 }
0x159f   : > { %v5903_v5 = vadd.f32 %v7233_v49, %v5862_v35  ;;  %v5906_v59 = vadd.f32 %v5900_v34, %v8642_v6 }
0x15a1   : > { %v5908_v36 = vsel %vm932_vm2, %v5906_v59, 0.0  ;;  %v5907_v13 = vadd.f32 %v5903_v5, %v8644_v7 }
0x15a2   : > { %5909 = vadd.xlane.f32.xlu0 %v5908_v36 }
0x15a3   : > { %v5911_v58 = vsel %vm932_vm2, %v5907_v13, 0.0 }
0x15a6   : > { %5912 = vadd.xlane.f32.xlu0 %v5911_v58 }
0x162f   : > { %v5910_v37 = vpop.xlane.xlu0 %5909 }
0x1630   : > { %v5914_v26 = vmul.f32 0.03125, %v5910_v37 }
0x1632   : > { %v5916_v39 = vsub.f32 %v5906_v59, %v5914_v26 }
0x1633   : > { %v5913_v1 = vpop.xlane.xlu0 %5912 }
0x1634   : > { %v5915_v40 = vmul.f32 0.03125, %v5913_v1  ;;  %v5918_v2 = vmul.f32 %v5916_v39, %v5916_v39 }
0x1636   : > { %v5917_v43 = vsub.f32 %v5907_v13, %v5915_v40  ;;  %v5920_v44 = vsel %vm932_vm2, %v5918_v2, 0.0 }
0x1637   : > { %5921 = vadd.xlane.f32.xlu0 %v5920_v44 }
0x1638   : > { %v5919_v45 = vmul.f32 %v5917_v43, %v5917_v43 }
0x163a   : > { %v5923_v6 = vsel %vm932_vm2, %v5919_v45, 0.0 }
0x163b   : > { %5924 = vadd.xlane.f32.xlu1 %v5923_v6 }
0x16c4   : > { %v5922_v21 = vpop.xlane.xlu0 %5921 }
0x16c5   : > { %v5926_v7 = vmul.f32 0.03125, %v5922_v21 }
0x16c7   : > { %v5928_v31 = vadd.f32 1e-05, %v5926_v7 }
0x16c8   : > { %v5925_v11 = vpop.xlane.xlu1 %5924 }
0x16c9   : > { %7742 = vrsqrt.f32 %v5928_v31  ;;  %v5927_v63 = vmul.f32 0.03125, %v5925_v11 }
0x16cb   : > { %v5929_v23 = vadd.f32 1e-05, %v5927_v63 }
0x16cd   : > { %7744 = vrsqrt.f32 %v5929_v23 }
0x16d3   : > { %v7743_v29 = vpop.eup %7742 }
0x16d4   : > { %v5932_v50 = vmul.f32 %v7743_v29, %v5916_v39 }
0x16d6   : > { %v5938_v51 = vmul.f32 %v5937_v46, %v5932_v50 }
0x16d7   : > { %v7745_v52 = vpop.eup %7744 }
0x16d8   : > { %v5944_v53 = vadd.f32 %v5943_v47, %v5938_v51  ;;  %v5933_v55 = vmul.f32 %v7745_v52, %v5917_v43  ;;  %5951 = sbr.rel (%p6794_p5) target bundleno = 6073 (0x17b9), region = 84 }
0x16da   : > { %5946 = vst.msk [vmem:[#allocation2] sm:$0xff] %vm932_vm2, %v5944_v53  ;;  %v5939_v3 = vmul.f32 %v5937_v46, %v5933_v55 }
0x16dc   : > { %v5945_v14 = vadd.f32 %v5943_v47, %v5939_v3 }
0x16de   : > { %5947 = vst.msk [vmem:[#allocation2 + $0x8] sm:$0xff] %vm932_vm2, %v5945_v14  ;;  %v5956_v48 = vpack.c.bf16 (!%p6794_p5), %v5945_v14, %v5944_v53 }
0x16e0   : > { %7418 = vmatmul.mubr.msk.bf16.vlgmr.msra.gmra.mrb[0].mxu0 %vm932_vm2, %v5956_v48 }
0x17b3   : > { %v6013_v57 = vpop.f32.mrb[0].mxu0 }
0x17b4   : > { %v6014_v10 = vadd.f32 %v6795_v61, %v6013_v57  ;;  %v7419_v15 = vpop.f32.mrb[1].mxu0 }
0x17b5   : > { %v6016_v56 = vpop.f32.mrb[2].mxu0 }
0x17b6   : > { %6020 = vst [vmem:[%s8934_s27] sm:$0xff] %v6014_v10  ;;  %v6017_v42 = vadd.f32 %v6795_v61, %v6016_v56  ;;  %v7420_v60 = vpop.f32.mrb[3].mxu0 }
0x17b8   : > { %6021 = vst [vmem:[%s8934_s27 + $0x8] sm:$0xff] %v6017_v42 }
0x17b9 PF: > { %s8935_s18 = sld [smem:[#allocation3_spill]] }
0x17bf   : > { %s24_s29 = sadd.s32 1, %s8935_s18  }
0x17c0   : > { %p21_p6 = scmp.ge.s32.totalorder %s24_s29, 5  }
0x17c2   :  { %23 = sbr.rel (!%p21_p6) target bundleno = 4 (0x4), region = 127 }

</bundles_post_ra>
